<compile_context>
chip_gen: v6e
topology: v6e:2x2x1
jax: 0.10.0
libtpu: 0.0.40
codegen_flags: <defaults>
</compile_context>

<pallas_src>
import functools

import jax
import jax.numpy as jnp
from jax.experimental import pallas as pl
from jax.experimental.pallas import tpu as pltpu


def mha_kernel(x_ref, w_qkv_ref, b_qkv_ref, w_proj_ref, b_proj_ref,
               o_ref, acc_ref, ho_ref, *, n_valid, group_heads, head_dim, scale):
    """One grid step = (bb batch elements) x (one group of G heads).

    The head-group axis is a reduction: each group's output-projection
    contribution is accumulated into a persistent f32 VMEM scratch and the
    output block is written once on the last group (pl.when init/finalize).
    """
    G, d = group_heads, head_dim
    GD = G * d
    bb, Np, E = x_ref.shape

    gi = pl.program_id(1)

    @pl.when(gi == 0)
    def _init():
        acc_ref[...] = jnp.zeros_like(acc_ref)

    # Fused QKV projection for the whole (bb, G-head) block: one wide matmul
    # [bb*Np, E] @ [E, 3*G*d], bf16 operands, f32 accumulation.
    xf = x_ref[...].reshape(bb * Np, E)                          # bf16
    qkv = jnp.dot(xf, w_qkv_ref[0], preferred_element_type=jnp.float32)
    qkv = qkv + b_qkv_ref[0]                                     # [bb*Np, 3*G*d] f32

    # Key-padding mask (only materialised when the wrapper actually padded N).
    if n_valid < Np:
        key_ids = jax.lax.broadcasted_iota(jnp.int32, (1, Np), 1)
        key_mask = jnp.where(key_ids < n_valid, 0.0, -1e30).astype(jnp.float32)

    # Per-(batch element, head) attention.  The score / P@V matmuls are
    # intrinsically K=d; the heavy projections above/below are the wide ones.
    for b in range(bb):
        rows = qkv[b * Np:(b + 1) * Np, :]                       # [Np, 3*G*d]
        for g in range(G):
            q = rows[:, g * d:(g + 1) * d]                       # [Np, d]
            k = rows[:, GD + g * d:GD + (g + 1) * d]             # [Np, d]
            v = rows[:, 2 * GD + g * d:2 * GD + (g + 1) * d]     # [Np, d]

            # Scores: contract the last dims directly (no k.T relayout).
            s = jax.lax.dot_general(
                q.astype(jnp.bfloat16), k.astype(jnp.bfloat16),
                dimension_numbers=(((1,), (1,)), ((), ())),
                preferred_element_type=jnp.float32)              # [Np, Np] f32
            if n_valid < Np:
                s = s + key_mask                                 # mask padded keys

            # TODO(synk): optional `mask` argument (masked_fill before softmax)
            # of the PyTorch module is not implemented (mask=None path only).

            # Reference semantics: softmax over keys FIRST, then divide by
            # sqrt(embedding_dim).  Fold the 1/sqrt(E) into the denominator;
            # exact normalisation (off the MXU critical path) for f32 parity.
            s = s - jnp.max(s, axis=-1, keepdims=True)
            p = jnp.exp(s)
            p = p / (jnp.sum(p, axis=-1, keepdims=True) * scale)

            ho = jnp.dot(p.astype(jnp.bfloat16), v.astype(jnp.bfloat16),
                         preferred_element_type=jnp.float32)     # [Np, d] f32
            ho_ref[b * Np:(b + 1) * Np, g * d:(g + 1) * d] = ho.astype(jnp.bfloat16)

    # Output projection for all bb batch elements and G heads at once:
    # [bb*Np, G*d] @ [G*d, E]  (deep contraction, full MXU columns).
    acc_ref[...] += jnp.dot(ho_ref[...], w_proj_ref[0],
                            preferred_element_type=jnp.float32)

    @pl.when(gi == pl.num_programs(1) - 1)
    def _finalize():
        out = acc_ref[...] + b_proj_ref[...]
        o_ref[...] = out.reshape(bb, Np, E).astype(o_ref.dtype)


def multi_head_attention(x, wqkv, bqkv, wproj, bproj, num_heads,
                         bb_target=4, mxu_width=256):
    """x: [B, N, E]; wqkv: [E, 3E] ('(h d qkv)' column order); wproj: [E, E]."""
    B, N, E = x.shape
    H = num_heads
    assert E % H == 0, "embedding_dim must be divisible by num_heads"
    d = E // H

    # ---- head grouping: G heads per grid step so that G*d ~ MXU width ------
    # (v6e/v7x MXU is 256 wide; on v5e pass mxu_width=128.)
    G = 1
    for cand in range(1, H + 1):
        if H % cand == 0 and cand * d <= mxu_width:
            G = cand
    Hg = H // G
    GD = G * d

    # ---- pad sequence length to a lane-friendly multiple of 128 ------------
    Np = ((N + 127) // 128) * 128

    # ---- batch blocking, sized for VMEM and >= 2 parallel blocks (v7x) -----
    x_bytes = jnp.dtype(x.dtype).itemsize

    def vmem_estimate(bb):
        xin = 2 * bb * Np * E * 2            # double-buffered bf16 input block
        outb = 2 * bb * Np * E * x_bytes     # double-buffered output block
        w_qkv_b = 2 * E * 3 * GD * 2         # double-buffered fused QKV slab
        w_p_b = 2 * GD * E * 2               # double-buffered proj slab
        acc = bb * Np * E * 4                # f32 accumulator scratch
        ho = bb * Np * GD * 2                # bf16 head-output scratch
        tmp = bb * Np * 3 * GD * 4           # f32 fused-QKV intermediate
        return xin + outb + w_qkv_b + w_p_b + acc + ho + tmp

    bb = 1
    for cand in range(1, B + 1):
        if B % cand or cand > bb_target:
            continue
        if B >= 2 and B // cand < 2:         # keep >=2 'parallel' blocks (v7x: 2 TCs)
            continue
        if vmem_estimate(cand) > 24 * 1024 * 1024:
            continue
        bb = cand

    # ---- repack the fused qkv weight ('(h d qkv)' columns) into per-group --
    # slabs [Hg, E, 3*G*d] = [ q heads | k heads | v heads ] so head selection
    # happens at DMA level and the in-kernel QKV projection is one wide matmul.
    w4 = wqkv.reshape(E, H, d, 3)            # columns factor as (h, d, qkv)

    def group_w(w):                          # w: [E, H, d] -> [Hg, E, G*d]
        w = w.reshape(E, Hg, G, d)
        w = jnp.transpose(w, (1, 0, 2, 3))
        return w.reshape(Hg, E, GD)

    w_slab = jnp.concatenate(
        [group_w(w4[..., 0]), group_w(w4[..., 1]), group_w(w4[..., 2])],
        axis=-1).astype(jnp.bfloat16)        # [Hg, E, 3*G*d]

    b4 = bqkv.reshape(H, d, 3)
    b_slab = jnp.concatenate(
        [b4[..., 0].reshape(Hg, GD), b4[..., 1].reshape(Hg, GD),
         b4[..., 2].reshape(Hg, GD)],
        axis=-1).reshape(Hg, 1, 3 * GD).astype(jnp.float32)   # [Hg, 1, 3*G*d]

    wp_slab = wproj.reshape(Hg, G, d, E).reshape(Hg, GD, E).astype(jnp.bfloat16)
    bp_2d = bproj.reshape(1, E).astype(jnp.float32)

    # ---- pad + cast the activations -----------------------------------------
    x_p = x
    if Np != N:
        x_p = jnp.pad(x, ((0, 0), (0, Np - N), (0, 0)))
    x_p = x_p.astype(jnp.bfloat16)

    grid_spec = pltpu.PrefetchScalarGridSpec(
        num_scalar_prefetch=0,
        grid=(B // bb, Hg),                               # head-group axis = reduction
        in_specs=[
            pl.BlockSpec((bb, Np, E), lambda b, h: (b, 0, 0)),     # x (bf16)
            pl.BlockSpec((1, E, 3 * GD), lambda b, h: (h, 0, 0)),  # fused QKV slab
            pl.BlockSpec((1, 1, 3 * GD), lambda b, h: (h, 0, 0)),  # fused QKV bias
            pl.BlockSpec((1, GD, E), lambda b, h: (h, 0, 0)),      # proj slab
            pl.BlockSpec((1, E), lambda b, h: (0, 0)),             # proj bias
        ],
        out_specs=pl.BlockSpec((bb, Np, E), lambda b, h: (b, 0, 0)),
        scratch_shapes=[
            pltpu.VMEM((bb * Np, E), jnp.float32),     # output-proj accumulator
            pltpu.VMEM((bb * Np, GD), jnp.bfloat16),   # staged head outputs
        ],
    )

    out = pl.pallas_call(
        functools.partial(mha_kernel, n_valid=N, group_heads=G, head_dim=d,
                          scale=float(E) ** 0.5),
        out_shape=jax.ShapeDtypeStruct((B, Np, E), x.dtype),
        grid_spec=grid_spec,
        compiler_params=pltpu.CompilerParams(
            dimension_semantics=("parallel", "arbitrary"),
            vmem_limit_bytes=32 * 1024 * 1024),
    )(x_p, w_slab, b_slab, wp_slab, bp_2d)

    return out[:, :N, :]


def reference_mha(x, wqkv, bqkv, wproj, bproj, num_heads):
    """Pure-JAX (f32) replica of the PyTorch forward (for verification)."""
    B, N, E = x.shape
    hd = E // num_heads
    qkv = x @ wqkv + bqkv                                   # [B, N, 3E]
    qkv = qkv.reshape(B, N, num_heads, hd, 3)               # (h d qkv)
    qkv = jnp.transpose(qkv, (4, 0, 2, 1, 3))               # qkv b h n d
    q, k, v = qkv[0], qkv[1], qkv[2]
    att = jnp.einsum('bhqd,bhkd->bhqk', q, k)
    att = jax.nn.softmax(att, axis=-1) / (E ** 0.5)
    out = jnp.einsum('bhnk,bhkd->bhnd', att, v)
    out = jnp.transpose(out, (0, 2, 1, 3)).reshape(B, N, E)
    return out @ wproj + bproj


if __name__ == "__main__":
    # Small demo shapes for correctness; the tiling/grouping logic is
    # shape-generic (ViT-Base: N=197->256, E=768, H=12, G=4, bb auto-sized).
    B, N, E, H = 2, 8, 32, 4

    key = jax.random.PRNGKey(0)
    kx, kw1, kb1, kw2, kb2 = jax.random.split(key, 5)
    x = jax.random.normal(kx, (B, N, E), dtype=jnp.float32)
    wqkv = jax.random.normal(kw1, (E, 3 * E), dtype=jnp.float32) * 0.05
    bqkv = jax.random.normal(kb1, (3 * E,), dtype=jnp.float32) * 0.05
    wproj = jax.random.normal(kw2, (E, E), dtype=jnp.float32) * 0.05
    bproj = jax.random.normal(kb2, (E,), dtype=jnp.float32) * 0.05

    out = multi_head_attention(x, wqkv, bqkv, wproj, bproj, num_heads=H)
    out = jax.block_until_ready(out)

    ref = reference_mha(x, wqkv, bqkv, wproj, bproj, num_heads=H)
    assert out.shape == (B, N, E)
    # Tolerance: bf16 MXU operands (softmax normalisation is exact f32).
    assert jnp.allclose(out, ref, atol=2e-2, rtol=2e-2), "mismatch vs reference"

    print("KERNEL_OK")
</pallas_src>

<mosaic_0001>
module attributes {stable_mosaic.version = 11 : i64} {
  func.func @mha_kernel(%arg0: i32, %arg1: i32, %arg2: memref<1x128x32xbf16, #tpu.memory_space<vmem>>, %arg3: memref<1x32x96xbf16, #tpu.memory_space<vmem>>, %arg4: memref<1x1x96xf32, #tpu.memory_space<vmem>>, %arg5: memref<1x32x32xbf16, #tpu.memory_space<vmem>>, %arg6: memref<1x32xf32, #tpu.memory_space<vmem>>, %arg7: memref<1x128x32xf32, #tpu.memory_space<vmem>>, %arg8: memref<128x32xf32, #tpu.memory_space<vmem>>, %arg9: memref<128x32xbf16, #tpu.memory_space<vmem>>) attributes {dimension_semantics = [#tpu.dimension_semantics<parallel>, #tpu.dimension_semantics<arbitrary>], iteration_bounds = array<i64: 2, 1>, scalar_prefetch = 0 : i64, scratch_operands = 2 : i64, tpu.core_type = #tpu.core_type<tc>, window_params = [{transform_indices = @transform_0, window_bounds = array<i64: 1, 128, 32>}, {transform_indices = @transform_1, window_bounds = array<i64: 1, 32, 96>}, {transform_indices = @transform_2, window_bounds = array<i64: 1, 1, 96>}, {transform_indices = @transform_3, window_bounds = array<i64: 1, 32, 32>}, {pipeline_mode = #tpu.pipeline_mode<synchronous>, transform_indices = @transform_4, window_bounds = array<i64: 1, 32>}, {transform_indices = @transform_5, window_bounds = array<i64: 1, 128, 32>}]} {
    %c0_i32 = arith.constant 0 : i32
    %0 = arith.cmpi eq, %arg1, %c0_i32 : i32
    %1 = arith.extui %0 : i1 to i32
    %c0_i32_0 = arith.constant 0 : i32
    %2 = arith.cmpi ne, %1, %c0_i32_0 : i32
    scf.if %2 {
      %cst_48 = arith.constant 0.000000e+00 : f32
      %124 = vector.broadcast %cst_48 : f32 to vector<128x32xf32>
      %c0_49 = arith.constant 0 : index
      %c0_50 = arith.constant 0 : index
      %125 = vector.load %arg8[%c0_49, %c0_50] : memref<128x32xf32, #tpu.memory_space<vmem>>, vector<128x32xf32>
      tpu.vector_store %arg8[%c0_49, %c0_50], %124 {strides = array<i32>} : memref<128x32xf32, #tpu.memory_space<vmem>>, vector<128x32xf32>,
    } else {
    }
    %c0 = arith.constant 0 : index
    %c0_1 = arith.constant 0 : index
    %c0_2 = arith.constant 0 : index
    %3 = vector.load %arg2[%c0, %c0_1, %c0_2] : memref<1x128x32xbf16, #tpu.memory_space<vmem>>, vector<1x128x32xbf16>
    %4 = vector.shape_cast %3 : vector<1x128x32xbf16> to vector<128x32xbf16>
    %c0_3 = arith.constant 0 : index
    %c0_4 = arith.constant 0 : index
    %c0_5 = arith.constant 0 : index
    %5 = vector.load %arg3[%c0_3, %c0_4, %c0_5] : memref<1x32x96xbf16, #tpu.memory_space<vmem>>, vector<1x32x96xbf16>
    %6 = vector.shape_cast %5 : vector<1x32x96xbf16> to vector<32x96xbf16>
    %cst = arith.constant dense<0.000000e+00> : vector<128x96xf32>
    %7 = tpu.matmul %4, %6, %cst {dimension_numbers = #tpu.dot_dimension_numbers<[1], [0], [0], [1], [0, 0, 1, 1], [], []>} : vector<128x32xbf16>, vector<32x96xbf16>, vector<128x96xf32> -> vector<128x96xf32>
    %c0_6 = arith.constant 0 : index
    %c0_7 = arith.constant 0 : index
    %c0_8 = arith.constant 0 : index
    %8 = vector.load %arg4[%c0_6, %c0_7, %c0_8] : memref<1x1x96xf32, #tpu.memory_space<vmem>>, vector<1x1x96xf32>
    %9 = vector.shape_cast %8 : vector<1x1x96xf32> to vector<1x96xf32>
    %10 = vector.broadcast %9 : vector<1x96xf32> to vector<128x96xf32>
    %11 = arith.addf %7, %10 : vector<128x96xf32>
    %12 = tpu.iota {dimensions = array<i32: 1>} : vector<1x128xi32>
    %c8_i32 = arith.constant 8 : i32
    %13 = vector.broadcast %c8_i32 : i32 to vector<1x128xi32>
    %14 = arith.cmpi slt, %12, %13 : vector<1x128xi32>
    %cst_9 = arith.constant 0.000000e+00 : f32
    %cst_10 = arith.constant -1.000000e+30 : f32
    %15 = vector.broadcast %cst_9 : f32 to vector<1x128xf32>
    %16 = vector.broadcast %cst_10 : f32 to vector<1x128xf32>
    %17 = arith.select %14, %15, %16 : vector<1x128xi1>, vector<1x128xf32>
    %18 = vector.extract_strided_slice %11 {offsets = [0, 0], sizes = [128, 8], strides = [1, 1]} : vector<128x96xf32> to vector<128x8xf32>
    %19 = vector.extract_strided_slice %11 {offsets = [0, 32], sizes = [128, 8], strides = [1, 1]} : vector<128x96xf32> to vector<128x8xf32>
    %20 = vector.extract_strided_slice %11 {offsets = [0, 64], sizes = [128, 8], strides = [1, 1]} : vector<128x96xf32> to vector<128x8xf32>
    %21 = arith.truncf %18 : vector<128x8xf32> to vector<128x8xbf16>
    %22 = arith.truncf %19 : vector<128x8xf32> to vector<128x8xbf16>
    %cst_11 = arith.constant dense<0.000000e+00> : vector<128x128xf32>
    %23 = tpu.matmul %21, %22, %cst_11 {dimension_numbers = #tpu.dot_dimension_numbers<[1], [1], [0], [0], [0, 0, 1, 0], [], []>} : vector<128x8xbf16>, vector<128x8xbf16>, vector<128x128xf32> -> vector<128x128xf32>
    %24 = vector.broadcast %17 : vector<1x128xf32> to vector<128x128xf32>
    %25 = arith.addf %23, %24 : vector<128x128xf32>
    %cst_12 = arith.constant dense<0xFF800000> : vector<128xf32>
    %26 = vector.multi_reduction <maximumf>, %25, %cst_12 [1] : vector<128x128xf32> to vector<128xf32>
    %27 = vector.shape_cast %26 : vector<128xf32> to vector<128x1xf32>
    %28 = vector.broadcast %27 : vector<128x1xf32> to vector<128x128xf32>
    %29 = arith.subf %25, %28 : vector<128x128xf32>
    %30 = math.exp %29 : vector<128x128xf32>
    %cst_13 = arith.constant dense<0.000000e+00> : vector<128xf32>
    %31 = vector.multi_reduction <add>, %30, %cst_13 [1] : vector<128x128xf32> to vector<128xf32>
    %32 = vector.shape_cast %31 : vector<128xf32> to vector<128x1xf32>
    %cst_14 = arith.constant 5.65685415 : f32
    %33 = vector.broadcast %cst_14 : f32 to vector<128x1xf32>
    %34 = arith.mulf %32, %33 : vector<128x1xf32>
    %35 = vector.broadcast %34 : vector<128x1xf32> to vector<128x128xf32>
    %36 = arith.divf %30, %35 : vector<128x128xf32>
    %37 = arith.truncf %36 : vector<128x128xf32> to vector<128x128xbf16>
    %38 = arith.truncf %20 : vector<128x8xf32> to vector<128x8xbf16>
    %cst_15 = arith.constant dense<0.000000e+00> : vector<128x8xf32>
    %39 = tpu.matmul %37, %38, %cst_15 {dimension_numbers = #tpu.dot_dimension_numbers<[1], [0], [0], [1], [0, 0, 1, 1], [], []>} : vector<128x128xbf16>, vector<128x8xbf16>, vector<128x8xf32> -> vector<128x8xf32>
    %40 = arith.truncf %39 : vector<128x8xf32> to vector<128x8xbf16>
    %c0_16 = arith.constant 0 : index
    %c0_17 = arith.constant 0 : index
    %41 = vector.load %arg9[%c0_16, %c0_17] : memref<128x32xbf16, #tpu.memory_space<vmem>>, vector<128x8xbf16>
    tpu.vector_store %arg9[%c0_16, %c0_17], %40 {strides = array<i32>} : memref<128x32xbf16, #tpu.memory_space<vmem>>, vector<128x8xbf16>,
    %42 = vector.extract_strided_slice %11 {offsets = [0, 8], sizes = [128, 8], strides = [1, 1]} : vector<128x96xf32> to vector<128x8xf32>
    %43 = vector.extract_strided_slice %11 {offsets = [0, 40], sizes = [128, 8], strides = [1, 1]} : vector<128x96xf32> to vector<128x8xf32>
    %44 = vector.extract_strided_slice %11 {offsets = [0, 72], sizes = [128, 8], strides = [1, 1]} : vector<128x96xf32> to vector<128x8xf32>
    %45 = arith.truncf %42 : vector<128x8xf32> to vector<128x8xbf16>
    %46 = arith.truncf %43 : vector<128x8xf32> to vector<128x8xbf16>
    %cst_18 = arith.constant dense<0.000000e+00> : vector<128x128xf32>
    %47 = tpu.matmul %45, %46, %cst_18 {dimension_numbers = #tpu.dot_dimension_numbers<[1], [1], [0], [0], [0, 0, 1, 0], [], []>} : vector<128x8xbf16>, vector<128x8xbf16>, vector<128x128xf32> -> vector<128x128xf32>
    %48 = vector.broadcast %17 : vector<1x128xf32> to vector<128x128xf32>
    %49 = arith.addf %47, %48 : vector<128x128xf32>
    %cst_19 = arith.constant dense<0xFF800000> : vector<128xf32>
    %50 = vector.multi_reduction <maximumf>, %49, %cst_19 [1] : vector<128x128xf32> to vector<128xf32>
    %51 = vector.shape_cast %50 : vector<128xf32> to vector<128x1xf32>
    %52 = vector.broadcast %51 : vector<128x1xf32> to vector<128x128xf32>
    %53 = arith.subf %49, %52 : vector<128x128xf32>
    %54 = math.exp %53 : vector<128x128xf32>
    %cst_20 = arith.constant dense<0.000000e+00> : vector<128xf32>
    %55 = vector.multi_reduction <add>, %54, %cst_20 [1] : vector<128x128xf32> to vector<128xf32>
    %56 = vector.shape_cast %55 : vector<128xf32> to vector<128x1xf32>
    %cst_21 = arith.constant 5.65685415 : f32
    %57 = vector.broadcast %cst_21 : f32 to vector<128x1xf32>
    %58 = arith.mulf %56, %57 : vector<128x1xf32>
    %59 = vector.broadcast %58 : vector<128x1xf32> to vector<128x128xf32>
    %60 = arith.divf %54, %59 : vector<128x128xf32>
    %61 = arith.truncf %60 : vector<128x128xf32> to vector<128x128xbf16>
    %62 = arith.truncf %44 : vector<128x8xf32> to vector<128x8xbf16>
    %cst_22 = arith.constant dense<0.000000e+00> : vector<128x8xf32>
    %63 = tpu.matmul %61, %62, %cst_22 {dimension_numbers = #tpu.dot_dimension_numbers<[1], [0], [0], [1], [0, 0, 1, 1], [], []>} : vector<128x128xbf16>, vector<128x8xbf16>, vector<128x8xf32> -> vector<128x8xf32>
    %64 = arith.truncf %63 : vector<128x8xf32> to vector<128x8xbf16>
    %c0_23 = arith.constant 0 : index
    %c8 = arith.constant 8 : index
    %65 = vector.load %arg9[%c0_23, %c8] : memref<128x32xbf16, #tpu.memory_space<vmem>>, vector<128x8xbf16>
    tpu.vector_store %arg9[%c0_23, %c8], %64 {strides = array<i32>} : memref<128x32xbf16, #tpu.memory_space<vmem>>, vector<128x8xbf16>,
    %66 = vector.extract_strided_slice %11 {offsets = [0, 16], sizes = [128, 8], strides = [1, 1]} : vector<128x96xf32> to vector<128x8xf32>
    %67 = vector.extract_strided_slice %11 {offsets = [0, 48], sizes = [128, 8], strides = [1, 1]} : vector<128x96xf32> to vector<128x8xf32>
    %68 = vector.extract_strided_slice %11 {offsets = [0, 80], sizes = [128, 8], strides = [1, 1]} : vector<128x96xf32> to vector<128x8xf32>
    %69 = arith.truncf %66 : vector<128x8xf32> to vector<128x8xbf16>
    %70 = arith.truncf %67 : vector<128x8xf32> to vector<128x8xbf16>
    %cst_24 = arith.constant dense<0.000000e+00> : vector<128x128xf32>
    %71 = tpu.matmul %69, %70, %cst_24 {dimension_numbers = #tpu.dot_dimension_numbers<[1], [1], [0], [0], [0, 0, 1, 0], [], []>} : vector<128x8xbf16>, vector<128x8xbf16>, vector<128x128xf32> -> vector<128x128xf32>
    %72 = vector.broadcast %17 : vector<1x128xf32> to vector<128x128xf32>
    %73 = arith.addf %71, %72 : vector<128x128xf32>
    %cst_25 = arith.constant dense<0xFF800000> : vector<128xf32>
    %74 = vector.multi_reduction <maximumf>, %73, %cst_25 [1] : vector<128x128xf32> to vector<128xf32>
    %75 = vector.shape_cast %74 : vector<128xf32> to vector<128x1xf32>
    %76 = vector.broadcast %75 : vector<128x1xf32> to vector<128x128xf32>
    %77 = arith.subf %73, %76 : vector<128x128xf32>
    %78 = math.exp %77 : vector<128x128xf32>
    %cst_26 = arith.constant dense<0.000000e+00> : vector<128xf32>
    %79 = vector.multi_reduction <add>, %78, %cst_26 [1] : vector<128x128xf32> to vector<128xf32>
    %80 = vector.shape_cast %79 : vector<128xf32> to vector<128x1xf32>
    %cst_27 = arith.constant 5.65685415 : f32
    %81 = vector.broadcast %cst_27 : f32 to vector<128x1xf32>
    %82 = arith.mulf %80, %81 : vector<128x1xf32>
    %83 = vector.broadcast %82 : vector<128x1xf32> to vector<128x128xf32>
    %84 = arith.divf %78, %83 : vector<128x128xf32>
    %85 = arith.truncf %84 : vector<128x128xf32> to vector<128x128xbf16>
    %86 = arith.truncf %68 : vector<128x8xf32> to vector<128x8xbf16>
    %cst_28 = arith.constant dense<0.000000e+00> : vector<128x8xf32>
    %87 = tpu.matmul %85, %86, %cst_28 {dimension_numbers = #tpu.dot_dimension_numbers<[1], [0], [0], [1], [0, 0, 1, 1], [], []>} : vector<128x128xbf16>, vector<128x8xbf16>, vector<128x8xf32> -> vector<128x8xf32>
    %88 = arith.truncf %87 : vector<128x8xf32> to vector<128x8xbf16>
    %c0_29 = arith.constant 0 : index
    %c16 = arith.constant 16 : index
    %89 = vector.load %arg9[%c0_29, %c16] : memref<128x32xbf16, #tpu.memory_space<vmem>>, vector<128x8xbf16>
    tpu.vector_store %arg9[%c0_29, %c16], %88 {strides = array<i32>} : memref<128x32xbf16, #tpu.memory_space<vmem>>, vector<128x8xbf16>,
    %90 = vector.extract_strided_slice %11 {offsets = [0, 24], sizes = [128, 8], strides = [1, 1]} : vector<128x96xf32> to vector<128x8xf32>
    %91 = vector.extract_strided_slice %11 {offsets = [0, 56], sizes = [128, 8], strides = [1, 1]} : vector<128x96xf32> to vector<128x8xf32>
    %92 = vector.extract_strided_slice %11 {offsets = [0, 88], sizes = [128, 8], strides = [1, 1]} : vector<128x96xf32> to vector<128x8xf32>
    %93 = arith.truncf %90 : vector<128x8xf32> to vector<128x8xbf16>
    %94 = arith.truncf %91 : vector<128x8xf32> to vector<128x8xbf16>
    %cst_30 = arith.constant dense<0.000000e+00> : vector<128x128xf32>
    %95 = tpu.matmul %93, %94, %cst_30 {dimension_numbers = #tpu.dot_dimension_numbers<[1], [1], [0], [0], [0, 0, 1, 0], [], []>} : vector<128x8xbf16>, vector<128x8xbf16>, vector<128x128xf32> -> vector<128x128xf32>
    %96 = vector.broadcast %17 : vector<1x128xf32> to vector<128x128xf32>
    %97 = arith.addf %95, %96 : vector<128x128xf32>
    %cst_31 = arith.constant dense<0xFF800000> : vector<128xf32>
    %98 = vector.multi_reduction <maximumf>, %97, %cst_31 [1] : vector<128x128xf32> to vector<128xf32>
    %99 = vector.shape_cast %98 : vector<128xf32> to vector<128x1xf32>
    %100 = vector.broadcast %99 : vector<128x1xf32> to vector<128x128xf32>
    %101 = arith.subf %97, %100 : vector<128x128xf32>
    %102 = math.exp %101 : vector<128x128xf32>
    %cst_32 = arith.constant dense<0.000000e+00> : vector<128xf32>
    %103 = vector.multi_reduction <add>, %102, %cst_32 [1] : vector<128x128xf32> to vector<128xf32>
    %104 = vector.shape_cast %103 : vector<128xf32> to vector<128x1xf32>
    %cst_33 = arith.constant 5.65685415 : f32
    %105 = vector.broadcast %cst_33 : f32 to vector<128x1xf32>
    %106 = arith.mulf %104, %105 : vector<128x1xf32>
    %107 = vector.broadcast %106 : vector<128x1xf32> to vector<128x128xf32>
    %108 = arith.divf %102, %107 : vector<128x128xf32>
    %109 = arith.truncf %108 : vector<128x128xf32> to vector<128x128xbf16>
    %110 = arith.truncf %92 : vector<128x8xf32> to vector<128x8xbf16>
    %cst_34 = arith.constant dense<0.000000e+00> : vector<128x8xf32>
    %111 = tpu.matmul %109, %110, %cst_34 {dimension_numbers = #tpu.dot_dimension_numbers<[1], [0], [0], [1], [0, 0, 1, 1], [], []>} : vector<128x128xbf16>, vector<128x8xbf16>, vector<128x8xf32> -> vector<128x8xf32>
    %112 = arith.truncf %111 : vector<128x8xf32> to vector<128x8xbf16>
    %c0_35 = arith.constant 0 : index
    %c24 = arith.constant 24 : index
    %113 = vector.load %arg9[%c0_35, %c24] : memref<128x32xbf16, #tpu.memory_space<vmem>>, vector<128x8xbf16>
    tpu.vector_store %arg9[%c0_35, %c24], %112 {strides = array<i32>} : memref<128x32xbf16, #tpu.memory_space<vmem>>, vector<128x8xbf16>,
    %c0_36 = arith.constant 0 : index
    %c0_37 = arith.constant 0 : index
    %114 = vector.load %arg8[%c0_36, %c0_37] : memref<128x32xf32, #tpu.memory_space<vmem>>, vector<128x32xf32>
    %c0_38 = arith.constant 0 : index
    %c0_39 = arith.constant 0 : index
    %115 = vector.load %arg9[%c0_38, %c0_39] : memref<128x32xbf16, #tpu.memory_space<vmem>>, vector<128x32xbf16>
    %c0_40 = arith.constant 0 : index
    %c0_41 = arith.constant 0 : index
    %c0_42 = arith.constant 0 : index
    %116 = vector.load %arg5[%c0_40, %c0_41, %c0_42] : memref<1x32x32xbf16, #tpu.memory_space<vmem>>, vector<1x32x32xbf16>
    %117 = vector.shape_cast %116 : vector<1x32x32xbf16> to vector<32x32xbf16>
    %cst_43 = arith.constant dense<0.000000e+00> : vector<128x32xf32>
    %118 = tpu.matmul %115, %117, %cst_43 {dimension_numbers = #tpu.dot_dimension_numbers<[1], [0], [0], [1], [0, 0, 1, 1], [], []>} : vector<128x32xbf16>, vector<32x32xbf16>, vector<128x32xf32> -> vector<128x32xf32>
    %119 = arith.addf %114, %118 : vector<128x32xf32>
    %c0_44 = arith.constant 0 : index
    %c0_45 = arith.constant 0 : index
    %120 = vector.load %arg8[%c0_44, %c0_45] : memref<128x32xf32, #tpu.memory_space<vmem>>, vector<128x32xf32>
    tpu.vector_store %arg8[%c0_44, %c0_45], %119 {strides = array<i32>} : memref<128x32xf32, #tpu.memory_space<vmem>>, vector<128x32xf32>,
    %c0_i32_46 = arith.constant 0 : i32
    %121 = arith.cmpi eq, %arg1, %c0_i32_46 : i32
    %122 = arith.extui %121 : i1 to i32
    %c0_i32_47 = arith.constant 0 : i32
    %123 = arith.cmpi ne, %122, %c0_i32_47 : i32
    scf.if %123 {
      %c0_48 = arith.constant 0 : index
      %c0_49 = arith.constant 0 : index
      %124 = vector.load %arg8[%c0_48, %c0_49] : memref<128x32xf32, #tpu.memory_space<vmem>>, vector<128x32xf32>
      %c0_50 = arith.constant 0 : index
      %c0_51 = arith.constant 0 : index
      %125 = vector.load %arg6[%c0_50, %c0_51] : memref<1x32xf32, #tpu.memory_space<vmem>>, vector<1x32xf32>
      %126 = vector.broadcast %125 : vector<1x32xf32> to vector<128x32xf32>
      %127 = arith.addf %124, %126 : vector<128x32xf32>
      %128 = vector.shape_cast %127 : vector<128x32xf32> to vector<1x128x32xf32>
      %c0_52 = arith.constant 0 : index
      %c0_53 = arith.constant 0 : index
      %c0_54 = arith.constant 0 : index
      %129 = vector.load %arg7[%c0_52, %c0_53, %c0_54] : memref<1x128x32xf32, #tpu.memory_space<vmem>>, vector<1x128x32xf32>
      tpu.vector_store %arg7[%c0_52, %c0_53, %c0_54], %128 {strides = array<i32>} : memref<1x128x32xf32, #tpu.memory_space<vmem>>, vector<1x128x32xf32>,
    } else {
    }
    return
  }
  func.func @transform_0(%arg0: i32, %arg1: i32) -> (i32, i32, i32) {
    %c0_i32 = arith.constant 0 : i32
    %c0_i32_0 = arith.constant 0 : i32
    %c0_i32_1 = arith.constant 0 : i32
    return %arg0, %c0_i32, %c0_i32_0 : i32, i32, i32
  }
  func.func @transform_1(%arg0: i32, %arg1: i32) -> (i32, i32, i32) {
    %c0_i32 = arith.constant 0 : i32
    %c0_i32_0 = arith.constant 0 : i32
    %c0_i32_1 = arith.constant 0 : i32
    return %arg1, %c0_i32, %c0_i32_0 : i32, i32, i32
  }
  func.func @transform_2(%arg0: i32, %arg1: i32) -> (i32, i32, i32) {
    %c0_i32 = arith.constant 0 : i32
    %c0_i32_0 = arith.constant 0 : i32
    %c0_i32_1 = arith.constant 0 : i32
    return %arg1, %c0_i32, %c0_i32_0 : i32, i32, i32
  }
  func.func @transform_3(%arg0: i32, %arg1: i32) -> (i32, i32, i32) {
    %c0_i32 = arith.constant 0 : i32
    %c0_i32_0 = arith.constant 0 : i32
    %c0_i32_1 = arith.constant 0 : i32
    return %arg1, %c0_i32, %c0_i32_0 : i32, i32, i32
  }
  func.func @transform_4(%arg0: i32, %arg1: i32) -> (i32, i32) {
    %c0_i32 = arith.constant 0 : i32
    %c0_i32_0 = arith.constant 0 : i32
    %c0_i32_1 = arith.constant 0 : i32
    return %c0_i32, %c0_i32_0 : i32, i32
  }
  func.func @transform_5(%arg0: i32, %arg1: i32) -> (i32, i32, i32) {
    %c0_i32 = arith.constant 0 : i32
    %c0_i32_0 = arith.constant 0 : i32
    %c0_i32_1 = arith.constant 0 : i32
    return %arg0, %c0_i32, %c0_i32_0 : i32, i32, i32
  }
}

</mosaic_0001>

<bundles_post_ra>
// kernel: tpu_custom_call.1
= control target key start
LH: loop header
LB: loop body
LE: loop exit
PB: predicated region body
PF: predicated region fallthrough
CT: control target
= control target key end

     0   :  { %s4300_s18 = smov 0   ;;  %s4302_s19 = smov 0   ;;  %s5445_s0 = inlined_call_operand.vmem [shape: bf16[2,128,32], index: 0, kind: input, shape index: {}]   ;;  %s5446_s1 = inlined_call_operand.vmem [shape: bf16[1,32,96], index: 1, kind: input, shape index: {}]   ;;  %s5447_s2 = inlined_call_operand.vmem [shape: f32[1,1,96], index: 2, kind: input, shape index: {}]   ;;  %s5448_s3 = inlined_call_operand.vmem [shape: bf16[1,32,32], index: 3, kind: input, shape index: {}]   ;;  %s5449_s4 = inlined_call_operand.vmem [shape: f32[1,32], index: 4, kind: input, shape index: {}]   ;;  %s5450_s5 = inlined_call_operand.vmem [shape: f32[2,128,32], index: 5, kind: output, shape index: {}]  }
   0x1   :  { %s4304_s20 = smov 0  }
   0x2 LB: > { %s27_s21 = sadd.s32 1, %s4248_s19  ;;  %p3215_p0 = scmp.ge.s32.totalorder %s4252_s20, 1  ;;  %s4252_s20 = sphi %s4304_s20, %s15_s20   ;;  %s4248_s19 = sphi %s4302_s19, %s5460_s19   ;;  %s4244_s18 = sphi %s4300_s18, %s5459_s18  }
   0x3   : > { %p29_p1 = scmp.ge.s32.totalorder %s27_s21, 2  ;;  %p227_p2 = scmp.lt.s32.totalorder %s4252_s20, 3 }
   0x5   : > { %s5462_s21 = smov (%p29_p1, %s27_s21), 0  ;;  %p228_p3 = pnand %p3215_p0, %p227_p2 }
   0x7   : > { %231 = sbr.rel (%p228_p3) target bundleno = 3340 (0xd0c), region = 40 }
   0xc   : > { %v3954_v0 = vld [vmem:[%s5446_s1 + $0x8] sm:$0xff]   ;;  %p268_p4 = scmp.lt.s32.totalorder %s4244_s18, 1  ;;  %v3955_v1 = vld [vmem:[%s5446_s1] sm:$0xff]   ;;  %vm296_vm0 = vcmask 261120   ;;  %vm550_vm1 = vcmask 64512   ;;  %s4254_s7 = smov 96  }
   0xd   : > { %3570 = vmatprep.subr.bf16.mxu0 %v3954_v0  ;;  %v3220_v13 = vld [vmem:[%s5447_s2] ss:$0 sm:$0xff]  ;;  %s4255_s8 = smov 64   ;;  %s4256_s9 = smov 88   ;;  %vm1049_vm3 = vcmask 60416   ;;  %vm1628_vm4 = vcmask 126016  }
   0xe   : > { %s5464_s18 = smov (!%p268_p4, %s4244_s18), 1  ;;  %3571 = vmatpush3.bf16.msra.mxu0 %v3954_v0  ;;  %s4258_s10 = smov 120   ;;  %vm2207_vm5 = vcmask 191616   ;;  %vm2786_vm6 = vcmask 257216  }
   0xf   : > { %3572 = vmatprep.subr.bf16.mxu0 %v3955_v1  ;;  %s3356_s26 = sshll.u32 %s5464_s18, 6  ;;  %s4259_s11 = smov 56  }
  0x10   : > { %s272_s29 = scalar_lea.vmem %s5445_s0, %s3356_s26  ;;  %s4260_s12 = smov 80  }
  0x11   : > { %v3956_v2 = vld [vmem:[%s272_s29] sm:$0xff]   ;;  %v3957_v3 = vld [vmem:[%s272_s29 + $0x8] sm:$0xff]   ;;  %v3958_v4 = vld [vmem:[%s272_s29 + $0x10] sm:$0xff]   ;;  %s4261_s13 = smov 112   ;;  %s4262_s14 = smov 48  }
  0x12   : > { %3573 = vmatpush3.bf16.msra.mxu0 %v3955_v1  ;;  %3574 = vmatprep.mubr.msk.bf16.mxu0 %vm296_vm0, %v3956_v2  ;;  %v3959_v5 = vld [vmem:[%s272_s29 + $0x18] sm:$0xff]   ;;  %v3960_v6 = vld [vmem:[%s272_s29 + $0x20] sm:$0xff]   ;;  %v3961_v7 = vld [vmem:[%s272_s29 + $0x28] sm:$0xff]   ;;  %s4263_s15 = smov 72   ;;  %s4264_s16 = smov 104  }
  0x13   : > { %v3962_v8 = vld [vmem:[%s272_s29 + $0x30] sm:$0xff]   ;;  %v3963_v9 = vld [vmem:[%s272_s29 + $0x38] sm:$0xff]   ;;  %s4265_s17 = smov 40   ;;  %s4266_s22 = smov 8  }
  0x14   : > { %s4267_s23 = smov 16   ;;  %s4268_s28 = smov 24  }
  0x15   : > { %3575 = vmatmul.mubr.msk.bf16.vlgmr.msra.gmra.mxu0 %vm296_vm0, %v3957_v3  ;;  %s3357_s29 = sshll.u32 %s5464_s18, 7 }
  0x16   : > { %3578 = vmatprep.mubr.msk.bf16.mxu0 %vm296_vm0, %v3958_v4 }
  0x1d   : > { %3579 = vmatmul.mubr.msk.bf16.gmra.mxu0 %vm296_vm0, %v3959_v5 }
  0x1e   : > { %3582 = vmatprep.mubr.msk.bf16.mxu0 %vm296_vm0, %v3960_v6 }
  0x25   : > { %3583 = vmatmul.mubr.msk.bf16.gmra.mxu0 %vm296_vm0, %v3961_v7 }
  0x26   : > { %3586 = vmatprep.mubr.msk.bf16.mxu0 %vm296_vm0, %v3962_v8 }
  0x2d   : > { %3587 = vmatmul.mubr.msk.bf16.gmra.mxu0 %vm296_vm0, %v3963_v9 }
  0xd5   : > { %v3576_v10 = vpop.f32.mrf.mxu0 }
  0xd6   : > { %v460_v49 = vadd.f32 %v3576_v10, %v3220_v13 }
  0xd7   : > { %v451_v11 = vpop.f32.mrf.mxu0 }
  0xd8   : > { %v452_v15 = vadd.f32 %v3220_v13, %v451_v11 }
  0xd9   : > { %v3577_v12 = vpop.f32.mrf.mxu0 }
  0xda   : > { %v463_v47 = vadd.f32 %v3577_v12, %v3220_v13  ;;  %v514_v12 = vlaneseq }
  0xdb   : > { %v454_v14 = vpop.f32.mrf.mxu0 }
  0xdc   : > { %v455_v16 = vadd.f32 %v3220_v13, %v454_v14  ;;  %v4365_v50 = vpack.c.bf16 %v463_v47, %v460_v49  ;;  %v4257_v14 = vmov -1e+30  }
  0xdd   : > { %v3580_v17 = vpop.f32.mrf.mxu0 }
  0xde   : > { %v4341_v18 = vpack.c.bf16 %v455_v16, %v452_v15  ;;  %v476_v46 = vadd.f32 %v3580_v17, %v3220_v13 }
  0xdf   : > { %v467_v19 = vpop.f32.mrf.mxu0 }
  0xe0   : > { %3606 = vmatprep.mubr.msk.bf16.mxu1 %vm550_vm1, %v4341_v18  ;;  %v468_v36 = vadd.f32 %v3220_v13, %v467_v19 }
  0xe1   : > { %v3581_v20 = vpop.f32.mrf.mxu0 }
  0xe2   : > { %v479_v44 = vadd.f32 %v3581_v20, %v3220_v13 }
  0xe3   : > { %v470_v21 = vpop.f32.mrf.mxu0 }
  0xe4   : > { %v471_v33 = vadd.f32 %v3220_v13, %v470_v21  ;;  %v4361_v48 = vpack.c.bf16 %v479_v44, %v476_v46 }
  0xe5   : > { %v3584_v22 = vpop.f32.mrf.mxu0 }
  0xe6   : > { %v492_v25 = vadd.f32 %v3584_v22, %v3220_v13  ;;  %v4351_v40 = vpack.c.bf16 %v471_v33, %v468_v36 }
  0xe7   : > { %v483_v23 = vpop.f32.mrf.mxu0 }
  0xe8   : > { %v484_v31 = vadd.f32 %v3220_v13, %v483_v23 }
  0xe9   : > { %v3585_v24 = vpop.f32.mrf.mxu0 }
  0xea   : > { %v495_v26 = vadd.f32 %v3585_v24, %v3220_v13 }
  0xeb   : > { %v486_v27 = vpop.f32.mrf.mxu0 }
  0xec   : > { %v4345_v28 = vpack.c.bf16 %v495_v26, %v492_v25  ;;  %v487_v29 = vadd.f32 %v3220_v13, %v486_v27 }
  0xed   : > { %v3588_v30 = vpop.f32.mrf.mxu0 }
  0xee   : > { %544 = vrot.lane.b32.xlu1 %v4345_v28, %s4254_s7  ;;  %v4348_v34 = vpack.c.bf16 %v487_v29, %v484_v31  ;;  %v508_v37 = vadd.f32 %v3588_v30, %v3220_v13 }
  0xef   : > { %v499_v32 = vpop.f32.mrf.mxu0 }
  0xf0   : > { %v500_v43 = vadd.f32 %v3220_v13, %v499_v32 }
  0xf1   : > { %v3589_v35 = vpop.f32.mrf.mxu0 }
  0xf2   : > { %v511_v38 = vadd.f32 %v3589_v35, %v3220_v13  ;;  %542 = vrot.lane.b32.xlu1 %v4348_v34, %s4254_s7 }
  0xf3   : > { %v502_v39 = vpop.f32.mrf.mxu0 }
  0xf4   : > { %v4353_v41 = vpack.c.bf16 %v511_v38, %v508_v37  ;;  %v503_v42 = vadd.f32 %v3220_v13, %v502_v39  ;;  %v515_v13 = vand.u32 127, %v514_v12 }
  0xf6   : > { %548 = vrot.lane.b32.xlu0 %v4353_v41, %s4254_s7  ;;  %538 = vrot.lane.b32.xlu1 %v4351_v40, %s4254_s7  ;;  %v4357_v45 = vpack.c.bf16 %v503_v42, %v500_v43  ;;  %vm516_vm2 = vcmp.lt.s32.totalorder %v515_v13, 8 }
  0xf7   : > { %v4413_v15 = vsel %vm516_vm2, 0.0, %v4257_v14 }
  0xfa   : > { %546 = vrot.lane.b32.xlu0 %v4357_v45, %s4254_s7  ;;  %534 = vrot.lane.b32.xlu1 %v4341_v18, %s4254_s7 }
  0xfe   : > { %540 = vrot.lane.b32.xlu0 %v4361_v48, %s4254_s7  ;;  %878 = vrot.lane.b32.xlu1 %v4353_v41, %s4255_s8 }
 0x102   : > { %536 = vrot.lane.b32.xlu0 %v4365_v50, %s4254_s7  ;;  %874 = vrot.lane.b32.xlu1 %v4345_v28, %s4255_s8 }
 0x106   : > { %866 = vrot.lane.b32.xlu0 %v4365_v50, %s4255_s8  ;;  %872 = vrot.lane.b32.xlu1 %v4348_v34, %s4255_s8 }
 0x10a   : > { %1096 = vrot.lane.b32.xlu0 %v4353_v41, %s4256_s9  ;;  %870 = vrot.lane.b32.xlu1 %v4361_v48, %s4255_s8 }
 0x10e   : > { %876 = vrot.lane.b32.xlu0 %v4357_v45, %s4255_s8  ;;  %868 = vrot.lane.b32.xlu1 %v4351_v40, %s4255_s8 }
 0x112   : > { %1094 = vrot.lane.b32.xlu0 %v4357_v45, %s4256_s9  ;;  %864 = vrot.lane.b32.xlu1 %v4341_v18, %s4255_s8 }
 0x160   : > { %v545_v51 = vpop.permute.xlu1 %544 }
 0x161   : > { %v591_v63 = vsel %vm550_vm1, %v545_v51, 0 }
 0x164   : > { %v543_v52 = vpop.permute.xlu1 %542 }
 0x165   : > { %v588_v3 = vsel %vm550_vm1, %v543_v52, 0 }
 0x168   : > { %v549_v53 = vpop.permute.xlu0 %548  ;;  %v539_v54 = vpop.permute.xlu1 %538 }
 0x169   : > { %3882 = vmatprep.subr.msk.bf16.mxu1 %vm550_vm1, %v549_v53  ;;  %v597_v55 = vsel %vm550_vm1, %v549_v53, 0  ;;  %v582_v8 = vsel %vm550_vm1, %v539_v54, 0 }
 0x16a   : > { %3591 = vmatpush3.bf16.xpose.msra.mxu1 %v597_v55 }
 0x16c   : > { %v547_v56 = vpop.permute.xlu0 %546  ;;  %v535_v57 = vpop.permute.xlu1 %534 }
 0x16d   : > { %3883 = vmatprep.subr.msk.bf16.mxu1 %vm550_vm1, %v547_v56  ;;  %v594_v60 = vsel %vm550_vm1, %v547_v56, 0  ;;  %v576_v11 = vsel %vm550_vm1, %v535_v57, 0 }
 0x170   : > { %v541_v58 = vpop.permute.xlu0 %540  ;;  %v879_v59 = vpop.permute.xlu1 %878 }
 0x171   : > { %3622 = vmatprep.subr.bf16.mxu0 %v879_v59  ;;  %v585_v6 = vsel %vm550_vm1, %v541_v58, 0 }
 0x172   : > { %3593 = vmatpush3.bf16.xpose.msra.mxu1 %v594_v60  ;;  %3623 = vmatpush3.bf16.msra.mxu0 %v879_v59 }
 0x173   : > { %3884 = vmatprep.subr.msk.bf16.mxu1 %vm550_vm1, %v545_v51 }
 0x174   : > { %v537_v61 = vpop.permute.xlu0 %536  ;;  %v875_v0 = vpop.permute.xlu1 %874 }
 0x175   : > { %v579_v10 = vsel %vm550_vm1, %v537_v61, 0 }
 0x178   : > { %v867_v62 = vpop.permute.xlu0 %866  ;;  %v873_v4 = vpop.permute.xlu1 %872 }
 0x17a   : > { %3595 = vmatpush3.bf16.xpose.msra.mxu1 %v591_v63 }
 0x17b   : > { %3885 = vmatprep.subr.msk.bf16.mxu1 %vm550_vm1, %v543_v52 }
 0x17c   : > { %v4386_v1 = vpop.permute.xlu0 %1096  ;;  %v871_v5 = vpop.permute.xlu1 %870 }
 0x180   : > { %v877_v2 = vpop.permute.xlu0 %876  ;;  %v869_v7 = vpop.permute.xlu1 %868 }
 0x181   : > { %3624 = vmatprep.subr.bf16.mxu0 %v877_v2 }
 0x182   : > { %3597 = vmatpush3.bf16.xpose.msra.mxu1 %v588_v3  ;;  %3625 = vmatpush3.bf16.msra.mxu0 %v877_v2 }
 0x183   : > { %3886 = vmatprep.subr.msk.bf16.mxu1 %vm550_vm1, %v541_v58  ;;  %3626 = vmatprep.subr.bf16.mxu0 %v875_v0 }
 0x184   : > { %v865_v9 = vpop.permute.xlu1 %864  ;;  %v4462_v56 = vpop.permute.xlu0 %1094 }
 0x186   : > { %3627 = vmatpush3.bf16.msra.mxu0 %v875_v0 }
 0x187   : > { %3628 = vmatprep.subr.bf16.mxu0 %v873_v4 }
 0x18a   : > { %3599 = vmatpush3.bf16.xpose.msra.mxu1 %v585_v6  ;;  %3629 = vmatpush3.bf16.msra.mxu0 %v873_v4 }
 0x18b   : > { %3887 = vmatprep.subr.msk.bf16.mxu1 %vm550_vm1, %v539_v54  ;;  %3630 = vmatprep.subr.bf16.mxu0 %v871_v5 }
 0x18e   : > { %3631 = vmatpush3.bf16.msra.mxu0 %v871_v5 }
 0x18f   : > { %3632 = vmatprep.subr.bf16.mxu0 %v869_v7 }
 0x192   : > { %3601 = vmatpush3.bf16.xpose.msra.mxu1 %v582_v8  ;;  %3633 = vmatpush3.bf16.msra.mxu0 %v869_v7 }
 0x193   : > { %3888 = vmatprep.subr.msk.bf16.mxu1 %vm550_vm1, %v537_v61  ;;  %3634 = vmatprep.subr.bf16.mxu0 %v867_v62 }
 0x196   : > { %3635 = vmatpush3.bf16.msra.mxu0 %v867_v62 }
 0x197   : > { %3636 = vmatprep.subr.bf16.mxu0 %v865_v9 }
 0x19a   : > { %3603 = vmatpush3.bf16.xpose.msra.mxu1 %v579_v10  ;;  %3637 = vmatpush3.bf16.msra.mxu0 %v865_v9 }
 0x19b   : > { %3889 = vmatprep.subr.msk.bf16.mxu1 %vm550_vm1, %v535_v57  ;;  %3890 = vmatprep.subr.msk.bf16.mxu0 %vm550_vm1, %v4386_v1 }
 0x1a2   : > { %3605 = vmatpush3.bf16.xpose.msra.mxu1 %v576_v11 }
 0x1a9   : > { %3607 = vmatmul.mubr.msk.bf16.vlgmr.msra.gmra.mxu1 %vm550_vm1, %v4365_v50 }
 0x1aa   : > { %3610 = vmatprep.mubr.msk.bf16.mxu1 %vm550_vm1, %v4351_v40 }
 0x1b1   : > { %3611 = vmatmul.mubr.msk.bf16.gmra.mxu1 %vm550_vm1, %v4361_v48 }
 0x1b2   : > { %3614 = vmatprep.mubr.msk.bf16.mxu1 %vm550_vm1, %v4348_v34 }
 0x1b9   : > { %3615 = vmatmul.mubr.msk.bf16.gmra.mxu1 %vm550_vm1, %v4345_v28 }
 0x1ba   : > { %3618 = vmatprep.mubr.msk.bf16.mxu1 %vm550_vm1, %v4357_v45 }
 0x1c1   : > { %3619 = vmatmul.mubr.msk.bf16.gmra.mxu1 %vm550_vm1, %v4353_v41 }
 0x269   : > { %v3608_v16 = vpop.f32.mrf.mxu1 }
 0x26a   : > { %v642_v17 = vadd.f32 %v3608_v16, %v4413_v15 }
 0x26b   : > { %v633_v19 = vpop.f32.mrf.mxu1 }
 0x26c   : > { %700 = vmax.xlane.f32.xlu0 %v642_v17  ;;  %v634_v21 = vadd.f32 %v633_v19, %v4413_v15 }
 0x26d   : > { %v3609_v20 = vpop.f32.mrf.mxu1 }
 0x26e   : > { %v645_v25 = vadd.f32 %v3609_v20, %v4413_v15 }
 0x26f   : > { %v636_v22 = vpop.f32.mrf.mxu1 }
 0x270   : > { %v637_v23 = vadd.f32 %v636_v22, %v4413_v15  ;;  %696 = vmax.xlane.f32.xlu0 %v634_v21 }
 0x271   : > { %v3612_v24 = vpop.f32.mrf.mxu1 }
 0x272   : > { %698 = vmax.xlane.f32.xlu1 %v637_v23  ;;  %v658_v27 = vadd.f32 %v3612_v24, %v4413_v15 }
 0x273   : > { %v649_v26 = vpop.f32.mrf.mxu1 }
 0x274   : > { %702 = vmax.xlane.f32.xlu0 %v645_v25  ;;  %v650_v32 = vadd.f32 %v649_v26, %v4413_v15 }
 0x275   : > { %v3613_v29 = vpop.f32.mrf.mxu1 }
 0x276   : > { %v4421_v30 = vadd.f32 %v3613_v29, %v4413_v15  ;;  %708 = vmax.xlane.f32.xlu1 %v658_v27 }
 0x277   : > { %v652_v31 = vpop.f32.mrf.mxu1 }
 0x278   : > { %710 = vmax.xlane.f32.xlu0 %v4421_v30  ;;  %v653_v35 = vadd.f32 %v652_v31, %v4413_v15 }
 0x279   : > { %v3616_v33 = vpop.f32.mrf.mxu1 }
 0x27a   : > { %704 = vmax.xlane.f32.xlu1 %v650_v32  ;;  %v4427_v37 = vadd.f32 %v3616_v33, %v4413_v15 }
 0x27b   : > { %v665_v36 = vpop.f32.mrf.mxu1 }
 0x27c   : > { %706 = vmax.xlane.f32.xlu0 %v653_v35  ;;  %v4434_v43 = vadd.f32 %v665_v36, %v4413_v15 }
 0x27d   : > { %v3617_v38 = vpop.f32.mrf.mxu1 }
 0x27e   : > { %v4430_v39 = vadd.f32 %v3617_v38, %v4413_v15  ;;  %716 = vmax.xlane.f32.xlu1 %v4427_v37 }
 0x27f   : > { %v668_v42 = vpop.f32.mrf.mxu1 }
 0x280   : > { %718 = vmax.xlane.f32.xlu0 %v4430_v39  ;;  %v4438_v46 = vadd.f32 %v668_v42, %v4413_v15 }
 0x281   : > { %v3620_v44 = vpop.f32.mrf.mxu1 }
 0x282   : > { %712 = vmax.xlane.f32.xlu1 %v4434_v43  ;;  %v4442_v49 = vadd.f32 %v3620_v44, %v4413_v15 }
 0x283   : > { %v681_v47 = vpop.f32.mrf.mxu1 }
 0x284   : > { %714 = vmax.xlane.f32.xlu0 %v4438_v46  ;;  %v4450_v54 = vadd.f32 %v681_v47, %v4413_v15 }
 0x285   : > { %v3621_v51 = vpop.f32.mrf.mxu1 }
 0x286   : > { %v4446_v52 = vadd.f32 %v3621_v51, %v4413_v15  ;;  %724 = vmax.xlane.f32.xlu1 %v4442_v49 }
 0x287   : > { %v684_v53 = vpop.f32.mrf.mxu1 }
 0x288   : > { %726 = vmax.xlane.f32.xlu0 %v4446_v52  ;;  %v4454_v55 = vadd.f32 %v684_v53, %v4413_v15 }
 0x28a   : > { %720 = vmax.xlane.f32.xlu1 %v4450_v54 }
 0x28c   : > { %722 = vmax.xlane.f32.xlu0 %v4454_v55 }
 0x29b   : > { %1092 = vrot.lane.b32.xlu1 %v4345_v28, %s4256_s9 }
 0x2a2   : > { %1090 = vrot.lane.b32.xlu0 %v4348_v34, %s4256_s9 }
 0x2f5   : > { %v701_v57 = vpop.xlane.xlu0 %700 }
 0x2f6   : > { %v730_v58 = vsub.f32 %v642_v17, %v701_v57 }
 0x2f8   : > { %v748_v59 = vmul.f32 1.442695, %v730_v58 }
 0x2f9   : > { %v697_v60 = vpop.xlane.xlu0 %696 }
 0x2fa   : > { %3974 = vpow2.f32 %v748_v59  ;;  %v728_v61 = vsub.f32 %v634_v21, %v697_v60 }
 0x2fb   : > { %v699_v62 = vpop.xlane.xlu1 %698 }
 0x2fc   : > { %v744_v63 = vmul.f32 1.442695, %v728_v61  ;;  %v729_v2 = vsub.f32 %v637_v23, %v699_v62 }
 0x2fd   : > { %v703_v0 = vpop.xlane.xlu0 %702 }
 0x2fe   : > { %3976 = vpow2.f32 %v744_v63  ;;  %v731_v3 = vsub.f32 %v645_v25, %v703_v0  ;;  %v746_v7 = vmul.f32 1.442695, %v729_v2 }
 0x2ff   : > { %v709_v4 = vpop.xlane.xlu1 %708 }
 0x300   : > { %v750_v5 = vmul.f32 1.442695, %v731_v3  ;;  %v734_v8 = vsub.f32 %v658_v27, %v709_v4 }
 0x301   : > { %v711_v6 = vpop.xlane.xlu0 %710 }
 0x302   : > { %3978 = vpow2.f32 %v750_v5  ;;  %v735_v10 = vsub.f32 %v4421_v30, %v711_v6  ;;  %v756_v13 = vmul.f32 1.442695, %v734_v8 }
 0x303   : > { %v705_v9 = vpop.xlane.xlu1 %704  ;;  %3980 = vpow2.f32 %v746_v7 }
 0x304   : > { %v732_v11 = vsub.f32 %v650_v32, %v705_v9  ;;  %v758_v20 = vmul.f32 1.442695, %v735_v10 }
 0x305   : > { %v707_v12 = vpop.xlane.xlu0 %706 }
 0x306   : > { %v752_v14 = vmul.f32 1.442695, %v732_v11  ;;  %v733_v16 = vsub.f32 %v653_v35, %v707_v12 }
 0x307   : > { %v4465_v17 = vpop.eup %3974  ;;  %v717_v19 = vpop.xlane.xlu1 %716 }
 0x308   : > { %3982 = vpow2.f32 %v752_v14  ;;  %v738_v21 = vsub.f32 %v4427_v37, %v717_v19  ;;  %780 = vadd.xlane.f32.xlu0 %v4465_v17  ;;  %v754_v22 = vmul.f32 1.442695, %v733_v16 }
 0x309   : > { %3984 = vpow2.f32 %v756_v13  ;;  %v719_v24 = vpop.xlane.xlu0 %718 }
 0x30a   : > { %3986 = vpow2.f32 %v758_v20  ;;  %v764_v26 = vmul.f32 1.442695, %v738_v21  ;;  %v739_v30 = vsub.f32 %v4430_v39, %v719_v24 }
 0x30b   : > { %v4469_v23 = vpop.eup %3976  ;;  %v713_v25 = vpop.xlane.xlu1 %712  ;;  %3988 = vpow2.f32 %v754_v22 }
 0x30c   : > { %v736_v27 = vsub.f32 %v4434_v43, %v713_v25  ;;  %776 = vadd.xlane.f32.xlu1 %v4469_v23  ;;  %3990 = vpow2.f32 %v764_v26  ;;  %v766_v35 = vmul.f32 1.442695, %v739_v30 }
 0x30d   : > { %v715_v32 = vpop.xlane.xlu0 %714 }
 0x30e   : > { %v760_v31 = vmul.f32 1.442695, %v736_v27  ;;  %v737_v36 = vsub.f32 %v4438_v46, %v715_v32 }
 0x30f   : > { %v4473_v29 = vpop.eup %3978  ;;  %v725_v53 = vpop.xlane.xlu1 %724 }
 0x310   : > { %782 = vadd.xlane.f32.xlu0 %v4473_v29  ;;  %v4477_v33 = vpop.eup %3980  ;;  %3992 = vpow2.f32 %v760_v31  ;;  %v762_v39 = vmul.f32 1.442695, %v737_v36  ;;  %v742_v57 = vsub.f32 %v4442_v49, %v725_v53 }
 0x311   : > { %3994 = vpow2.f32 %v766_v35  ;;  %v727_v61 = vpop.xlane.xlu0 %726 }
 0x312   : > { %3996 = vpow2.f32 %v762_v39  ;;  %v772_v59 = vmul.f32 1.442695, %v742_v57  ;;  %v743_v62 = vsub.f32 %v4446_v52, %v727_v61 }
 0x313   : > { %v721_v58 = vpop.xlane.xlu1 %720 }
 0x314   : > { %778 = vadd.xlane.f32.xlu0 %v4477_v33  ;;  %v740_v60 = vsub.f32 %v4450_v54, %v721_v58  ;;  %3998 = vpow2.f32 %v772_v59  ;;  %v774_v2 = vmul.f32 1.442695, %v743_v62 }
 0x315   : > { %v4481_v37 = vpop.eup %3982  ;;  %v723_v0 = vpop.xlane.xlu0 %722 }
 0x316   : > { %784 = vadd.xlane.f32.xlu1 %v4481_v37  ;;  %v4484_v38 = vpop.eup %3984  ;;  %v768_v63 = vmul.f32 1.442695, %v740_v60  ;;  %v741_v3 = vsub.f32 %v4454_v55, %v723_v0 }
 0x317   : > { %v4487_v42 = vpop.eup %3986  ;;  %v4549_v6 = vpop.permute.xlu1 %1092 }
 0x318   : > { %788 = vadd.xlane.f32.xlu0 %v4484_v38  ;;  %v4490_v43 = vpop.eup %3988  ;;  %4000 = vpow2.f32 %v768_v63  ;;  %v770_v4 = vmul.f32 1.442695, %v741_v3 }
 0x319   : > { %v4493_v44 = vpop.eup %3990  ;;  %4002 = vpow2.f32 %v774_v2  ;;  %v4547_v55 = vpop.permute.xlu0 %1090 }
 0x31a   : > { %790 = vadd.xlane.f32.xlu1 %v4487_v42  ;;  %4004 = vpow2.f32 %v770_v4 }
 0x31c   : > { %786 = vadd.xlane.f32.xlu0 %v4490_v43 }
 0x31d   : > { %v4496_v46 = vpop.eup %3992 }
 0x31e   : > { %796 = vadd.xlane.f32.xlu1 %v4493_v44  ;;  %v4499_v47 = vpop.eup %3994 }
 0x31f   : > { %v4502_v51 = vpop.eup %3996 }
 0x321   : > { %v4513_v49 = vpop.eup %3998 }
 0x322   : > { %792 = vadd.xlane.f32.xlu1 %v4496_v46 }
 0x325   : > { %v4516_v5 = vpop.eup %4000 }
 0x326   : > { %798 = vadd.xlane.f32.xlu1 %v4499_v47  ;;  %v4519_v54 = vpop.eup %4002 }
 0x327   : > { %v4522_v52 = vpop.eup %4004 }
 0x32a   : > { %794 = vadd.xlane.f32.xlu1 %v4502_v51 }
 0x332   : > { %1086 = vrot.lane.b32.xlu0 %v4351_v40, %s4256_s9 }
 0x33b   : > { %1088 = vrot.lane.b32.xlu1 %v4361_v48, %s4256_s9 }
 0x351   : > { %804 = vadd.xlane.f32.xlu0 %v4513_v49 }
 0x355   : > { %800 = vadd.xlane.f32.xlu0 %v4516_v5 }
 0x359   : > { %806 = vadd.xlane.f32.xlu0 %v4519_v54 }
 0x35f   : > { %802 = vadd.xlane.f32.xlu1 %v4522_v52 }
 0x36f   : > { %1084 = vrot.lane.b32.xlu0 %v4365_v50, %s4256_s9 }
 0x370   : > { %1082 = vrot.lane.b32.xlu1 %v4341_v18, %s4256_s9  ;;  %s5374_s9 = scalar_lea.vmem %s5450_s5, %s3357_s29 }
 0x373   : > { %1066 = vrot.lane.b32.xlu0 %v4341_v18, %s4258_s10 }
 0x374   : > { %1068 = vrot.lane.b32.xlu1 %v4365_v50, %s4258_s10 }
 0x377   : > { %1070 = vrot.lane.b32.xlu0 %v4351_v40, %s4258_s10 }
 0x378   : > { %1072 = vrot.lane.b32.xlu1 %v4361_v48, %s4258_s10 }
 0x37b   : > { %1074 = vrot.lane.b32.xlu0 %v4348_v34, %s4258_s10 }
 0x37c   : > { %1076 = vrot.lane.b32.xlu1 %v4345_v28, %s4258_s10 }
 0x37f   : > { %1078 = vrot.lane.b32.xlu0 %v4357_v45, %s4258_s10 }
 0x380   : > { %1080 = vrot.lane.b32.xlu1 %v4353_v41, %s4258_s10 }
 0x383   : > { %1423 = vrot.lane.b32.xlu0 %v4357_v45, %s4259_s11 }
 0x384   : > { %1425 = vrot.lane.b32.xlu1 %v4353_v41, %s4259_s11 }
 0x387   : > { %1413 = vrot.lane.b32.xlu0 %v4365_v50, %s4259_s11 }
 0x388   : > { %1421 = vrot.lane.b32.xlu1 %v4345_v28, %s4259_s11 }
 0x38b   : > { %1675 = vrot.lane.b32.xlu0 %v4353_v41, %s4260_s12 }
 0x38c   : > { %1419 = vrot.lane.b32.xlu1 %v4348_v34, %s4259_s11 }
 0x38f   : > { %1673 = vrot.lane.b32.xlu0 %v4357_v45, %s4260_s12 }
 0x390   : > { %1417 = vrot.lane.b32.xlu1 %v4361_v48, %s4259_s11 }
 0x391   : > { %v781_v7 = vpop.xlane.xlu0 %780 }
 0x392   : > { %v810_v12 = vmul.f32 5.656854, %v781_v7 }
 0x394   : > { %1415 = vrot.lane.b32.xlu1 %v4351_v40, %s4259_s11 }
 0x395   : > { %v777_v8 = vpop.xlane.xlu1 %776 }
 0x396   : > { %v808_v10 = vmul.f32 5.656854, %v777_v8 }
 0x398   : > { %1411 = vrot.lane.b32.xlu1 %v4341_v18, %s4259_s11 }
 0x399   : > { %v783_v9 = vpop.xlane.xlu0 %782 }
 0x39a   : > { %v811_v11 = vmul.f32 5.656854, %v783_v9 }
 0x39c   : > { %4006 = vrcp.f32 %v811_v11 }
 0x39d   : > { %v779_v13 = vpop.xlane.xlu0 %778  ;;  %4008 = vrcp.f32 %v808_v10 }
 0x39e   : > { %v809_v14 = vmul.f32 5.656854, %v779_v13  ;;  %4010 = vrcp.f32 %v810_v12  ;;  %v1141_v12 = vsel %vm550_vm1, %v4462_v56, 0 }
 0x39f   : > { %v785_v16 = vpop.xlane.xlu1 %784 }
 0x3a0   : > { %4012 = vrcp.f32 %v809_v14  ;;  %v812_v19 = vmul.f32 5.656854, %v785_v16 }
 0x3a1   : > { %v789_v20 = vpop.xlane.xlu0 %788 }
 0x3a2   : > { %v814_v21 = vmul.f32 5.656854, %v789_v20  ;;  %4014 = vrcp.f32 %v812_v19 }
 0x3a3   : > { %v791_v22 = vpop.xlane.xlu1 %790 }
 0x3a4   : > { %v815_v24 = vmul.f32 5.656854, %v791_v22  ;;  %v1135_v22 = vsel %vm550_vm1, %v4547_v55, 0 }
 0x3a5   : > { %v787_v25 = vpop.xlane.xlu0 %786 }
 0x3a6   : > { %4016 = vrcp.f32 %v815_v24  ;;  %v813_v26 = vmul.f32 5.656854, %v787_v25 }
 0x3a7   : > { %4018 = vrcp.f32 %v814_v21  ;;  %v797_v27 = vpop.xlane.xlu1 %796 }
 0x3a8   : > { %4020 = vrcp.f32 %v813_v26  ;;  %v818_v63 = vmul.f32 5.656854, %v797_v27 }
 0x3a9   : > { %v4007_v30 = vpop.eup %4006 }
 0x3aa   : > { %v4009_v31 = vpop.eup %4008  ;;  %v831_v39 = vmul.f32 %v4007_v30, %v4473_v29  ;;  %v1144_v29 = vsel %vm550_vm1, %v4386_v1, 0 }
 0x3ab   : > { %v793_v32 = vpop.xlane.xlu1 %792  ;;  %v4011_v35 = vpop.eup %4010  ;;  %v825_v53 = vmul.f32 %v4009_v31, %v4469_v23 }
 0x3ac   : > { %v829_v59 = vmul.f32 %v4011_v35, %v4465_v17  ;;  %v816_v60 = vmul.f32 5.656854, %v793_v32 }
 0x3ad   : > { %v4013_v36 = vpop.eup %4012 }
 0x3ae   : > { %v827_v57 = vmul.f32 %v4013_v36, %v4477_v33  ;;  %v857_v0 = vpack.c.bf16 %v831_v39, %v829_v59 }
 0x3af   : > { %v799_v58 = vpop.xlane.xlu1 %798  ;;  %v4015_v2 = vpop.eup %4014 }
 0x3b0   : > { %v819_v61 = vmul.f32 5.656854, %v799_v58  ;;  %v856_v62 = vpack.c.bf16 %v827_v57, %v825_v53  ;;  %v833_v8 = vmul.f32 %v4015_v2, %v4481_v37  ;;  %v1138_v37 = vsel %vm550_vm1, %v4549_v6, 0 }
 0x3b2   : > { %3638 = vmatprep.mubr.bf16.mxu0 %v856_v62  ;;  %4022 = vrcp.f32 %v819_v61 }
 0x3b3   : > { %v4017_v3 = vpop.eup %4016  ;;  %v795_v4 = vpop.xlane.xlu1 %794  ;;  %3639 = vmatmul.mubr.bf16.vlgmr.msra.gmra.mxu0 %v857_v0  ;;  %4024 = vrcp.f32 %v816_v60 }
 0x3b4   : > { %v4019_v23 = vpop.eup %4018  ;;  %v817_v33 = vmul.f32 5.656854, %v795_v4  ;;  %3655 = vmatpush3.bf16.xpose.msra.mxu0 %v1144_v29  ;;  %4026 = vrcp.f32 %v818_v63  ;;  %v839_v17 = vmul.f32 %v4017_v3, %v4487_v42 }
 0x3b5   : > { %v4021_v7 = vpop.eup %4020  ;;  %3891 = vmatprep.subr.msk.bf16.mxu0 %vm550_vm1, %v4462_v56  ;;  %v837_v10 = vmul.f32 %v4019_v23, %v4484_v38 }
 0x3b6   : > { %4028 = vrcp.f32 %v817_v33  ;;  %v835_v9 = vmul.f32 %v4021_v7, %v4490_v43 }
 0x3b7   : > { %v859_v1 = vpack.c.bf16 %v839_v17, %v837_v10 }
 0x3b8   : > { %v858_v11 = vpack.c.bf16 %v835_v9, %v833_v8 }
 0x3ba   : > { %3642 = vmatprep.mubr.bf16.mxu0 %v858_v11 }
 0x3bb   : > { %3643 = vmatmul.mubr.bf16.gmra.mxu0 %v859_v1 }
 0x3bc   : > { %3657 = vmatpush3.bf16.xpose.msra.mxu0 %v1141_v12 }
 0x3bd   : > { %3892 = vmatprep.subr.msk.bf16.mxu0 %vm550_vm1, %v4549_v6  ;;  %v1089_v6 = vpop.permute.xlu1 %1088 }
 0x3bf   : > { %v4023_v13 = vpop.eup %4022 }
 0x3c0   : > { %v4025_v42 = vpop.eup %4024  ;;  %v847_v38 = vmul.f32 %v4023_v13, %v4499_v47  ;;  %v1087_v47 = vpop.permute.xlu0 %1086 }
 0x3c1   : > { %v4027_v14 = vpop.eup %4026  ;;  %v841_v43 = vmul.f32 %v4025_v42, %v4496_v46  ;;  %v1132_v46 = vsel %vm550_vm1, %v1089_v6, 0 }
 0x3c2   : > { %v845_v56 = vmul.f32 %v4027_v14, %v4493_v44  ;;  %v1129_v44 = vsel %vm550_vm1, %v1087_v47, 0 }
 0x3c3   : > { %v4029_v16 = vpop.eup %4028 }
 0x3c4   : > { %3659 = vmatpush3.bf16.xpose.msra.mxu0 %v1138_v37  ;;  %v843_v19 = vmul.f32 %v4029_v16, %v4502_v51  ;;  %v861_v21 = vpack.c.bf16 %v847_v38, %v845_v56 }
 0x3c5   : > { %3893 = vmatprep.subr.msk.bf16.mxu0 %vm550_vm1, %v4547_v55 }
 0x3c6   : > { %v860_v20 = vpack.c.bf16 %v843_v19, %v841_v43 }
 0x3c8   : > { %3646 = vmatprep.mubr.bf16.mxu0 %v860_v20 }
 0x3c9   : > { %3647 = vmatmul.mubr.bf16.gmra.mxu0 %v861_v21 }
 0x3cc   : > { %3661 = vmatpush3.bf16.xpose.msra.mxu0 %v1135_v22 }
 0x3cd   : > { %3894 = vmatprep.subr.msk.bf16.mxu0 %vm550_vm1, %v1089_v6 }
 0x3d4   : > { %3663 = vmatpush3.bf16.xpose.msra.mxu0 %v1132_v46 }
 0x3d5   : > { %3895 = vmatprep.subr.msk.bf16.mxu0 %vm550_vm1, %v1087_v47 }
 0x3da   : > { %v805_v51 = vpop.xlane.xlu0 %804 }
 0x3db   : > { %v822_v30 = vmul.f32 5.656854, %v805_v51 }
 0x3dc   : > { %3665 = vmatpush3.bf16.xpose.msra.mxu0 %v1129_v44 }
 0x3de   : > { %v801_v24 = vpop.xlane.xlu0 %800 }
 0x3df   : > { %v820_v27 = vmul.f32 5.656854, %v801_v24 }
 0x3e2   : > { %v807_v25 = vpop.xlane.xlu0 %806 }
 0x3e3   : > { %v823_v26 = vmul.f32 5.656854, %v807_v25 }
 0x3e5   : > { %4030 = vrcp.f32 %v823_v26 }
 0x3e6   : > { %v1085_v55 = vpop.permute.xlu0 %1084  ;;  %4032 = vrcp.f32 %v820_v27 }
 0x3e7   : > { %3896 = vmatprep.subr.msk.bf16.mxu0 %vm550_vm1, %v1085_v55  ;;  %v1126_v31 = vsel %vm550_vm1, %v1085_v55, 0  ;;  %4034 = vrcp.f32 %v822_v30 }
 0x3e8   : > { %v803_v32 = vpop.xlane.xlu1 %802  ;;  %3667 = vmatpush3.bf16.xpose.msra.mxu0 %v1126_v31 }
 0x3e9   : > { %v821_v35 = vmul.f32 5.656854, %v803_v32 }
 0x3ea   : > { %v1067_v36 = vpop.permute.xlu0 %1066 }
 0x3eb   : > { %4036 = vrcp.f32 %v821_v35 }
 0x3ec   : > { %v1083_v39 = vpop.permute.xlu1 %1082 }
 0x3ed   : > { %3897 = vmatprep.subr.msk.bf16.mxu0 %vm550_vm1, %v1083_v39  ;;  %v1123_v53 = vsel %vm550_vm1, %v1083_v39, 0 }
 0x3ee   : > { %v1071_v57 = vpop.permute.xlu0 %1070 }
 0x3f0   : > { %v1069_v58 = vpop.permute.xlu1 %1068  ;;  %3669 = vmatpush3.bf16.xpose.msra.mxu0 %v1123_v53 }
 0x3f2   : > { %v4031_v60 = vpop.eup %4030  ;;  %v1075_v62 = vpop.permute.xlu0 %1074 }
 0x3f3   : > { %v4033_v61 = vpop.eup %4032  ;;  %v855_v3 = vmul.f32 %v4031_v60, %v4519_v54 }
 0x3f4   : > { %v1073_v59 = vpop.permute.xlu1 %1072  ;;  %v4035_v63 = vpop.eup %4034  ;;  %v849_v4 = vmul.f32 %v4033_v61, %v4516_v5 }
 0x3f5   : > { %v853_v23 = vmul.f32 %v4035_v63, %v4513_v49 }
 0x3f6   : > { %v1079_v7 = vpop.permute.xlu0 %1078 }
 0x3f7   : > { %v863_v8 = vpack.c.bf16 %v855_v3, %v853_v23 }
 0x3f8   : > { %v4037_v0 = vpop.eup %4036  ;;  %v1077_v2 = vpop.permute.xlu1 %1076 }
 0x3f9   : > { %v851_v29 = vmul.f32 %v4037_v0, %v4522_v52 }
 0x3fa   : > { %v1424_v10 = vpop.permute.xlu0 %1423 }
 0x3fb   : > { %v862_v33 = vpack.c.bf16 %v851_v29, %v849_v4 }
 0x3fc   : > { %v1081_v17 = vpop.permute.xlu1 %1080 }
 0x3fd   : > { %3650 = vmatprep.mubr.bf16.mxu0 %v862_v33 }
 0x3fe   : > { %3651 = vmatmul.mubr.bf16.gmra.mxu0 %v863_v8  ;;  %v1414_v11 = vpop.permute.xlu0 %1413 }
 0x3ff   : > { %3670 = vmatprep.mubr.msk.bf16.mxu0 %vm550_vm1, %v1067_v36 }
 0x400   : > { %v1426_v9 = vpop.permute.xlu1 %1425 }
 0x401   : > { %3686 = vmatprep.subr.bf16.mxu1 %v1426_v9 }
 0x402   : > { %3687 = vmatpush3.bf16.msra.mxu1 %v1426_v9  ;;  %v4598_v12 = vpop.permute.xlu0 %1675 }
 0x403   : > { %3688 = vmatprep.subr.bf16.mxu1 %v1424_v10 }
 0x404   : > { %v1422_v54 = vpop.permute.xlu1 %1421 }
 0x406   : > { %3671 = vmatmul.mubr.msk.bf16.vlgmr.msra.gmra.mxu0 %vm550_vm1, %v1069_v58  ;;  %3689 = vmatpush3.bf16.msra.mxu1 %v1424_v10 }
 0x407   : > { %3674 = vmatprep.mubr.msk.bf16.mxu0 %vm550_vm1, %v1071_v57  ;;  %3690 = vmatprep.subr.bf16.mxu1 %v1422_v54 }
 0x408   : > { %v1420_v49 = vpop.permute.xlu1 %1419 }
 0x40a   : > { %3691 = vmatpush3.bf16.msra.mxu1 %v1422_v54 }
 0x40b   : > { %3692 = vmatprep.subr.bf16.mxu1 %v1420_v49 }
 0x40c   : > { %v1418_v5 = vpop.permute.xlu1 %1417 }
 0x40e   : > { %3675 = vmatmul.mubr.msk.bf16.gmra.mxu0 %vm550_vm1, %v1073_v59  ;;  %3693 = vmatpush3.bf16.msra.mxu1 %v1420_v49 }
 0x40f   : > { %3678 = vmatprep.mubr.msk.bf16.mxu0 %vm550_vm1, %v1075_v62  ;;  %3694 = vmatprep.subr.bf16.mxu1 %v1418_v5 }
 0x410   : > { %v1416_v52 = vpop.permute.xlu1 %1415 }
 0x412   : > { %3695 = vmatpush3.bf16.msra.mxu1 %v1418_v5 }
 0x413   : > { %3696 = vmatprep.subr.bf16.mxu1 %v1416_v52 }
 0x414   : > { %v1412_v1 = vpop.permute.xlu1 %1411 }
 0x416   : > { %3679 = vmatmul.mubr.msk.bf16.gmra.mxu0 %vm550_vm1, %v1077_v2  ;;  %3697 = vmatpush3.bf16.msra.mxu1 %v1416_v52 }
 0x417   : > { %3682 = vmatprep.mubr.msk.bf16.mxu0 %vm550_vm1, %v1079_v7  ;;  %3698 = vmatprep.subr.bf16.mxu1 %v1414_v11 }
 0x41a   : > { %3699 = vmatpush3.bf16.msra.mxu1 %v1414_v11 }
 0x41b   : > { %3700 = vmatprep.subr.bf16.mxu1 %v1412_v1 }
 0x41e   : > { %3683 = vmatmul.mubr.msk.bf16.gmra.mxu0 %vm550_vm1, %v1081_v17  ;;  %3701 = vmatpush3.bf16.msra.mxu1 %v1412_v1 }
 0x41f   : > { %3898 = vmatprep.subr.msk.bf16.mxu1 %vm550_vm1, %v4598_v12 }
 0x473   : > { %v3640_v13 = vpop.f32.mrf.mxu0 }
 0x474   : > { %v3360_v42 = vpack.c.bf16 %v3640_v13, %v3640_v13 }
 0x475   : > { %v922_v14 = vpop.f32.mrf.mxu0 }
 0x476   : > { %1052 = vst.msk [vmem:[#allocation3 + $0x8] sm:$0xf] %vm1049_vm3, %v3360_v42  ;;  %v3358_v16 = vpack.c.bf16 %v922_v14, %v922_v14 }
 0x477   : > { %v3641_v37 = vpop.f32.mrf.mxu0 }
 0x478   : > { %1050 = vst.msk [vmem:[#allocation3] sm:$0xf] %vm1049_vm3, %v3358_v16  ;;  %v3361_v38 = vpack.c.bf16 %v3641_v37, %v3641_v37 }
 0x479   : > { %v925_v43 = vpop.f32.mrf.mxu0 }
 0x47a   : > { %1053 = vst.msk [vmem:[#allocation3 + $0xc] sm:$0xf] %vm1049_vm3, %v3361_v38  ;;  %v3359_v19 = vpack.c.bf16 %v925_v43, %v925_v43 }
 0x47b   : > { %v3644_v56 = vpop.f32.mrf.mxu0 }
 0x47c   : > { %1051 = vst.msk [vmem:[#allocation3 + $0x4] sm:$0xf] %vm1049_vm3, %v3359_v19  ;;  %v3364_v20 = vpack.c.bf16 %v3644_v56, %v3644_v56 }
 0x47d   : > { %v938_v21 = vpop.f32.mrf.mxu0 }
 0x47e   : > { %1056 = vst.msk [vmem:[#allocation3 + $0x18] sm:$0xf] %vm1049_vm3, %v3364_v20  ;;  %v3362_v22 = vpack.c.bf16 %v938_v21, %v938_v21  ;;  %v4666_v21 = vpop.permute.xlu0 %1673 }
 0x47f   : > { %v3645_v6 = vpop.f32.mrf.mxu0 }
 0x480   : > { %1054 = vst.msk [vmem:[#allocation3 + $0x10] sm:$0xf] %vm1049_vm3, %v3362_v22  ;;  %v3365_v46 = vpack.c.bf16 %v3645_v6, %v3645_v6 }
 0x481   : > { %v941_v47 = vpop.f32.mrf.mxu0 }
 0x482   : > { %1057 = vst.msk [vmem:[#allocation3 + $0x1c] sm:$0xf] %vm1049_vm3, %v3365_v46  ;;  %v3363_v51 = vpack.c.bf16 %v941_v47, %v941_v47 }
 0x484   : > { %1055 = vst.msk [vmem:[#allocation3 + $0x14] sm:$0xf] %vm1049_vm3, %v3363_v51 }
 0x489   : > { %v3648_v44 = vpop.f32.mrf.mxu0 }
 0x48a   : > { %v3368_v24 = vpack.c.bf16 %v3648_v44, %v3648_v44 }
 0x48b   : > { %v954_v25 = vpop.f32.mrf.mxu0 }
 0x48c   : > { %1060 = vst.msk [vmem:[#allocation3 + $0x28] sm:$0xf] %vm1049_vm3, %v3368_v24  ;;  %v3366_v26 = vpack.c.bf16 %v954_v25, %v954_v25 }
 0x48d   : > { %v3649_v27 = vpop.f32.mrf.mxu0 }
 0x48e   : > { %1058 = vst.msk [vmem:[#allocation3 + $0x20] sm:$0xf] %vm1049_vm3, %v3366_v26  ;;  %v3369_v30 = vpack.c.bf16 %v3649_v27, %v3649_v27 }
 0x48f   : > { %v957_v55 = vpop.f32.mrf.mxu0 }
 0x490   : > { %1061 = vst.msk [vmem:[#allocation3 + $0x2c] sm:$0xf] %vm1049_vm3, %v3369_v30  ;;  %v3367_v31 = vpack.c.bf16 %v957_v55, %v957_v55 }
 0x492   : > { %1059 = vst.msk [vmem:[#allocation3 + $0x24] sm:$0xf] %vm1049_vm3, %v3367_v31 }
 0x4be   : > { %v3652_v32 = vpop.f32.mrf.mxu0 }
 0x4bf   : > { %v3372_v35 = vpack.c.bf16 %v3652_v32, %v3652_v32 }
 0x4c0   : > { %v970_v36 = vpop.f32.mrf.mxu0 }
 0x4c1   : > { %1064 = vst.msk [vmem:[#allocation3 + $0x38] sm:$0xf] %vm1049_vm3, %v3372_v35  ;;  %v3370_v39 = vpack.c.bf16 %v970_v36, %v970_v36 }
 0x4c2   : > { %v3653_v53 = vpop.f32.mrf.mxu0 }
 0x4c3   : > { %1062 = vst.msk [vmem:[#allocation3 + $0x30] sm:$0xf] %vm1049_vm3, %v3370_v39  ;;  %v3373_v57 = vpack.c.bf16 %v3653_v53, %v3653_v53 }
 0x4c4   : > { %v973_v58 = vpop.f32.mrf.mxu0 }
 0x4c5   : > { %1065 = vst.msk [vmem:[#allocation3 + $0x3c] sm:$0xf] %vm1049_vm3, %v3373_v57  ;;  %v3371_v59 = vpack.c.bf16 %v973_v58, %v973_v58 }
 0x4c6   : > { %v3672_v60 = vpop.f32.mrf.mxu0 }
 0x4c7   : > { %1063 = vst.msk [vmem:[#allocation3 + $0x34] sm:$0xf] %vm1049_vm3, %v3371_v59  ;;  %v1189_v61 = vadd.f32 %v3672_v60, %v4413_v15 }
 0x4c8   : > { %v1180_v62 = vpop.f32.mrf.mxu0 }
 0x4c9   : > { %1247 = vmax.xlane.f32.xlu0 %v1189_v61  ;;  %v1181_v0 = vadd.f32 %v1180_v62, %v4413_v15 }
 0x4ca   : > { %v3673_v63 = vpop.f32.mrf.mxu0 }
 0x4cb   : > { %v1192_v29 = vadd.f32 %v3673_v63, %v4413_v15 }
 0x4cc   : > { %v1183_v2 = vpop.f32.mrf.mxu0 }
 0x4cd   : > { %v1184_v3 = vadd.f32 %v1183_v2, %v4413_v15  ;;  %1243 = vmax.xlane.f32.xlu0 %v1181_v0 }
 0x4ce   : > { %v3676_v4 = vpop.f32.mrf.mxu0 }
 0x4cf   : > { %1245 = vmax.xlane.f32.xlu1 %v1184_v3  ;;  %v1205_v33 = vadd.f32 %v3676_v4, %v4413_v15 }
 0x4d0   : > { %v1196_v23 = vpop.f32.mrf.mxu0 }
 0x4d1   : > { %1249 = vmax.xlane.f32.xlu0 %v1192_v29  ;;  %v1197_v9 = vadd.f32 %v1196_v23, %v4413_v15 }
 0x4d2   : > { %v3677_v7 = vpop.f32.mrf.mxu0 }
 0x4d3   : > { %v4625_v17 = vadd.f32 %v3677_v7, %v4413_v15  ;;  %1255 = vmax.xlane.f32.xlu1 %v1205_v33 }
 0x4d4   : > { %v1199_v8 = vpop.f32.mrf.mxu0 }
 0x4d5   : > { %1257 = vmax.xlane.f32.xlu0 %v4625_v17  ;;  %v1200_v54 = vadd.f32 %v1199_v8, %v4413_v15 }
 0x4d6   : > { %v3680_v10 = vpop.f32.mrf.mxu0 }
 0x4d7   : > { %1251 = vmax.xlane.f32.xlu1 %v1197_v9  ;;  %v4631_v5 = vadd.f32 %v3680_v10, %v4413_v15 }
 0x4d8   : > { %v1212_v49 = vpop.f32.mrf.mxu0 }
 0x4d9   : > { %1253 = vmax.xlane.f32.xlu0 %v1200_v54  ;;  %v4638_v13 = vadd.f32 %v1212_v49, %v4413_v15 }
 0x4da   : > { %v3681_v52 = vpop.f32.mrf.mxu0 }
 0x4db   : > { %v4634_v11 = vadd.f32 %v3681_v52, %v4413_v15  ;;  %1263 = vmax.xlane.f32.xlu1 %v4631_v5 }
 0x4dc   : > { %v1215_v1 = vpop.f32.mrf.mxu0 }
 0x4dd   : > { %1265 = vmax.xlane.f32.xlu0 %v4634_v11  ;;  %v4642_v14 = vadd.f32 %v1215_v1, %v4413_v15 }
 0x4de   : > { %v3684_v42 = vpop.f32.mrf.mxu0 }
 0x4df   : > { %1259 = vmax.xlane.f32.xlu1 %v4638_v13  ;;  %v4646_v37 = vadd.f32 %v3684_v42, %v4413_v15 }
 0x4e0   : > { %v1228_v16 = vpop.f32.mrf.mxu0 }
 0x4e1   : > { %1261 = vmax.xlane.f32.xlu0 %v4642_v14  ;;  %v4654_v56 = vadd.f32 %v1228_v16, %v4413_v15 }
 0x4e2   : > { %v3685_v38 = vpop.f32.mrf.mxu0 }
 0x4e3   : > { %v4650_v43 = vadd.f32 %v3685_v38, %v4413_v15  ;;  %1271 = vmax.xlane.f32.xlu1 %v4646_v37 }
 0x4e4   : > { %v1231_v19 = vpop.f32.mrf.mxu0 }
 0x4e5   : > { %1273 = vmax.xlane.f32.xlu0 %v4650_v43  ;;  %v4658_v20 = vadd.f32 %v1231_v19, %v4413_v15 }
 0x4e7   : > { %1267 = vmax.xlane.f32.xlu1 %v4654_v56 }
 0x4e9   : > { %1269 = vmax.xlane.f32.xlu0 %v4658_v20 }
 0x4f8   : > { %1671 = vrot.lane.b32.xlu1 %v4345_v28, %s4260_s12 }
 0x4ff   : > { %1669 = vrot.lane.b32.xlu0 %v4348_v34, %s4260_s12 }
 0x552   : > { %v1248_v22 = vpop.xlane.xlu0 %1247 }
 0x553   : > { %v1277_v6 = vsub.f32 %v1189_v61, %v1248_v22 }
 0x555   : > { %v1295_v46 = vmul.f32 1.442695, %v1277_v6 }
 0x556   : > { %v1244_v47 = vpop.xlane.xlu0 %1243 }
 0x557   : > { %4038 = vpow2.f32 %v1295_v46  ;;  %v1275_v51 = vsub.f32 %v1181_v0, %v1244_v47 }
 0x558   : > { %v1246_v44 = vpop.xlane.xlu1 %1245 }
 0x559   : > { %v1291_v24 = vmul.f32 1.442695, %v1275_v51  ;;  %v1276_v26 = vsub.f32 %v1184_v3, %v1246_v44 }
 0x55a   : > { %v1250_v25 = vpop.xlane.xlu0 %1249 }
 0x55b   : > { %4040 = vpow2.f32 %v1291_v24  ;;  %v1278_v27 = vsub.f32 %v1192_v29, %v1250_v25  ;;  %v1293_v32 = vmul.f32 1.442695, %v1276_v26 }
 0x55c   : > { %v1256_v30 = vpop.xlane.xlu1 %1255 }
 0x55d   : > { %v1297_v55 = vmul.f32 1.442695, %v1278_v27  ;;  %v1281_v35 = vsub.f32 %v1205_v33, %v1256_v30 }
 0x55e   : > { %v1258_v31 = vpop.xlane.xlu0 %1257 }
 0x55f   : > { %4042 = vpow2.f32 %v1297_v55  ;;  %v1282_v39 = vsub.f32 %v4625_v17, %v1258_v31  ;;  %v1303_v58 = vmul.f32 1.442695, %v1281_v35 }
 0x560   : > { %v1252_v36 = vpop.xlane.xlu1 %1251  ;;  %4044 = vpow2.f32 %v1293_v32 }
 0x561   : > { %v1279_v53 = vsub.f32 %v1197_v9, %v1252_v36  ;;  %v1305_v63 = vmul.f32 1.442695, %v1282_v39 }
 0x562   : > { %v1254_v57 = vpop.xlane.xlu0 %1253 }
 0x563   : > { %v1299_v59 = vmul.f32 1.442695, %v1279_v53  ;;  %v1280_v60 = vsub.f32 %v1200_v54, %v1254_v57 }
 0x564   : > { %v4669_v61 = vpop.eup %4038  ;;  %v1264_v62 = vpop.xlane.xlu1 %1263 }
 0x565   : > { %4046 = vpow2.f32 %v1299_v59  ;;  %v1285_v0 = vsub.f32 %v4631_v5, %v1264_v62  ;;  %1327 = vadd.xlane.f32.xlu0 %v4669_v61  ;;  %v1301_v2 = vmul.f32 1.442695, %v1280_v60 }
 0x566   : > { %4048 = vpow2.f32 %v1303_v58  ;;  %v1266_v4 = vpop.xlane.xlu0 %1265 }
 0x567   : > { %4050 = vpow2.f32 %v1305_v63  ;;  %v1311_v23 = vmul.f32 1.442695, %v1285_v0  ;;  %v1286_v17 = vsub.f32 %v4634_v11, %v1266_v4 }
 0x568   : > { %v4673_v3 = vpop.eup %4040  ;;  %v1260_v29 = vpop.xlane.xlu1 %1259  ;;  %4052 = vpow2.f32 %v1301_v2 }
 0x569   : > { %v1283_v33 = vsub.f32 %v4638_v13, %v1260_v29  ;;  %1323 = vadd.xlane.f32.xlu1 %v4673_v3  ;;  %4054 = vpow2.f32 %v1311_v23  ;;  %v1313_v54 = vmul.f32 1.442695, %v1286_v17 }
 0x56a   : > { %v1262_v9 = vpop.xlane.xlu0 %1261 }
 0x56b   : > { %v1307_v8 = vmul.f32 1.442695, %v1283_v33  ;;  %v1284_v49 = vsub.f32 %v4642_v14, %v1262_v9 }
 0x56c   : > { %v4677_v7 = vpop.eup %4042  ;;  %v1272_v19 = vpop.xlane.xlu1 %1271 }
 0x56d   : > { %1329 = vadd.xlane.f32.xlu0 %v4677_v7  ;;  %v4681_v10 = vpop.eup %4044  ;;  %4056 = vpow2.f32 %v1307_v8  ;;  %v1309_v11 = vmul.f32 1.442695, %v1284_v49  ;;  %v1289_v22 = vsub.f32 %v4646_v37, %v1272_v19 }
 0x56e   : > { %4058 = vpow2.f32 %v1313_v54  ;;  %v1274_v51 = vpop.xlane.xlu0 %1273 }
 0x56f   : > { %4060 = vpow2.f32 %v1309_v11  ;;  %v1319_v46 = vmul.f32 1.442695, %v1289_v22  ;;  %v1290_v44 = vsub.f32 %v4650_v43, %v1274_v51 }
 0x570   : > { %v1268_v6 = vpop.xlane.xlu1 %1267 }
 0x571   : > { %1325 = vadd.xlane.f32.xlu0 %v4681_v10  ;;  %v1287_v47 = vsub.f32 %v4654_v56, %v1268_v6  ;;  %4062 = vpow2.f32 %v1319_v46  ;;  %v1321_v26 = vmul.f32 1.442695, %v1290_v44 }
 0x572   : > { %v4685_v5 = vpop.eup %4046  ;;  %v1270_v25 = vpop.xlane.xlu0 %1269 }
 0x573   : > { %1331 = vadd.xlane.f32.xlu1 %v4685_v5  ;;  %v4688_v52 = vpop.eup %4048  ;;  %v1315_v24 = vmul.f32 1.442695, %v1287_v47  ;;  %v1288_v27 = vsub.f32 %v4658_v20, %v1270_v25 }
 0x574   : > { %v4691_v1 = vpop.eup %4050  ;;  %v4753_v31 = vpop.permute.xlu1 %1671 }
 0x575   : > { %1335 = vadd.xlane.f32.xlu0 %v4688_v52  ;;  %v4694_v13 = vpop.eup %4052  ;;  %4064 = vpow2.f32 %v1315_v24  ;;  %v1317_v30 = vmul.f32 1.442695, %v1288_v27 }
 0x576   : > { %v4697_v42 = vpop.eup %4054  ;;  %4066 = vpow2.f32 %v1321_v26  ;;  %v4751_v20 = vpop.permute.xlu0 %1669 }
 0x577   : > { %1337 = vadd.xlane.f32.xlu1 %v4691_v1  ;;  %4068 = vpow2.f32 %v1317_v30 }
 0x579   : > { %1333 = vadd.xlane.f32.xlu0 %v4694_v13 }
 0x57a   : > { %v4700_v14 = vpop.eup %4056 }
 0x57b   : > { %1343 = vadd.xlane.f32.xlu1 %v4697_v42  ;;  %v4703_v16 = vpop.eup %4058 }
 0x57c   : > { %v4706_v38 = vpop.eup %4060 }
 0x57e   : > { %v4717_v37 = vpop.eup %4062 }
 0x57f   : > { %1339 = vadd.xlane.f32.xlu1 %v4700_v14 }
 0x582   : > { %v4720_v55 = vpop.eup %4064 }
 0x583   : > { %1345 = vadd.xlane.f32.xlu1 %v4703_v16  ;;  %v4723_v56 = vpop.eup %4066 }
 0x584   : > { %v4726_v43 = vpop.eup %4068 }
 0x587   : > { %1341 = vadd.xlane.f32.xlu1 %v4706_v38 }
 0x58f   : > { %1665 = vrot.lane.b32.xlu0 %v4351_v40, %s4260_s12 }
 0x598   : > { %1667 = vrot.lane.b32.xlu1 %v4361_v48, %s4260_s12 }
 0x5ae   : > { %1351 = vadd.xlane.f32.xlu0 %v4717_v37 }
 0x5b2   : > { %1347 = vadd.xlane.f32.xlu0 %v4720_v55 }
 0x5b6   : > { %1353 = vadd.xlane.f32.xlu0 %v4723_v56 }
 0x5bc   : > { %1349 = vadd.xlane.f32.xlu1 %v4726_v43 }
 0x5cc   : > { %1663 = vrot.lane.b32.xlu0 %v4365_v50, %s4260_s12 }
 0x5cd   : > { %1661 = vrot.lane.b32.xlu1 %v4341_v18, %s4260_s12 }
 0x5d0   : > { %1645 = vrot.lane.b32.xlu0 %v4341_v18, %s4261_s13 }
 0x5d1   : > { %1647 = vrot.lane.b32.xlu1 %v4365_v50, %s4261_s13 }
 0x5d4   : > { %1649 = vrot.lane.b32.xlu0 %v4351_v40, %s4261_s13 }
 0x5d5   : > { %1651 = vrot.lane.b32.xlu1 %v4361_v48, %s4261_s13 }
 0x5d8   : > { %1653 = vrot.lane.b32.xlu0 %v4348_v34, %s4261_s13 }
 0x5d9   : > { %1655 = vrot.lane.b32.xlu1 %v4345_v28, %s4261_s13 }
 0x5dc   : > { %1657 = vrot.lane.b32.xlu0 %v4357_v45, %s4261_s13 }
 0x5dd   : > { %1659 = vrot.lane.b32.xlu1 %v4353_v41, %s4261_s13 }
 0x5e0   : > { %2002 = vrot.lane.b32.xlu0 %v4357_v45, %s4262_s14 }
 0x5e1   : > { %2004 = vrot.lane.b32.xlu1 %v4353_v41, %s4262_s14 }
 0x5e4   : > { %1992 = vrot.lane.b32.xlu0 %v4365_v50, %s4262_s14 }
 0x5e5   : > { %2000 = vrot.lane.b32.xlu1 %v4345_v28, %s4262_s14 }
 0x5e8   : > { %2254 = vrot.lane.b32.xlu0 %v4353_v41, %s4263_s15 }
 0x5e9   : > { %1998 = vrot.lane.b32.xlu1 %v4348_v34, %s4262_s14 }
 0x5ec   : > { %2252 = vrot.lane.b32.xlu0 %v4357_v45, %s4263_s15 }
 0x5ed   : > { %1996 = vrot.lane.b32.xlu1 %v4361_v48, %s4262_s14 }
 0x5ee   : > { %v1328_v32 = vpop.xlane.xlu0 %1327 }
 0x5ef   : > { %v1357_v57 = vmul.f32 5.656854, %v1328_v32 }
 0x5f1   : > { %1994 = vrot.lane.b32.xlu1 %v4351_v40, %s4262_s14 }
 0x5f2   : > { %v1324_v35 = vpop.xlane.xlu1 %1323 }
 0x5f3   : > { %v1355_v39 = vmul.f32 5.656854, %v1324_v35 }
 0x5f5   : > { %1990 = vrot.lane.b32.xlu1 %v4341_v18, %s4262_s14 }
 0x5f6   : > { %v1330_v36 = vpop.xlane.xlu0 %1329 }
 0x5f7   : > { %v1358_v53 = vmul.f32 5.656854, %v1330_v36 }
 0x5f9   : > { %4070 = vrcp.f32 %v1358_v53 }
 0x5fa   : > { %v1326_v58 = vpop.xlane.xlu0 %1325  ;;  %4072 = vrcp.f32 %v1355_v39 }
 0x5fb   : > { %v1356_v59 = vmul.f32 5.656854, %v1326_v58  ;;  %4074 = vrcp.f32 %v1357_v57  ;;  %v1720_v57 = vsel %vm550_vm1, %v4666_v21, 0 }
 0x5fc   : > { %v1332_v60 = vpop.xlane.xlu1 %1331 }
 0x5fd   : > { %4076 = vrcp.f32 %v1356_v59  ;;  %v1359_v62 = vmul.f32 5.656854, %v1332_v60 }
 0x5fe   : > { %v1336_v63 = vpop.xlane.xlu0 %1335 }
 0x5ff   : > { %v1361_v0 = vmul.f32 5.656854, %v1336_v63  ;;  %4078 = vrcp.f32 %v1359_v62 }
 0x600   : > { %v1338_v2 = vpop.xlane.xlu1 %1337 }
 0x601   : > { %v1362_v4 = vmul.f32 5.656854, %v1338_v2  ;;  %v1714_v2 = vsel %vm550_vm1, %v4751_v20, 0 }
 0x602   : > { %v1334_v29 = vpop.xlane.xlu0 %1333 }
 0x603   : > { %4080 = vrcp.f32 %v1362_v4  ;;  %v1360_v23 = vmul.f32 5.656854, %v1334_v29 }
 0x604   : > { %4082 = vrcp.f32 %v1361_v0  ;;  %v1344_v33 = vpop.xlane.xlu1 %1343 }
 0x605   : > { %4084 = vrcp.f32 %v1360_v23  ;;  %v1365_v24 = vmul.f32 5.656854, %v1344_v33 }
 0x606   : > { %v4071_v17 = vpop.eup %4070 }
 0x607   : > { %v4073_v8 = vpop.eup %4072  ;;  %v1378_v11 = vmul.f32 %v4071_v17, %v4677_v7  ;;  %v1723_v7 = vsel %vm550_vm1, %v4598_v12, 0 }
 0x608   : > { %v1340_v9 = vpop.xlane.xlu1 %1339  ;;  %v4075_v54 = vpop.eup %4074  ;;  %v1372_v19 = vmul.f32 %v4073_v8, %v4673_v3 }
 0x609   : > { %v1376_v46 = vmul.f32 %v4075_v54, %v4669_v61  ;;  %v1363_v47 = vmul.f32 5.656854, %v1340_v9 }
 0x60a   : > { %v4077_v49 = vpop.eup %4076 }
 0x60b   : > { %v1374_v22 = vmul.f32 %v4077_v49, %v4681_v10  ;;  %v1404_v25 = vpack.c.bf16 %v1378_v11, %v1376_v46 }
 0x60c   : > { %v1346_v6 = vpop.xlane.xlu1 %1345  ;;  %v4079_v26 = vpop.eup %4078 }
 0x60d   : > { %v1366_v51 = vmul.f32 5.656854, %v1346_v6  ;;  %v1403_v44 = vpack.c.bf16 %v1374_v22, %v1372_v19  ;;  %v1380_v35 = vmul.f32 %v4079_v26, %v4685_v5  ;;  %v1717_v5 = vsel %vm550_vm1, %v4753_v31, 0 }
 0x60f   : > { %3702 = vmatprep.mubr.bf16.mxu1 %v1403_v44  ;;  %4086 = vrcp.f32 %v1366_v51 }
 0x610   : > { %v4081_v27 = vpop.eup %4080  ;;  %v1342_v30 = vpop.xlane.xlu1 %1341  ;;  %3703 = vmatmul.mubr.bf16.vlgmr.msra.gmra.mxu1 %v1404_v25  ;;  %4088 = vrcp.f32 %v1363_v47 }
 0x611   : > { %v4083_v3 = vpop.eup %4082  ;;  %v1364_v10 = vmul.f32 5.656854, %v1342_v30  ;;  %3719 = vmatpush3.bf16.xpose.msra.mxu1 %v1723_v7  ;;  %4090 = vrcp.f32 %v1365_v24  ;;  %v1386_v61 = vmul.f32 %v4081_v27, %v4691_v1 }
 0x612   : > { %v4085_v32 = vpop.eup %4084  ;;  %3899 = vmatprep.subr.msk.bf16.mxu1 %vm550_vm1, %v4666_v21  ;;  %v1384_v39 = vmul.f32 %v4083_v3, %v4688_v52 }
 0x613   : > { %4092 = vrcp.f32 %v1364_v10  ;;  %v1382_v36 = vmul.f32 %v4085_v32, %v4694_v13 }
 0x614   : > { %v1406_v12 = vpack.c.bf16 %v1386_v61, %v1384_v39 }
 0x615   : > { %v1405_v53 = vpack.c.bf16 %v1382_v36, %v1380_v35 }
 0x617   : > { %3706 = vmatprep.mubr.bf16.mxu1 %v1405_v53 }
 0x618   : > { %3707 = vmatmul.mubr.bf16.gmra.mxu1 %v1406_v12 }
 0x619   : > { %3721 = vmatpush3.bf16.xpose.msra.mxu1 %v1720_v57 }
 0x61a   : > { %3900 = vmatprep.subr.msk.bf16.mxu1 %vm550_vm1, %v4753_v31  ;;  %v1668_v31 = vpop.permute.xlu1 %1667 }
 0x61c   : > { %v4087_v58 = vpop.eup %4086 }
 0x61d   : > { %v4089_v1 = vpop.eup %4088  ;;  %v1394_v52 = vmul.f32 %v4087_v58, %v4703_v16  ;;  %v1666_v16 = vpop.permute.xlu0 %1665 }
 0x61e   : > { %v4091_v59 = vpop.eup %4090  ;;  %v1388_v13 = vmul.f32 %v4089_v1, %v4700_v14  ;;  %v1711_v14 = vsel %vm550_vm1, %v1668_v31, 0 }
 0x61f   : > { %v1392_v21 = vmul.f32 %v4091_v59, %v4697_v42  ;;  %v1708_v42 = vsel %vm550_vm1, %v1666_v16, 0 }
 0x620   : > { %v4093_v60 = vpop.eup %4092 }
 0x621   : > { %3723 = vmatpush3.bf16.xpose.msra.mxu1 %v1717_v5  ;;  %v1390_v62 = vmul.f32 %v4093_v60, %v4706_v38  ;;  %v1408_v0 = vpack.c.bf16 %v1394_v52, %v1392_v21 }
 0x622   : > { %3901 = vmatprep.subr.msk.bf16.mxu1 %vm550_vm1, %v4751_v20 }
 0x623   : > { %v1407_v63 = vpack.c.bf16 %v1390_v62, %v1388_v13 }
 0x625   : > { %3710 = vmatprep.mubr.bf16.mxu1 %v1407_v63 }
 0x626   : > { %3711 = vmatmul.mubr.bf16.gmra.mxu1 %v1408_v0 }
 0x629   : > { %3725 = vmatpush3.bf16.xpose.msra.mxu1 %v1714_v2 }
 0x62a   : > { %3902 = vmatprep.subr.msk.bf16.mxu1 %vm550_vm1, %v1668_v31 }
 0x631   : > { %3727 = vmatpush3.bf16.xpose.msra.mxu1 %v1711_v14 }
 0x632   : > { %3903 = vmatprep.subr.msk.bf16.mxu1 %vm550_vm1, %v1666_v16 }
 0x637   : > { %v1352_v38 = vpop.xlane.xlu0 %1351 }
 0x638   : > { %v1369_v17 = vmul.f32 5.656854, %v1352_v38 }
 0x639   : > { %3729 = vmatpush3.bf16.xpose.msra.mxu1 %v1708_v42 }
 0x63b   : > { %v1348_v4 = vpop.xlane.xlu0 %1347 }
 0x63c   : > { %v1367_v33 = vmul.f32 5.656854, %v1348_v4 }
 0x63f   : > { %v1354_v29 = vpop.xlane.xlu0 %1353 }
 0x640   : > { %v1370_v23 = vmul.f32 5.656854, %v1354_v29 }
 0x642   : > { %4094 = vrcp.f32 %v1370_v23 }
 0x643   : > { %v1664_v20 = vpop.permute.xlu0 %1663  ;;  %4096 = vrcp.f32 %v1367_v33 }
 0x644   : > { %3904 = vmatprep.subr.msk.bf16.mxu1 %vm550_vm1, %v1664_v20  ;;  %v1705_v8 = vsel %vm550_vm1, %v1664_v20, 0  ;;  %4098 = vrcp.f32 %v1369_v17 }
 0x645   : > { %v1350_v9 = vpop.xlane.xlu1 %1349  ;;  %3731 = vmatpush3.bf16.xpose.msra.mxu1 %v1705_v8 }
 0x646   : > { %v1368_v54 = vmul.f32 5.656854, %v1350_v9 }
 0x647   : > { %v1646_v49 = vpop.permute.xlu0 %1645 }
 0x648   : > { %4100 = vrcp.f32 %v1368_v54 }
 0x649   : > { %v1662_v11 = vpop.permute.xlu1 %1661 }
 0x64a   : > { %3905 = vmatprep.subr.msk.bf16.mxu1 %vm550_vm1, %v1662_v11  ;;  %v1702_v19 = vsel %vm550_vm1, %v1662_v11, 0 }
 0x64b   : > { %v1650_v22 = vpop.permute.xlu0 %1649 }
 0x64d   : > { %v1648_v6 = vpop.permute.xlu1 %1647  ;;  %3733 = vmatpush3.bf16.xpose.msra.mxu1 %v1702_v19 }
 0x64f   : > { %v4095_v47 = vpop.eup %4094  ;;  %v1654_v44 = vpop.permute.xlu0 %1653 }
 0x650   : > { %v4097_v51 = vpop.eup %4096  ;;  %v1402_v27 = vmul.f32 %v4095_v47, %v4723_v56 }
 0x651   : > { %v1652_v46 = vpop.permute.xlu1 %1651  ;;  %v4099_v24 = vpop.eup %4098  ;;  %v1396_v30 = vmul.f32 %v4097_v51, %v4720_v55 }
 0x652   : > { %v1400_v3 = vmul.f32 %v4099_v24, %v4717_v37 }
 0x653   : > { %v1658_v32 = vpop.permute.xlu0 %1657 }
 0x654   : > { %v1410_v35 = vpack.c.bf16 %v1402_v27, %v1400_v3 }
 0x655   : > { %v4101_v25 = vpop.eup %4100  ;;  %v1656_v26 = vpop.permute.xlu1 %1655 }
 0x656   : > { %v1398_v7 = vmul.f32 %v4101_v25, %v4726_v43 }
 0x657   : > { %v2003_v39 = vpop.permute.xlu0 %2002 }
 0x658   : > { %v1409_v10 = vpack.c.bf16 %v1398_v7, %v1396_v30 }
 0x659   : > { %v1660_v61 = vpop.permute.xlu1 %1659 }
 0x65a   : > { %3714 = vmatprep.mubr.bf16.mxu1 %v1409_v10 }
 0x65b   : > { %3715 = vmatmul.mubr.bf16.gmra.mxu1 %v1410_v35  ;;  %v1993_v53 = vpop.permute.xlu0 %1992 }
 0x65c   : > { %3734 = vmatprep.mubr.msk.bf16.mxu1 %vm550_vm1, %v1646_v49 }
 0x65d   : > { %v2005_v36 = vpop.permute.xlu1 %2004 }
 0x65e   : > { %3750 = vmatprep.subr.bf16.mxu0 %v2005_v36 }
 0x65f   : > { %3751 = vmatpush3.bf16.msra.mxu0 %v2005_v36  ;;  %v4802_v57 = vpop.permute.xlu0 %2254 }
 0x660   : > { %3752 = vmatprep.subr.bf16.mxu0 %v2003_v39 }
 0x661   : > { %v2001_v56 = vpop.permute.xlu1 %2000 }
 0x663   : > { %3735 = vmatmul.mubr.msk.bf16.vlgmr.msra.gmra.mxu1 %vm550_vm1, %v1648_v6  ;;  %3753 = vmatpush3.bf16.msra.mxu0 %v2003_v39 }
 0x664   : > { %3738 = vmatprep.mubr.msk.bf16.mxu1 %vm550_vm1, %v1650_v22  ;;  %3754 = vmatprep.subr.bf16.mxu0 %v2001_v56 }
 0x665   : > { %v1999_v37 = vpop.permute.xlu1 %1998 }
 0x667   : > { %3755 = vmatpush3.bf16.msra.mxu0 %v2001_v56  ;;  %v4886_v56 = vpop.permute.xlu0 %2252 }
 0x668   : > { %3756 = vmatprep.subr.bf16.mxu0 %v1999_v37 }
 0x669   : > { %v1997_v55 = vpop.permute.xlu1 %1996 }
 0x66b   : > { %3739 = vmatmul.mubr.msk.bf16.gmra.mxu1 %vm550_vm1, %v1652_v46  ;;  %3757 = vmatpush3.bf16.msra.mxu0 %v1999_v37 }
 0x66c   : > { %3742 = vmatprep.mubr.msk.bf16.mxu1 %vm550_vm1, %v1654_v44  ;;  %3758 = vmatprep.subr.bf16.mxu0 %v1997_v55 }
 0x66d   : > { %v1995_v43 = vpop.permute.xlu1 %1994 }
 0x66f   : > { %3759 = vmatpush3.bf16.msra.mxu0 %v1997_v55 }
 0x670   : > { %3760 = vmatprep.subr.bf16.mxu0 %v1995_v43 }
 0x671   : > { %v1991_v12 = vpop.permute.xlu1 %1990 }
 0x673   : > { %3743 = vmatmul.mubr.msk.bf16.gmra.mxu1 %vm550_vm1, %v1656_v26  ;;  %3761 = vmatpush3.bf16.msra.mxu0 %v1995_v43 }
 0x674   : > { %3746 = vmatprep.mubr.msk.bf16.mxu1 %vm550_vm1, %v1658_v32  ;;  %3762 = vmatprep.subr.bf16.mxu0 %v1993_v53 }
 0x677   : > { %3763 = vmatpush3.bf16.msra.mxu0 %v1993_v53 }
 0x678   : > { %3764 = vmatprep.subr.bf16.mxu0 %v1991_v12 }
 0x67b   : > { %3747 = vmatmul.mubr.msk.bf16.gmra.mxu1 %vm550_vm1, %v1660_v61  ;;  %3765 = vmatpush3.bf16.msra.mxu0 %v1991_v12 }
 0x67c   : > { %3906 = vmatprep.subr.msk.bf16.mxu0 %vm550_vm1, %v4802_v57 }
 0x6d0   : > { %v4807_v58 = vpop.f32.mrf.mxu1 }
 0x6d2   : > { %v4809_v1 = vpop.f32.mrf.mxu1 }
 0x6d4   : > { %v4811_v59 = vpop.f32.mrf.mxu1 }
 0x6d6   : > { %v4813_v60 = vpop.f32.mrf.mxu1 }
 0x6d8   : > { %v4815_v5 = vpop.f32.mrf.mxu1 }
 0x6da   : > { %v4817_v52 = vpop.f32.mrf.mxu1 }
 0x6dc   : > { %v4819_v13 = vpop.f32.mrf.mxu1 }
 0x6de   : > { %v4821_v62 = vpop.f32.mrf.mxu1 }
 0x6e6   : > { %v4823_v21 = vpop.f32.mrf.mxu1 }
 0x6e8   : > { %v4825_v63 = vpop.f32.mrf.mxu1 }
 0x6ea   : > { %v4827_v0 = vpop.f32.mrf.mxu1 }
 0x6ec   : > { %v4829_v2 = vpop.f32.mrf.mxu1 }
 0x71b   : > { %v4831_v31 = vpop.f32.mrf.mxu1 }
 0x71d   : > { %v4833_v14 = vpop.f32.mrf.mxu1 }
 0x71f   : > { %v4835_v16 = vpop.f32.mrf.mxu1 }
 0x721   : > { %v4837_v38 = vpop.f32.mrf.mxu1 }
 0x723   : > { %v3736_v42 = vpop.f32.mrf.mxu1 }
 0x724   : > { %v1768_v4 = vadd.f32 %v3736_v42, %v4413_v15 }
 0x725   : > { %v1759_v29 = vpop.f32.mrf.mxu1 }
 0x726   : > { %1826 = vmax.xlane.f32.xlu0 %v1768_v4  ;;  %v1760_v33 = vadd.f32 %v1759_v29, %v4413_v15 }
 0x727   : > { %v3737_v23 = vpop.f32.mrf.mxu1 }
 0x728   : > { %v1771_v9 = vadd.f32 %v3737_v23, %v4413_v15 }
 0x729   : > { %v1762_v17 = vpop.f32.mrf.mxu1 }
 0x72a   : > { %v1763_v20 = vadd.f32 %v1762_v17, %v4413_v15  ;;  %1822 = vmax.xlane.f32.xlu0 %v1760_v33 }
 0x72b   : > { %v3740_v8 = vpop.f32.mrf.mxu1 }
 0x72c   : > { %1824 = vmax.xlane.f32.xlu1 %v1763_v20  ;;  %v1784_v49 = vadd.f32 %v3740_v8, %v4413_v15 }
 0x72d   : > { %v1775_v54 = vpop.f32.mrf.mxu1 }
 0x72e   : > { %1828 = vmax.xlane.f32.xlu0 %v1771_v9  ;;  %v1776_v6 = vadd.f32 %v1775_v54, %v4413_v15 }
 0x72f   : > { %v3741_v11 = vpop.f32.mrf.mxu1 }
 0x730   : > { %v4845_v19 = vadd.f32 %v3741_v11, %v4413_v15  ;;  %1834 = vmax.xlane.f32.xlu1 %v1784_v49 }
 0x731   : > { %v1778_v22 = vpop.f32.mrf.mxu1 }
 0x732   : > { %1836 = vmax.xlane.f32.xlu0 %v4845_v19  ;;  %v1779_v47 = vadd.f32 %v1778_v22, %v4413_v15 }
 0x733   : > { %v3744_v46 = vpop.f32.mrf.mxu1 }
 0x734   : > { %1830 = vmax.xlane.f32.xlu1 %v1776_v6  ;;  %v4851_v44 = vadd.f32 %v3744_v46, %v4413_v15 }
 0x735   : > { %v1791_v51 = vpop.f32.mrf.mxu1 }
 0x736   : > { %1832 = vmax.xlane.f32.xlu0 %v1779_v47  ;;  %v4858_v27 = vadd.f32 %v1791_v51, %v4413_v15 }
 0x737   : > { %v3745_v24 = vpop.f32.mrf.mxu1 }
 0x738   : > { %v4854_v25 = vadd.f32 %v3745_v24, %v4413_v15  ;;  %1842 = vmax.xlane.f32.xlu1 %v4851_v44 }
 0x739   : > { %v1794_v26 = vpop.f32.mrf.mxu1 }
 0x73a   : > { %1844 = vmax.xlane.f32.xlu0 %v4854_v25  ;;  %v4862_v7 = vadd.f32 %v1794_v26, %v4413_v15 }
 0x73b   : > { %v3748_v30 = vpop.f32.mrf.mxu1 }
 0x73c   : > { %1838 = vmax.xlane.f32.xlu1 %v4858_v27  ;;  %v4866_v10 = vadd.f32 %v3748_v30, %v4413_v15 }
 0x73d   : > { %v1807_v3 = vpop.f32.mrf.mxu1 }
 0x73e   : > { %1840 = vmax.xlane.f32.xlu0 %v4862_v7  ;;  %v4874_v36 = vadd.f32 %v1807_v3, %v4413_v15 }
 0x73f   : > { %v3749_v32 = vpop.f32.mrf.mxu1 }
 0x740   : > { %v4870_v61 = vadd.f32 %v3749_v32, %v4413_v15  ;;  %1850 = vmax.xlane.f32.xlu1 %v4866_v10 }
 0x741   : > { %v1810_v35 = vpop.f32.mrf.mxu1 }
 0x742   : > { %1852 = vmax.xlane.f32.xlu0 %v4870_v61  ;;  %v4878_v39 = vadd.f32 %v1810_v35, %v4413_v15 }
 0x744   : > { %1846 = vmax.xlane.f32.xlu1 %v4874_v36 }
 0x746   : > { %1848 = vmax.xlane.f32.xlu0 %v4878_v39 }
 0x755   : > { %2250 = vrot.lane.b32.xlu1 %v4345_v28, %s4263_s15 }
 0x75c   : > { %2248 = vrot.lane.b32.xlu0 %v4348_v34, %s4263_s15 }
 0x7af   : > { %v1827_v37 = vpop.xlane.xlu0 %1826 }
 0x7b0   : > { %v1856_v55 = vsub.f32 %v1768_v4, %v1827_v37 }
 0x7b2   : > { %v1874_v43 = vmul.f32 1.442695, %v1856_v55 }
 0x7b3   : > { %v1823_v53 = vpop.xlane.xlu0 %1822 }
 0x7b4   : > { %4102 = vpow2.f32 %v1874_v43  ;;  %v1854_v12 = vsub.f32 %v1760_v33, %v1823_v53 }
 0x7b5   : > { %v1825_v42 = vpop.xlane.xlu1 %1824 }
 0x7b6   : > { %v1870_v29 = vmul.f32 1.442695, %v1854_v12  ;;  %v1855_v17 = vsub.f32 %v1763_v20, %v1825_v42 }
 0x7b7   : > { %v1829_v23 = vpop.xlane.xlu0 %1828 }
 0x7b8   : > { %4104 = vpow2.f32 %v1870_v29  ;;  %v1857_v8 = vsub.f32 %v1771_v9, %v1829_v23  ;;  %v1872_v46 = vmul.f32 1.442695, %v1855_v17 }
 0x7b9   : > { %v1835_v54 = vpop.xlane.xlu1 %1834 }
 0x7ba   : > { %v1876_v11 = vmul.f32 1.442695, %v1857_v8  ;;  %v1860_v51 = vsub.f32 %v1784_v49, %v1835_v54 }
 0x7bb   : > { %v1837_v22 = vpop.xlane.xlu0 %1836 }
 0x7bc   : > { %4106 = vpow2.f32 %v1876_v11  ;;  %v1861_v26 = vsub.f32 %v4845_v19, %v1837_v22  ;;  %v1882_v3 = vmul.f32 1.442695, %v1860_v51 }
 0x7bd   : > { %v1831_v24 = vpop.xlane.xlu1 %1830  ;;  %4108 = vpow2.f32 %v1872_v46 }
 0x7be   : > { %v1858_v4 = vsub.f32 %v1776_v6, %v1831_v24  ;;  %v1884_v20 = vmul.f32 1.442695, %v1861_v26 }
 0x7bf   : > { %v1833_v30 = vpop.xlane.xlu0 %1832 }
 0x7c0   : > { %v1878_v33 = vmul.f32 1.442695, %v1858_v4  ;;  %v1859_v32 = vsub.f32 %v1779_v47, %v1833_v30 }
 0x7c1   : > { %v4889_v35 = vpop.eup %4102  ;;  %v1843_v37 = vpop.xlane.xlu1 %1842 }
 0x7c2   : > { %4110 = vpow2.f32 %v1878_v33  ;;  %v1864_v9 = vsub.f32 %v4851_v44, %v1843_v37  ;;  %1906 = vadd.xlane.f32.xlu0 %v4889_v35  ;;  %v1880_v49 = vmul.f32 1.442695, %v1859_v32 }
 0x7c3   : > { %4112 = vpow2.f32 %v1882_v3  ;;  %v1845_v19 = vpop.xlane.xlu0 %1844 }
 0x7c4   : > { %4114 = vpow2.f32 %v1884_v20  ;;  %v1890_v43 = vmul.f32 1.442695, %v1864_v9  ;;  %v1865_v44 = vsub.f32 %v4854_v25, %v1845_v19 }
 0x7c5   : > { %v4893_v55 = vpop.eup %4104  ;;  %v1839_v6 = vpop.xlane.xlu1 %1838  ;;  %4116 = vpow2.f32 %v1880_v49 }
 0x7c6   : > { %v1862_v53 = vsub.f32 %v4858_v27, %v1839_v6  ;;  %1902 = vadd.xlane.f32.xlu1 %v4893_v55  ;;  %4118 = vpow2.f32 %v1890_v43  ;;  %v1892_v23 = vmul.f32 1.442695, %v1865_v44 }
 0x7c7   : > { %v1841_v42 = vpop.xlane.xlu0 %1840 }
 0x7c8   : > { %v1886_v12 = vmul.f32 1.442695, %v1862_v53  ;;  %v1863_v17 = vsub.f32 %v4862_v7, %v1841_v42 }
 0x7c9   : > { %v4897_v47 = vpop.eup %4106  ;;  %v1851_v24 = vpop.xlane.xlu1 %1850 }
 0x7ca   : > { %1908 = vadd.xlane.f32.xlu0 %v4897_v47  ;;  %v4901_v29 = vpop.eup %4108  ;;  %4120 = vpow2.f32 %v1886_v12  ;;  %v1888_v25 = vmul.f32 1.442695, %v1863_v17  ;;  %v1868_v26 = vsub.f32 %v4866_v10, %v1851_v24 }
 0x7cb   : > { %4122 = vpow2.f32 %v1892_v23  ;;  %v1853_v33 = vpop.xlane.xlu0 %1852 }
 0x7cc   : > { %4124 = vpow2.f32 %v1888_v25  ;;  %v1898_v30 = vmul.f32 1.442695, %v1868_v26  ;;  %v1869_v32 = vsub.f32 %v4870_v61, %v1853_v33 }
 0x7cd   : > { %v1847_v4 = vpop.xlane.xlu1 %1846 }
 0x7ce   : > { %1904 = vadd.xlane.f32.xlu0 %v4901_v29  ;;  %v1866_v3 = vsub.f32 %v4874_v36, %v1847_v4  ;;  %4126 = vpow2.f32 %v1898_v30  ;;  %v1900_v9 = vmul.f32 1.442695, %v1869_v32 }
 0x7cf   : > { %v4905_v27 = vpop.eup %4110  ;;  %v1849_v20 = vpop.xlane.xlu0 %1848 }
 0x7d0   : > { %1910 = vadd.xlane.f32.xlu1 %v4905_v27  ;;  %v4908_v8 = vpop.eup %4112  ;;  %v1894_v37 = vmul.f32 1.442695, %v1866_v3  ;;  %v1867_v49 = vsub.f32 %v4878_v39, %v1849_v20 }
 0x7d1   : > { %v4911_v54 = vpop.eup %4114  ;;  %v4971_v43 = vpop.permute.xlu1 %2250 }
 0x7d2   : > { %1914 = vadd.xlane.f32.xlu0 %v4908_v8  ;;  %v4914_v11 = vpop.eup %4116  ;;  %4128 = vpow2.f32 %v1894_v37  ;;  %v1896_v19 = vmul.f32 1.442695, %v1867_v49 }
 0x7d3   : > { %v4917_v7 = vpop.eup %4118  ;;  %4130 = vpow2.f32 %v1900_v9  ;;  %v4969_v39 = vpop.permute.xlu0 %2248 }
 0x7d4   : > { %1916 = vadd.xlane.f32.xlu1 %v4911_v54  ;;  %4132 = vpow2.f32 %v1896_v19 }
 0x7d6   : > { %1912 = vadd.xlane.f32.xlu0 %v4914_v11 }
 0x7d7   : > { %v4920_v22 = vpop.eup %4120 }
 0x7d8   : > { %1922 = vadd.xlane.f32.xlu1 %v4917_v7  ;;  %v4923_v46 = vpop.eup %4122 }
 0x7d9   : > { %v4926_v51 = vpop.eup %4124 }
 0x7db   : > { %v4937_v10 = vpop.eup %4126 }
 0x7dc   : > { %1918 = vadd.xlane.f32.xlu1 %v4920_v22 }
 0x7df   : > { %v4940_v6 = vpop.eup %4128 }
 0x7e0   : > { %1924 = vadd.xlane.f32.xlu1 %v4923_v46  ;;  %v4943_v36 = vpop.eup %4130 }
 0x7e1   : > { %v4946_v61 = vpop.eup %4132 }
 0x7e4   : > { %1920 = vadd.xlane.f32.xlu1 %v4926_v51 }
 0x7ec   : > { %2244 = vrot.lane.b32.xlu0 %v4351_v40, %s4263_s15 }
 0x7f5   : > { %2246 = vrot.lane.b32.xlu1 %v4361_v48, %s4263_s15 }
 0x80b   : > { %1930 = vadd.xlane.f32.xlu0 %v4937_v10 }
 0x80f   : > { %1926 = vadd.xlane.f32.xlu0 %v4940_v6 }
 0x813   : > { %1932 = vadd.xlane.f32.xlu0 %v4943_v36 }
 0x819   : > { %1928 = vadd.xlane.f32.xlu1 %v4946_v61 }
 0x829   : > { %2242 = vrot.lane.b32.xlu0 %v4365_v50, %s4263_s15 }
 0x82a   : > { %2240 = vrot.lane.b32.xlu1 %v4341_v18, %s4263_s15 }
 0x82d   : > { %2224 = vrot.lane.b32.xlu0 %v4341_v18, %s4264_s16 }
 0x82e   : > { %2226 = vrot.lane.b32.xlu1 %v4365_v50, %s4264_s16 }
 0x831   : > { %2228 = vrot.lane.b32.xlu0 %v4351_v40, %s4264_s16 }
 0x832   : > { %2230 = vrot.lane.b32.xlu1 %v4361_v48, %s4264_s16 }
 0x835   : > { %2232 = vrot.lane.b32.xlu0 %v4348_v34, %s4264_s16 }
 0x836   : > { %2234 = vrot.lane.b32.xlu1 %v4345_v28, %s4264_s16 }
 0x839   : > { %2236 = vrot.lane.b32.xlu0 %v4357_v45, %s4264_s16 }
 0x83a   : > { %2238 = vrot.lane.b32.xlu1 %v4353_v41, %s4264_s16 }
 0x83d   : > { %2581 = vrot.lane.b32.xlu0 %v4357_v45, %s4265_s17 }
 0x83e   : > { %2583 = vrot.lane.b32.xlu1 %v4353_v41, %s4265_s17 }
 0x841   : > { %2577 = vrot.lane.b32.xlu0 %v4348_v34, %s4265_s17 }
 0x842   : > { %2579 = vrot.lane.b32.xlu1 %v4345_v28, %s4265_s17 }
 0x84b   : > { %v1907_v53 = vpop.xlane.xlu0 %1906 }
 0x84c   : > { %v1936_v17 = vmul.f32 5.656854, %v1907_v53 }
 0x84f   : > { %v1903_v44 = vpop.xlane.xlu1 %1902 }
 0x850   : > { %v1934_v42 = vmul.f32 5.656854, %v1903_v44 }
 0x853   : > { %v1909_v12 = vpop.xlane.xlu0 %1908 }
 0x854   : > { %v1937_v23 = vmul.f32 5.656854, %v1909_v12 }
 0x856   : > { %4134 = vrcp.f32 %v1937_v23 }
 0x857   : > { %v1905_v45 = vpop.xlane.xlu0 %1904  ;;  %4136 = vrcp.f32 %v1934_v42 }
 0x858   : > { %v1935_v41 = vmul.f32 5.656854, %v1905_v45  ;;  %4138 = vrcp.f32 %v1936_v17 }
 0x859   : > { %v1911_v25 = vpop.xlane.xlu1 %1910 }
 0x85a   : > { %4140 = vrcp.f32 %v1935_v41  ;;  %v1938_v34 = vmul.f32 5.656854, %v1911_v25 }
 0x85b   : > { %v1915_v24 = vpop.xlane.xlu0 %1914 }
 0x85c   : > { %v1940_v28 = vmul.f32 5.656854, %v1915_v24  ;;  %4142 = vrcp.f32 %v1938_v34 }
 0x85d   : > { %v1917_v26 = vpop.xlane.xlu1 %1916 }
 0x85e   : > { %v1941_v4 = vmul.f32 5.656854, %v1917_v26 }
 0x85f   : > { %v1913_v30 = vpop.xlane.xlu0 %1912 }
 0x860   : > { %4144 = vrcp.f32 %v1941_v4  ;;  %v1939_v3 = vmul.f32 5.656854, %v1913_v30 }
 0x861   : > { %4146 = vrcp.f32 %v1940_v28  ;;  %v1923_v33 = vpop.xlane.xlu1 %1922 }
 0x862   : > { %4148 = vrcp.f32 %v1939_v3  ;;  %v1944_v41 = vmul.f32 5.656854, %v1923_v33 }
 0x863   : > { %v4135_v32 = vpop.eup %4134 }
 0x864   : > { %v4137_v37 = vpop.eup %4136  ;;  %v1957_v19 = vmul.f32 %v4135_v32, %v4897_v47  ;;  %v2302_v47 = vsel %vm550_vm1, %v4802_v57, 0  ;;  %v2299_v32 = vsel %vm550_vm1, %v4886_v56, 0 }
 0x865   : > { %v1919_v20 = vpop.xlane.xlu1 %1918  ;;  %v4139_v9 = vpop.eup %4138  ;;  %v1951_v53 = vmul.f32 %v4137_v37, %v4893_v55 }
 0x866   : > { %v1955_v42 = vmul.f32 %v4139_v9, %v4889_v35  ;;  %v1942_v23 = vmul.f32 5.656854, %v1919_v20 }
 0x867   : > { %v4141_v49 = vpop.eup %4140 }
 0x868   : > { %v1953_v44 = vmul.f32 %v4141_v49, %v4901_v29  ;;  %v1983_v25 = vpack.c.bf16 %v1957_v19, %v1955_v42 }
 0x869   : > { %v1925_v12 = vpop.xlane.xlu1 %1924  ;;  %v4143_v34 = vpop.eup %4142 }
 0x86a   : > { %v1945_v17 = vmul.f32 5.656854, %v1925_v12  ;;  %v1982_v45 = vpack.c.bf16 %v1953_v44, %v1951_v53  ;;  %v1959_v4 = vmul.f32 %v4143_v34, %v4905_v27  ;;  %v2296_v27 = vsel %vm550_vm1, %v4971_v43, 0 }
 0x86b   : > { %v2293_v44 = vsel %vm550_vm1, %v4969_v39, 0 }
 0x86c   : > { %3766 = vmatprep.mubr.bf16.mxu0 %v1982_v45  ;;  %4150 = vrcp.f32 %v1945_v17 }
 0x86d   : > { %v4145_v24 = vpop.eup %4144  ;;  %v1921_v28 = vpop.xlane.xlu1 %1920  ;;  %3767 = vmatmul.mubr.bf16.vlgmr.msra.gmra.mxu0 %v1983_v25  ;;  %4152 = vrcp.f32 %v1942_v23 }
 0x86e   : > { %v4147_v55 = vpop.eup %4146  ;;  %v1943_v29 = vmul.f32 5.656854, %v1921_v28  ;;  %3783 = vmatpush3.bf16.xpose.msra.mxu0 %v2302_v47  ;;  %4154 = vrcp.f32 %v1944_v41  ;;  %v1965_v35 = vmul.f32 %v4145_v24, %v4911_v54 }
 0x86f   : > { %v4149_v26 = vpop.eup %4148  ;;  %3907 = vmatprep.subr.msk.bf16.mxu0 %vm550_vm1, %v4886_v56  ;;  %v1963_v3 = vmul.f32 %v4147_v55, %v4908_v8 }
 0x870   : > { %4156 = vrcp.f32 %v1943_v29  ;;  %v1961_v30 = vmul.f32 %v4149_v26, %v4914_v11 }
 0x871   : > { %v1985_v57 = vpack.c.bf16 %v1965_v35, %v1963_v3 }
 0x872   : > { %v1984_v33 = vpack.c.bf16 %v1961_v30, %v1959_v4 }
 0x874   : > { %3770 = vmatprep.mubr.bf16.mxu0 %v1984_v33 }
 0x875   : > { %3771 = vmatmul.mubr.bf16.gmra.mxu0 %v1985_v57 }
 0x876   : > { %3785 = vmatpush3.bf16.xpose.msra.mxu0 %v2299_v32 }
 0x877   : > { %3908 = vmatprep.subr.msk.bf16.mxu0 %vm550_vm1, %v4971_v43  ;;  %v2247_v43 = vpop.permute.xlu1 %2246 }
 0x879   : > { %v4151_v37 = vpop.eup %4150 }
 0x87a   : > { %v4153_v54 = vpop.eup %4152  ;;  %v1973_v8 = vmul.f32 %v4151_v37, %v4923_v46  ;;  %v2245_v46 = vpop.permute.xlu0 %2244 }
 0x87b   : > { %v4155_v20 = vpop.eup %4154  ;;  %v1967_v11 = vmul.f32 %v4153_v54, %v4920_v22  ;;  %v2290_v22 = vsel %vm550_vm1, %v2247_v43, 0 }
 0x87c   : > { %v1971_v56 = vmul.f32 %v4155_v20, %v4917_v7  ;;  %v2287_v7 = vsel %vm550_vm1, %v2245_v46, 0 }
 0x87d   : > { %v4157_v9 = vpop.eup %4156 }
 0x87e   : > { %3787 = vmatpush3.bf16.xpose.msra.mxu0 %v2296_v27  ;;  %v1969_v49 = vmul.f32 %v4157_v9, %v4926_v51  ;;  %v1987_v53 = vpack.c.bf16 %v1973_v8, %v1971_v56 }
 0x87f   : > { %3909 = vmatprep.subr.msk.bf16.mxu0 %vm550_vm1, %v4969_v39 }
 0x880   : > { %v1986_v19 = vpack.c.bf16 %v1969_v49, %v1967_v11 }
 0x882   : > { %3774 = vmatprep.mubr.bf16.mxu0 %v1986_v19 }
 0x883   : > { %3775 = vmatmul.mubr.bf16.gmra.mxu0 %v1987_v53 }
 0x886   : > { %3789 = vmatpush3.bf16.xpose.msra.mxu0 %v2293_v44 }
 0x887   : > { %3910 = vmatprep.subr.msk.bf16.mxu0 %vm550_vm1, %v2247_v43 }
 0x88e   : > { %3791 = vmatpush3.bf16.xpose.msra.mxu0 %v2290_v22 }
 0x88f   : > { %3911 = vmatprep.subr.msk.bf16.mxu0 %vm550_vm1, %v2245_v46 }
 0x894   : > { %v1931_v51 = vpop.xlane.xlu0 %1930 }
 0x895   : > { %v1948_v45 = vmul.f32 5.656854, %v1931_v51 }
 0x896   : > { %3793 = vmatpush3.bf16.xpose.msra.mxu0 %v2287_v7 }
 0x898   : > { %v1927_v12 = vpop.xlane.xlu0 %1926 }
 0x899   : > { %v1946_v17 = vmul.f32 5.656854, %v1927_v12 }
 0x89c   : > { %v1933_v42 = vpop.xlane.xlu0 %1932 }
 0x89d   : > { %v1949_v23 = vmul.f32 5.656854, %v1933_v42 }
 0x89f   : > { %4158 = vrcp.f32 %v1949_v23 }
 0x8a0   : > { %v2243_v39 = vpop.permute.xlu0 %2242  ;;  %4160 = vrcp.f32 %v1946_v17 }
 0x8a1   : > { %v2284_v41 = vsel %vm550_vm1, %v2243_v39, 0  ;;  %3912 = vmatprep.subr.msk.bf16.mxu0 %vm550_vm1, %v2243_v39  ;;  %4162 = vrcp.f32 %v1948_v45 }
 0x8a2   : > { %v1929_v25 = vpop.xlane.xlu1 %1928  ;;  %3795 = vmatpush3.bf16.xpose.msra.mxu0 %v2284_v41 }
 0x8a3   : > { %v1947_v34 = vmul.f32 5.656854, %v1929_v25 }
 0x8a4   : > { %v2225_v24 = vpop.permute.xlu0 %2224 }
 0x8a5   : > { %4164 = vrcp.f32 %v1947_v34 }
 0x8a6   : > { %v2241_v28 = vpop.permute.xlu1 %2240 }
 0x8a7   : > { %3913 = vmatprep.subr.msk.bf16.mxu0 %vm550_vm1, %v2241_v28  ;;  %v2281_v47 = vsel %vm550_vm1, %v2241_v28, 0 }
 0x8a8   : > { %v2229_v55 = vpop.permute.xlu0 %2228 }
 0x8aa   : > { %v2227_v29 = vpop.permute.xlu1 %2226  ;;  %3797 = vmatpush3.bf16.xpose.msra.mxu0 %v2281_v47 }
 0x8ac   : > { %v4159_v35 = vpop.eup %4158  ;;  %v2233_v30 = vpop.permute.xlu0 %2232 }
 0x8ad   : > { %v4161_v4 = vpop.eup %4160  ;;  %v1981_v32 = vmul.f32 %v4159_v35, %v4943_v36 }
 0x8ae   : > { %v2231_v26 = vpop.permute.xlu1 %2230  ;;  %v4163_v3 = vpop.eup %4162  ;;  %v1975_v37 = vmul.f32 %v4161_v4, %v4940_v6 }
 0x8af   : > { %v1979_v20 = vmul.f32 %v4163_v3, %v4937_v10 }
 0x8b0   : > { %v2237_v27 = vpop.permute.xlu0 %2236 }
 0x8b1   : > { %v1989_v11 = vpack.c.bf16 %v1981_v32, %v1979_v20 }
 0x8b2   : > { %v4165_v33 = vpop.eup %4164  ;;  %v2235_v57 = vpop.permute.xlu1 %2234 }
 0x8b3   : > { %v1977_v54 = vmul.f32 %v4165_v33, %v4946_v61 }
 0x8b4   : > { %v2582_v56 = vpop.permute.xlu0 %2581 }
 0x8b5   : > { %v1988_v9 = vpack.c.bf16 %v1977_v54, %v1975_v37 }
 0x8b6   : > { %v2239_v8 = vpop.permute.xlu1 %2238 }
 0x8b7   : > { %3778 = vmatprep.mubr.bf16.mxu0 %v1988_v9 }
 0x8b8   : > { %3779 = vmatmul.mubr.bf16.gmra.mxu0 %v1989_v11  ;;  %v2578_v10 = vpop.permute.xlu0 %2577 }
 0x8b9   : > { %3798 = vmatprep.mubr.msk.bf16.mxu0 %vm550_vm1, %v2225_v24 }
 0x8ba   : > { %v2584_v49 = vpop.permute.xlu1 %2583 }
 0x8bb   : > { %3814 = vmatprep.subr.bf16.mxu0 %v2584_v49  ;;  %3866 = vmatprep.subr.bf16.mxu1 %v2584_v49 }
 0x8bc   : > { %3874 = vmatpush3.bf16.msra.mxu1 %v2584_v49 }
 0x8bd   : > { %3867 = vmatprep.subr.bf16.mxu1 %v2582_v56 }
 0x8be   : > { %v2580_v6 = vpop.permute.xlu1 %2579 }
 0x8c0   : > { %3799 = vmatmul.mubr.msk.bf16.vlgmr.msra.gmra.mxu0 %vm550_vm1, %v2227_v29  ;;  %3875 = vmatpush3.bf16.msra.mxu1 %v2582_v56 }
 0x8c1   : > { %3815 = vmatpush3.bf16.msra.mxu0 %v2584_v49  ;;  %3802 = vmatprep.mubr.msk.bf16.mxu0 %vm550_vm1, %v2229_v55 }
 0x8c2   : > { %3816 = vmatprep.subr.bf16.mxu0 %v2582_v56  ;;  %3868 = vmatprep.subr.bf16.mxu1 %v2580_v6 }
 0x8c4   : > { %3876 = vmatpush3.bf16.msra.mxu1 %v2580_v6 }
 0x8c5   : > { %3817 = vmatpush3.bf16.msra.mxu0 %v2582_v56  ;;  %3869 = vmatprep.subr.bf16.mxu1 %v2578_v10 }
 0x8c6   : > { %3818 = vmatprep.subr.bf16.mxu0 %v2580_v6 }
 0x8c8   : > { %3803 = vmatmul.mubr.msk.bf16.gmra.mxu0 %vm550_vm1, %v2231_v26  ;;  %3877 = vmatpush3.bf16.msra.mxu1 %v2578_v10 }
 0x8c9   : > { %3819 = vmatpush3.bf16.msra.mxu0 %v2580_v6  ;;  %3806 = vmatprep.mubr.msk.bf16.mxu0 %vm550_vm1, %v2233_v30 }
 0x8ca   : > { %3820 = vmatprep.subr.bf16.mxu0 %v2578_v10 }
 0x8cd   : > { %3821 = vmatpush3.bf16.msra.mxu0 %v2578_v10 }
 0x8d0   : > { %3807 = vmatmul.mubr.msk.bf16.gmra.mxu0 %vm550_vm1, %v2235_v57 }
 0x8d1   : > { %3810 = vmatprep.mubr.msk.bf16.mxu0 %vm550_vm1, %v2237_v27 }
 0x8d8   : > { %3811 = vmatmul.mubr.msk.bf16.gmra.mxu0 %vm550_vm1, %v2239_v8 }
 0x92d   : > { %v5019_v36 = vpop.f32.mrf.mxu0 }
 0x92f   : > { %v5021_v61 = vpop.f32.mrf.mxu0 }
 0x931   : > { %v5023_v19 = vpop.f32.mrf.mxu0 }
 0x933   : > { %v5025_v53 = vpop.f32.mrf.mxu0 }
 0x935   : > { %v5027_v44 = vpop.f32.mrf.mxu0 }
 0x937   : > { %v5029_v43 = vpop.f32.mrf.mxu0 }
 0x939   : > { %v5031_v22 = vpop.f32.mrf.mxu0 }
 0x93b   : > { %v5033_v46 = vpop.f32.mrf.mxu0 }
 0x943   : > { %v5035_v51 = vpop.f32.mrf.mxu0 }
 0x945   : > { %v5037_v7 = vpop.f32.mrf.mxu0 }
 0x947   : > { %v5039_v12 = vpop.f32.mrf.mxu0 }
 0x949   : > { %v5041_v42 = vpop.f32.mrf.mxu0 }
 0x978   : > { %v5043_v23 = vpop.f32.mrf.mxu0 }
 0x979   : > { %5451 = vst [vmem:[#allocation4_spill] sm:$0xff] %v5043_v23 }
 0x97a   : > { %v5045_v17 = vpop.f32.mrf.mxu0 }
 0x97b   : > { %5452 = vst [vmem:[#allocation5_spill] sm:$0xff] %v5045_v17 }
 0x97c   : > { %v5047_v45 = vpop.f32.mrf.mxu0 }
 0x97d   : > { %5453 = vst [vmem:[#allocation6_spill] sm:$0xff] %v5047_v45 }
 0x97e   : > { %v5049_v39 = vpop.f32.mrf.mxu0 }
 0x97f   : > { %5454 = vst [vmem:[#allocation7_spill] sm:$0xff] %v5049_v39 }
 0x980   : > { %v3800_v41 = vpop.f32.mrf.mxu0 }
 0x981   : > { %v2347_v25 = vadd.f32 %v3800_v41, %v4413_v15 }
 0x982   : > { %v2338_v34 = vpop.f32.mrf.mxu0 }
 0x983   : > { %2405 = vmax.xlane.f32.xlu0 %v2347_v25  ;;  %v2339_v28 = vadd.f32 %v2338_v34, %v4413_v15 }
 0x984   : > { %v3801_v24 = vpop.f32.mrf.mxu0 }
 0x985   : > { %v2350_v26 = vadd.f32 %v3801_v24, %v4413_v15 }
 0x986   : > { %v2341_v47 = vpop.f32.mrf.mxu0 }
 0x987   : > { %v2342_v55 = vadd.f32 %v2341_v47, %v4413_v15  ;;  %2401 = vmax.xlane.f32.xlu0 %v2339_v28 }
 0x988   : > { %v3804_v29 = vpop.f32.mrf.mxu0 }
 0x989   : > { %2403 = vmax.xlane.f32.xlu1 %v2342_v55  ;;  %v2363_v4 = vadd.f32 %v3804_v29, %v4413_v15 }
 0x98a   : > { %v2354_v35 = vpop.f32.mrf.mxu0 }
 0x98b   : > { %2407 = vmax.xlane.f32.xlu0 %v2350_v26  ;;  %v2355_v57 = vadd.f32 %v2354_v35, %v4413_v15 }
 0x98c   : > { %v3805_v30 = vpop.f32.mrf.mxu0 }
 0x98d   : > { %v2366_v3 = vadd.f32 %v3805_v30, %v4413_v15  ;;  %2413 = vmax.xlane.f32.xlu1 %v2363_v4 }
 0x98e   : > { %v2357_v33 = vpop.f32.mrf.mxu0 }
 0x98f   : > { %2415 = vmax.xlane.f32.xlu0 %v2366_v3  ;;  %v5059_v37 = vadd.f32 %v2357_v33, %v4413_v15 }
 0x990   : > { %v3808_v32 = vpop.f32.mrf.mxu0 }
 0x991   : > { %2409 = vmax.xlane.f32.xlu1 %v2355_v57  ;;  %v2379_v20 = vadd.f32 %v3808_v32, %v4413_v15 }
 0x992   : > { %v2370_v54 = vpop.f32.mrf.mxu0 }
 0x993   : > { %2411 = vmax.xlane.f32.xlu0 %v5059_v37  ;;  %v5067_v11 = vadd.f32 %v2370_v54, %v4413_v15 }
 0x994   : > { %v3809_v9 = vpop.f32.mrf.mxu0 }
 0x995   : > { %v5064_v27 = vadd.f32 %v3809_v9, %v4413_v15  ;;  %2421 = vmax.xlane.f32.xlu1 %v2379_v20 }
 0x996   : > { %v2373_v8 = vpop.f32.mrf.mxu0 }
 0x997   : > { %2423 = vmax.xlane.f32.xlu0 %v5064_v27  ;;  %v5071_v56 = vadd.f32 %v2373_v8, %v4413_v15 }
 0x998   : > { %v3812_v49 = vpop.f32.mrf.mxu0 }
 0x999   : > { %2417 = vmax.xlane.f32.xlu1 %v5067_v11  ;;  %v5075_v10 = vadd.f32 %v3812_v49, %v4413_v15 }
 0x99a   : > { %v2386_v6 = vpop.f32.mrf.mxu0 }
 0x99b   : > { %2419 = vmax.xlane.f32.xlu0 %v5071_v56  ;;  %v5083_v47 = vadd.f32 %v2386_v6, %v4413_v15 }
 0x99c   : > { %v3813_v41 = vpop.f32.mrf.mxu0 }
 0x99d   : > { %v5079_v34 = vadd.f32 %v3813_v41, %v4413_v15  ;;  %2429 = vmax.xlane.f32.xlu1 %v5075_v10 }
 0x99e   : > { %v2389_v24 = vpop.f32.mrf.mxu0 }
 0x99f   : > { %2431 = vmax.xlane.f32.xlu0 %v5079_v34  ;;  %v5087_v29 = vadd.f32 %v2389_v24, %v4413_v15 }
 0x9a1   : > { %2425 = vmax.xlane.f32.xlu1 %v5083_v47 }
 0x9a3   : > { %2427 = vmax.xlane.f32.xlu0 %v5087_v29 }
 0x9b2   : > { %2575 = vrot.lane.b32.xlu1 %v4361_v48, %s4265_s17 }
 0x9b9   : > { %2573 = vrot.lane.b32.xlu0 %v4351_v40, %s4265_s17 }
 0xa0c   : > { %v2406_v35 = vpop.xlane.xlu0 %2405 }
 0xa0d   : > { %v2435_v30 = vsub.f32 %v2347_v25, %v2406_v35 }
 0xa0f   : > { %v2453_v33 = vmul.f32 1.442695, %v2435_v30 }
 0xa10   : > { %v2402_v32 = vpop.xlane.xlu0 %2401 }
 0xa11   : > { %4166 = vpow2.f32 %v2453_v33  ;;  %v2433_v54 = vsub.f32 %v2339_v28, %v2402_v32 }
 0xa12   : > { %v2404_v9 = vpop.xlane.xlu1 %2403 }
 0xa13   : > { %v2449_v8 = vmul.f32 1.442695, %v2433_v54  ;;  %v2434_v49 = vsub.f32 %v2342_v55, %v2404_v9 }
 0xa14   : > { %v2408_v15 = vpop.xlane.xlu0 %2407 }
 0xa15   : > { %4168 = vpow2.f32 %v2449_v8  ;;  %v2436_v6 = vsub.f32 %v2350_v26, %v2408_v15  ;;  %v2451_v48 = vmul.f32 1.442695, %v2434_v49 }
 0xa16   : > { %v2414_v41 = vpop.xlane.xlu1 %2413 }
 0xa17   : > { %v2455_v24 = vmul.f32 1.442695, %v2436_v6  ;;  %v2439_v45 = vsub.f32 %v2363_v4, %v2414_v41 }
 0xa18   : > { %v2416_v23 = vpop.xlane.xlu0 %2415 }
 0xa19   : > { %4170 = vpow2.f32 %v2455_v24  ;;  %v2461_v17 = vmul.f32 1.442695, %v2439_v45  ;;  %v2440_v40 = vsub.f32 %v2366_v3, %v2416_v23 }
 0xa1a   : > { %v2410_v39 = vpop.xlane.xlu1 %2409 }
 0xa1b   : > { %4172 = vpow2.f32 %v2461_v17  ;;  %v2437_v25 = vsub.f32 %v2355_v57, %v2410_v39  ;;  %v2463_v33 = vmul.f32 1.442695, %v2440_v40 }
 0xa1c   : > { %v2412_v35 = vpop.xlane.xlu0 %2411  ;;  %4174 = vpow2.f32 %v2451_v48 }
 0xa1d   : > { %v2457_v28 = vmul.f32 1.442695, %v2437_v25  ;;  %v2438_v55 = vsub.f32 %v5059_v37, %v2412_v35 }
 0xa1e   : > { %v5095_v30 = vpop.eup %4166  ;;  %v2422_v26 = vpop.xlane.xlu1 %2421 }
 0xa1f   : > { %4176 = vpow2.f32 %v2457_v28  ;;  %v2443_v32 = vsub.f32 %v2379_v20, %v2422_v26  ;;  %2485 = vadd.xlane.f32.xlu1 %v5095_v30  ;;  %v2459_v23 = vmul.f32 1.442695, %v2438_v55 }
 0xa20   : > { %v2424_v4 = vpop.xlane.xlu0 %2423  ;;  %4178 = vpow2.f32 %v2463_v33 }
 0xa21   : > { %v2469_v54 = vmul.f32 1.442695, %v2443_v32  ;;  %v2444_v17 = vsub.f32 %v5064_v27, %v2424_v4 }
 0xa22   : > { %v5099_v45 = vpop.eup %4168  ;;  %v2418_v39 = vpop.xlane.xlu1 %2417 }
 0xa23   : > { %4180 = vpow2.f32 %v2469_v54  ;;  %v2441_v3 = vsub.f32 %v5067_v11, %v2418_v39  ;;  %2481 = vadd.xlane.f32.xlu1 %v5099_v45  ;;  %v2471_v20 = vmul.f32 1.442695, %v2444_v17 }
 0xa24   : > { %v2420_v57 = vpop.xlane.xlu0 %2419  ;;  %4182 = vpow2.f32 %v2459_v23 }
 0xa25   : > { %v2465_v37 = vmul.f32 1.442695, %v2441_v3  ;;  %v2442_v8 = vsub.f32 %v5071_v56, %v2420_v57 }
 0xa26   : > { %v5104_v9 = vpop.eup %4170  ;;  %v2430_v15 = vpop.xlane.xlu1 %2429 }
 0xa27   : > { %4184 = vpow2.f32 %v2465_v37  ;;  %v2447_v49 = vsub.f32 %v5075_v10, %v2430_v15  ;;  %2487 = vadd.xlane.f32.xlu0 %v5104_v9  ;;  %v2467_v24 = vmul.f32 1.442695, %v2442_v8  ;;  %v3374_v37 = vpack.c.bf16 %v4809_v1, %v4809_v1  ;;  %v5456_v15 = vld [vmem:[#allocation5_spill] sm:$0xff] }
 0xa28   : > { %v5109_v27 = vpop.eup %4172  ;;  %v2432_v6 = vpop.xlane.xlu0 %2431  ;;  %4186 = vpow2.f32 %v2471_v20  ;;  %v3375_v20 = vpack.c.bf16 %v4813_v60, %v4813_v60  ;;  %v3377_v8 = vpack.c.bf16 %v4811_v59, %v4811_v59  ;;  %v3391_v1 = vpack.c.bf16 %v5025_v53, %v5025_v53 }
 0xa29   : > { %v2477_v11 = vmul.f32 1.442695, %v2447_v49  ;;  %2493 = vadd.xlane.f32.xlu1 %v5109_v27  ;;  %v5112_v41 = vpop.eup %4174  ;;  %v2448_v48 = vsub.f32 %v5079_v34, %v2432_v6  ;;  %v3390_v60 = vpack.c.bf16 %v5021_v61, %v5021_v61  ;;  %v3393_v59 = vpack.c.bf16 %v5023_v19, %v5023_v19 }
 0xa2a   : > { %v2426_v40 = vpop.xlane.xlu1 %2425  ;;  %v3378_v61 = vpack.c.bf16 %v4817_v52, %v4817_v52  ;;  %v3381_v19 = vpack.c.bf16 %v4819_v13, %v4819_v13  ;;  %v3394_v52 = vpack.c.bf16 %v5029_v43, %v5029_v43  ;;  %v3397_v13 = vpack.c.bf16 %v5031_v22, %v5031_v22 }
 0xa2b   : > { %4188 = vpow2.f32 %v2477_v11  ;;  %v2445_v56 = vsub.f32 %v5083_v47, %v2426_v40  ;;  %2483 = vadd.xlane.f32.xlu0 %v5112_v41  ;;  %v2479_v28 = vmul.f32 1.442695, %v2448_v48  ;;  %v3396_v53 = vpack.c.bf16 %v5027_v44, %v5027_v44 }
 0xa2c   : > { %v5117_v10 = vpop.eup %4176  ;;  %v2428_v25 = vpop.xlane.xlu0 %2427  ;;  %4190 = vpow2.f32 %v2467_v24  ;;  %v3382_v43 = vpack.c.bf16 %v4825_v63, %v4825_v63  ;;  %v3385_v22 = vpack.c.bf16 %v4827_v0, %v4827_v0  ;;  %v3399_v44 = vpack.c.bf16 %v5041_v42, %v5041_v42  ;;  %v5455_v42 = vld [vmem:[#allocation7_spill] sm:$0xff] }
 0xa2d   : > { %v2473_v35 = vmul.f32 1.442695, %v2445_v56  ;;  %2489 = vadd.xlane.f32.xlu1 %v5117_v10  ;;  %v2446_v33 = vsub.f32 %v5087_v29, %v2428_v25  ;;  %v5121_v26 = vpop.eup %4178  ;;  %v3398_v63 = vpack.c.bf16 %v5037_v7, %v5037_v7  ;;  %v3401_v0 = vpack.c.bf16 %v5039_v12, %v5039_v12 }
 0xa2e   : > { %v2576_v55 = vpop.permute.xlu1 %2575  ;;  %v3386_v7 = vpack.c.bf16 %v4833_v14, %v4833_v14  ;;  %v3389_v12 = vpack.c.bf16 %v4835_v16, %v4835_v16  ;;  %v3402_v14 = vpack.c.bf16 %v5456_v15, %v5456_v15 }
 0xa2f   : > { %4192 = vpow2.f32 %v2473_v35  ;;  %3822 = vmatprep.subr.bf16.mxu0 %v2576_v55  ;;  %3870 = vmatprep.subr.bf16.mxu1 %v2576_v55  ;;  %v2475_v32 = vmul.f32 1.442695, %v2446_v33 }
 0xa30   : > { %v5123_v34 = vpop.eup %4180  ;;  %2495 = vadd.xlane.f32.xlu0 %v5121_v26  ;;  %3823 = vmatpush3.bf16.msra.mxu0 %v2576_v55  ;;  %v2574_v47 = vpop.permute.xlu0 %2573  ;;  %4194 = vpow2.f32 %v2479_v28 }
 0xa31   : > { %3878 = vmatpush3.bf16.msra.mxu1 %v2576_v55  ;;  %2501 = vadd.xlane.f32.xlu1 %v5123_v34  ;;  %v5127_v29 = vpop.eup %4182  ;;  %4196 = vpow2.f32 %v2475_v32 }
 0xa32   : > { %3824 = vmatprep.subr.bf16.mxu0 %v2574_v47  ;;  %3871 = vmatprep.subr.bf16.mxu1 %v2574_v47 }
 0xa34   : > { %v5129_v4 = vpop.eup %4184  ;;  %2491 = vadd.xlane.f32.xlu0 %v5127_v29  ;;  %3825 = vmatpush3.bf16.msra.mxu0 %v2574_v47 }
 0xa35   : > { %3879 = vmatpush3.bf16.msra.mxu1 %v2574_v47  ;;  %2497 = vadd.xlane.f32.xlu1 %v5129_v4  ;;  %v5133_v54 = vpop.eup %4186 }
 0xa38   : > { %v5135_v23 = vpop.eup %4188  ;;  %2503 = vadd.xlane.f32.xlu0 %v5133_v54 }
 0xa39   : > { %2509 = vadd.xlane.f32.xlu1 %v5135_v23  ;;  %v5139_v17 = vpop.eup %4190 }
 0xa3c   : > { %v5141_v39 = vpop.eup %4192  ;;  %2499 = vadd.xlane.f32.xlu0 %v5139_v17 }
 0xa3d   : > { %2505 = vadd.xlane.f32.xlu1 %v5141_v39  ;;  %v5145_v3 = vpop.eup %4194 }
 0xa3e   : > { %v5148_v57 = vpop.eup %4196 }
 0xa40   : > { %2511 = vadd.xlane.f32.xlu0 %v5145_v3 }
 0xa44   : > { %2507 = vadd.xlane.f32.xlu0 %v5148_v57 }
 0xa4e   : > { %2571 = vrot.lane.b32.xlu1 %v4365_v50, %s4265_s17  ;;  %v3376_v50 = vpack.c.bf16 %v4807_v58, %v4807_v58  ;;  %v3392_v58 = vpack.c.bf16 %v5019_v36, %v5019_v36  ;;  %v3395_v36 = vpack.c.bf16 %v5033_v46, %v5033_v46  ;;  %v3400_v46 = vpack.c.bf16 %v5035_v51, %v5035_v51 }
 0xa4f   : > { %v3403_v51 = vpack.c.bf16 %v5455_v42, %v5455_v42 }
 0xa52   : > { %1580 = vrot.lane.b32.xlu1 %v3374_v37, %s4266_s22 }
 0xa56   : > { %1582 = vrot.lane.b32.xlu1 %v3375_v20, %s4266_s22 }
 0xa5a   : > { %2569 = vrot.lane.b32.xlu0 %v4341_v18, %s4265_s17  ;;  %1586 = vrot.lane.b32.xlu1 %v3377_v8, %s4266_s22  ;;  %v3379_v18 = vpack.c.bf16 %v4821_v62, %v4821_v62  ;;  %v3380_v62 = vpack.c.bf16 %v4815_v5, %v4815_v5  ;;  %v3383_v5 = vpack.c.bf16 %v4829_v2, %v4829_v2 }
 0xa5b   : > { %v3384_v2 = vpack.c.bf16 %v4823_v21, %v4823_v21  ;;  %v3387_v21 = vpack.c.bf16 %v4837_v38, %v4837_v38  ;;  %v3388_v38 = vpack.c.bf16 %v4831_v31, %v4831_v31 }
 0xa5e   : > { %1584 = vrot.lane.b32.xlu0 %v3376_v50, %s4266_s22  ;;  %2161 = vrot.lane.b32.xlu1 %v3391_v1, %s4267_s23 }
 0xa62   : > { %2159 = vrot.lane.b32.xlu0 %v3390_v60, %s4267_s23  ;;  %2165 = vrot.lane.b32.xlu1 %v3393_v59, %s4267_s23 }
 0xa66   : > { %2163 = vrot.lane.b32.xlu0 %v3392_v58, %s4267_s23  ;;  %1590 = vrot.lane.b32.xlu1 %v3379_v18, %s4266_s22 }
 0xa6a   : > { %1588 = vrot.lane.b32.xlu0 %v3378_v61, %s4266_s22  ;;  %1594 = vrot.lane.b32.xlu1 %v3381_v19, %s4266_s22 }
 0xa6e   : > { %1592 = vrot.lane.b32.xlu0 %v3380_v62, %s4266_s22  ;;  %2169 = vrot.lane.b32.xlu1 %v3395_v36, %s4267_s23 }
 0xa72   : > { %2167 = vrot.lane.b32.xlu0 %v3394_v52, %s4267_s23  ;;  %2173 = vrot.lane.b32.xlu1 %v3397_v13, %s4267_s23 }
 0xa76   : > { %2171 = vrot.lane.b32.xlu0 %v3396_v53, %s4267_s23  ;;  %1598 = vrot.lane.b32.xlu1 %v3383_v5, %s4266_s22 }
 0xa7a   : > { %1596 = vrot.lane.b32.xlu0 %v3382_v43, %s4266_s22  ;;  %1602 = vrot.lane.b32.xlu1 %v3385_v22, %s4266_s22 }
 0xa7e   : > { %1600 = vrot.lane.b32.xlu0 %v3384_v2, %s4266_s22  ;;  %2177 = vrot.lane.b32.xlu1 %v3399_v44, %s4267_s23 }
 0xa82   : > { %2175 = vrot.lane.b32.xlu0 %v3398_v63, %s4267_s23  ;;  %2181 = vrot.lane.b32.xlu1 %v3401_v0, %s4267_s23 }
 0xa86   : > { %2179 = vrot.lane.b32.xlu0 %v3400_v46, %s4267_s23  ;;  %1606 = vrot.lane.b32.xlu1 %v3387_v21, %s4266_s22 }
 0xa8a   : > { %1604 = vrot.lane.b32.xlu0 %v3386_v7, %s4266_s22  ;;  %1610 = vrot.lane.b32.xlu1 %v3389_v12, %s4266_s22 }
 0xa8e   : > { %1608 = vrot.lane.b32.xlu0 %v3388_v38, %s4266_s22  ;;  %2185 = vrot.lane.b32.xlu1 %v3403_v51, %s4267_s23 }
 0xa92   : > { %2183 = vrot.lane.b32.xlu0 %v3402_v14, %s4267_s23 }
 0xaa8   : > { %v2486_v16 = vpop.xlane.xlu1 %2485 }
 0xaa9   : > { %v2515_v47 = vmul.f32 5.656854, %v2486_v16 }
 0xaac   : > { %v2482_v49 = vpop.xlane.xlu1 %2481 }
 0xaad   : > { %v2513_v11 = vmul.f32 5.656854, %v2482_v49 }
 0xaaf   : > { %4198 = vrcp.f32 %v2513_v11 }
 0xab0   : > { %v2488_v6 = vpop.xlane.xlu0 %2487 }
 0xab1   : > { %v2516_v28 = vmul.f32 5.656854, %v2488_v6 }
 0xab2   : > { %v2494_v24 = vpop.xlane.xlu1 %2493 }
 0xab3   : > { %v2519_v20 = vmul.f32 5.656854, %v2494_v24 }
 0xab4   : > { %v2484_v48 = vpop.xlane.xlu0 %2483 }
 0xab5   : > { %v2514_v31 = vmul.f32 5.656854, %v2484_v48 }
 0xab6   : > { %v2490_v40 = vpop.xlane.xlu1 %2489 }
 0xab7   : > { %4200 = vrcp.f32 %v2514_v31  ;;  %v2517_v25 = vmul.f32 5.656854, %v2490_v40 }
 0xab9   : > { %v2496_v56 = vpop.xlane.xlu0 %2495  ;;  %4202 = vrcp.f32 %v2517_v25 }
 0xaba   : > { %v2502_v35 = vpop.xlane.xlu1 %2501  ;;  %v2520_v33 = vmul.f32 5.656854, %v2496_v56  ;;  %4204 = vrcp.f32 %v2516_v28 }
 0xabb   : > { %v2523_v52 = vmul.f32 5.656854, %v2502_v35 }
 0xabc   : > { %v4199_v50 = vpop.eup %4198 }
 0xabd   : > { %v2492_v55 = vpop.xlane.xlu0 %2491  ;;  %v2530_v61 = vmul.f32 %v4199_v50, %v5099_v45 }
 0xabe   : > { %v2518_v32 = vmul.f32 5.656854, %v2492_v55  ;;  %v2498_v37 = vpop.xlane.xlu1 %2497 }
 0xabf   : > { %v2521_v1 = vmul.f32 5.656854, %v2498_v37 }
 0xac0   : > { %4206 = vrcp.f32 %v2518_v32 }
 0xac1   : > { %4208 = vrcp.f32 %v2520_v33  ;;  %v2504_v8 = vpop.xlane.xlu0 %2503 }
 0xac2   : > { %4210 = vrcp.f32 %v2515_v47  ;;  %v2510_v60 = vpop.xlane.xlu1 %2509  ;;  %v2524_v18 = vmul.f32 5.656854, %v2504_v8 }
 0xac3   : > { %4212 = vrcp.f32 %v2519_v20  ;;  %v2527_v38 = vmul.f32 5.656854, %v2510_v60 }
 0xac4   : > { %v4201_v59 = vpop.eup %4200  ;;  %4214 = vrcp.f32 %v2521_v1 }
 0xac5   : > { %v2500_v58 = vpop.xlane.xlu0 %2499  ;;  %v2532_v19 = vmul.f32 %v4201_v59, %v5112_v41 }
 0xac6   : > { %v2522_v62 = vmul.f32 5.656854, %v2500_v58  ;;  %v2506_v36 = vpop.xlane.xlu1 %2505  ;;  %v4203_v22 = vpop.eup %4202 }
 0xac7   : > { %v2561_v13 = vpack.c.bf16 %v2532_v19, %v2530_v61  ;;  %v2525_v53 = vmul.f32 5.656854, %v2506_v36  ;;  %v4205_v2 = vpop.eup %4204  ;;  %v2538_v46 = vmul.f32 %v4203_v22, %v5117_v10 }
 0xac8   : > { %4216 = vrcp.f32 %v2522_v62  ;;  %v2536_v15 = vmul.f32 %v4205_v2, %v5104_v9 }
 0xac9   : > { %4218 = vrcp.f32 %v2524_v18  ;;  %v2512_v5 = vpop.xlane.xlu0 %2511  ;;  %3830 = vmatprep.mubr.bf16.mxu0 %v2561_v13 }
 0xaca   : > { %v2572_v43 = vpop.permute.xlu1 %2571  ;;  %4220 = vrcp.f32 %v2523_v52  ;;  %v2528_v41 = vmul.f32 5.656854, %v2512_v5 }
 0xacb   : > { %3826 = vmatprep.subr.bf16.mxu0 %v2572_v43  ;;  %3872 = vmatprep.subr.bf16.mxu1 %v2572_v43  ;;  %4222 = vrcp.f32 %v2525_v53 }
 0xacc   : > { %3827 = vmatpush3.bf16.msra.mxu0 %v2572_v43  ;;  %3880 = vmatpush3.bf16.msra.mxu1 %v2572_v43 }
 0xacd   : > { %v4207_v45 = vpop.eup %4206  ;;  %v2508_v44 = vpop.xlane.xlu0 %2507 }
 0xace   : > { %v4209_v63 = vpop.eup %4208  ;;  %v2526_v0 = vmul.f32 5.656854, %v2508_v44  ;;  %v1581_v21 = vpop.permute.xlu1 %1580  ;;  %v2540_v7 = vmul.f32 %v4207_v45, %v5127_v29 }
 0xacf   : > { %v4211_v12 = vpop.eup %4210  ;;  %1629 = vst.msk [vmem:[#allocation3] sm:$0xf] %vm1628_vm4, %v1581_v21  ;;  %v2544_v16 = vmul.f32 %v4209_v63, %v5121_v26  ;;  %v3965_v21 = vld [vmem:[%s5448_s3] sm:$0xff]  }
 0xad0   : > { %v4213_v42 = vpop.eup %4212  ;;  %4224 = vrcp.f32 %v2526_v0  ;;  %v2563_v51 = vpack.c.bf16 %v2540_v7, %v2538_v46  ;;  %v2534_v10 = vmul.f32 %v4211_v12, %v5095_v30  ;;  %v3964_v0 = vld [vmem:[%s5448_s3 + $0x8] sm:$0xff]  }
 0xad1   : > { %4226 = vrcp.f32 %v2528_v41  ;;  %v2570_v14 = vpop.permute.xlu0 %2569  ;;  %v4215_v6 = vpop.eup %4214  ;;  %v2542_v29 = vmul.f32 %v4213_v42, %v5109_v27 }
 0xad2   : > { %3828 = vmatprep.subr.bf16.mxu0 %v2570_v14  ;;  %3873 = vmatprep.subr.bf16.mxu1 %v2570_v14  ;;  %v1583_v49 = vpop.permute.xlu1 %1582  ;;  %4228 = vrcp.f32 %v2527_v38  ;;  %v2562_v11 = vpack.c.bf16 %v2536_v15, %v2534_v10  ;;  %v2546_v30 = vmul.f32 %v4215_v6, %v5129_v4 }
 0xad3   : > { %3834 = vmatprep.mubr.bf16.mxu1 %v2563_v51  ;;  %1630 = vst.msk [vmem:[#allocation3 + $0x4] sm:$0xf] %vm1628_vm4, %v1583_v49  ;;  %3829 = vmatpush3.bf16.msra.mxu0 %v2570_v14  ;;  %v2564_v48 = vpack.c.bf16 %v2544_v16, %v2542_v29 }
 0xad4   : > { %3881 = vmatpush3.bf16.msra.mxu1 %v2570_v14 }
 0xad5   : > { %v4217_v9 = vpop.eup %4216  ;;  %v1585_v24 = vpop.permute.xlu0 %1584  ;;  %3846 = vmatprep.subr.bf16.mxu1 %v3964_v0 }
 0xad6   : > { %v4219_v31 = vpop.eup %4218  ;;  %1631 = vst.msk [vmem:[#allocation3 + $0x8] sm:$0xf] %vm1628_vm4, %v1585_v24  ;;  %3831 = vmatmul.mubr.bf16.vlgmr.msra.gmra.mxu0 %v2562_v11  ;;  %v1587_v26 = vpop.permute.xlu1 %1586  ;;  %v2548_v40 = vmul.f32 %v4217_v9, %v5139_v17 }
 0xad7   : > { %3835 = vmatmul.mubr.bf16.vlgmr.msra.gmra.mxu1 %v2564_v48  ;;  %1632 = vst.msk [vmem:[#allocation3 + $0xc] sm:$0xf] %vm1628_vm4, %v1587_v26  ;;  %v4221_v56 = vpop.eup %4220  ;;  %v2552_v35 = vmul.f32 %v4219_v31, %v5133_v54 }
 0xad8   : > { %v2565_v27 = vpack.c.bf16 %v2548_v40, %v2546_v30  ;;  %v4223_v33 = vpop.eup %4222  ;;  %v2550_v4 = vmul.f32 %v4221_v56, %v5123_v34  ;;  %3847 = vmatpush3.bf16.msra.mxu1 %v3964_v0 }
 0xad9   : > { %v2160_v25 = vpop.permute.xlu0 %2159  ;;  %v2554_v20 = vmul.f32 %v4223_v33, %v5141_v39  ;;  %3848 = vmatprep.subr.bf16.mxu1 %v3965_v21 }
 0xada   : > { %2208 = vst.msk [vmem:[#allocation3] sm:$0xf] %vm2207_vm5, %v2160_v25  ;;  %3838 = vmatprep.mubr.bf16.mxu1 %v2565_v27  ;;  %v2162_v28 = vpop.permute.xlu1 %2161  ;;  %v2566_v47 = vpack.c.bf16 %v2552_v35, %v2550_v4 }
 0xadb   : > { %2209 = vst.msk [vmem:[#allocation3 + $0x4] sm:$0xf] %vm2207_vm5, %v2162_v28  ;;  %v5457_v28 = vld [vmem:[#allocation4_spill] sm:$0xff] }
 0xadc   : > { %3849 = vmatpush3.bf16.msra.mxu1 %v3965_v21  ;;  %v3404_v33 = vpack.c.bf16 %v5457_v28, %v5457_v28 }
 0xadd   : > { %v4225_v55 = vpop.eup %4224  ;;  %v2164_v17 = vpop.permute.xlu0 %2163 }
 0xade   : > { %v4227_v32 = vpop.eup %4226  ;;  %2210 = vst.msk [vmem:[#allocation3 + $0x8] sm:$0xf] %vm2207_vm5, %v2164_v17  ;;  %v2166_v37 = vpop.permute.xlu1 %2165  ;;  %v2556_v54 = vmul.f32 %v4225_v55, %v5148_v57  ;;  %v5458_v17 = vld [vmem:[#allocation6_spill] sm:$0xff] }
 0xadf   : > { %3839 = vmatmul.mubr.bf16.gmra.mxu1 %v2566_v47  ;;  %2211 = vst.msk [vmem:[#allocation3 + $0xc] sm:$0xf] %vm2207_vm5, %v2166_v37  ;;  %v4229_v8 = vpop.eup %4228  ;;  %v2560_v60 = vmul.f32 %v4227_v32, %v5145_v3  ;;  %v3405_v47 = vpack.c.bf16 %v5458_v17, %v5458_v17 }
 0xae0   : > { %v2567_v50 = vpack.c.bf16 %v2556_v54, %v2554_v20  ;;  %v2558_v59 = vmul.f32 %v4229_v8, %v5135_v23  ;;  %v4269_v8 = vmov 0.0  }
 0xae1   : > { %v1589_v1 = vpop.permute.xlu0 %1588  ;;  %299 = vst.msk [vmem:[#allocation2 + $0x10] sm:$0xff] %vm296_vm0, %v4269_v8  ;;  %297 = vst.msk [vmem:[#allocation2] sm:$0xff] %vm296_vm0, %v4269_v8 }
 0xae2   : > { %1633 = vst.msk [vmem:[#allocation3 + $0x10] sm:$0xf] %vm1628_vm4, %v1589_v1  ;;  %3842 = vmatprep.mubr.bf16.mxu1 %v2567_v50  ;;  %v1591_v34 = vpop.permute.xlu1 %1590  ;;  %v2568_v39 = vpack.c.bf16 %v2560_v60, %v2558_v59 }
 0xae3   : > { %1634 = vst.msk [vmem:[#allocation3 + $0x14] sm:$0xf] %vm1628_vm4, %v1591_v34 }
 0xae4   : > { %298 = vst.msk [vmem:[#allocation2 + $0x8] sm:$0xff] %vm296_vm0, %v4269_v8  ;;  %300 = vst.msk [vmem:[#allocation2 + $0x18] sm:$0xff] %vm296_vm0, %v4269_v8 }
 0xae5   : > { %v1593_v18 = vpop.permute.xlu0 %1592  ;;  %301 = vst.msk [vmem:[#allocation2 + $0x20] sm:$0xff] %vm296_vm0, %v4269_v8  ;;  %302 = vst.msk [vmem:[#allocation2 + $0x28] sm:$0xff] %vm296_vm0, %v4269_v8 }
 0xae6   : > { %1635 = vst.msk [vmem:[#allocation3 + $0x18] sm:$0xf] %vm1628_vm4, %v1593_v18  ;;  %v1595_v57 = vpop.permute.xlu1 %1594 }
 0xae7   : > { %3843 = vmatmul.mubr.bf16.gmra.mxu1 %v2568_v39  ;;  %1636 = vst.msk [vmem:[#allocation3 + $0x1c] sm:$0xf] %vm1628_vm4, %v1595_v57 }
 0xae8   : > { %303 = vst.msk [vmem:[#allocation2 + $0x30] sm:$0xff] %vm296_vm0, %v4269_v8  ;;  %304 = vst.msk [vmem:[#allocation2 + $0x38] sm:$0xff] %vm296_vm0, %v4269_v8  ;;  %v2805_v21 = vld [vmem:[#allocation2 + $0x10] sm:$0xff] }
 0xae9   : > { %v2168_v58 = vpop.permute.xlu0 %2167  ;;  %305 = vst.msk [vmem:[#allocation2 + $0x40] sm:$0xff] %vm296_vm0, %v4269_v8  ;;  %306 = vst.msk [vmem:[#allocation2 + $0x48] sm:$0xff] %vm296_vm0, %v4269_v8 }
 0xaea   : > { %2212 = vst.msk [vmem:[#allocation3 + $0x10] sm:$0xf] %vm2207_vm5, %v2168_v58  ;;  %v2170_v3 = vpop.permute.xlu1 %2169 }
 0xaeb   : > { %2213 = vst.msk [vmem:[#allocation3 + $0x14] sm:$0xf] %vm2207_vm5, %v2170_v3 }
 0xaec   : > { %307 = vst.msk [vmem:[#allocation2 + $0x50] sm:$0xff] %vm296_vm0, %v4269_v8  ;;  %308 = vst.msk [vmem:[#allocation2 + $0x58] sm:$0xff] %vm296_vm0, %v4269_v8 }
 0xaed   : > { %v2172_v61 = vpop.permute.xlu0 %2171  ;;  %309 = vst.msk [vmem:[#allocation2 + $0x60] sm:$0xff] %vm296_vm0, %v4269_v8  ;;  %310 = vst.msk [vmem:[#allocation2 + $0x68] sm:$0xff] %vm296_vm0, %v4269_v8 }
 0xaee   : > { %2214 = vst.msk [vmem:[#allocation3 + $0x18] sm:$0xf] %vm2207_vm5, %v2172_v61  ;;  %v2174_v19 = vpop.permute.xlu1 %2173 }
 0xaef   : > { %2215 = vst.msk [vmem:[#allocation3 + $0x1c] sm:$0xf] %vm2207_vm5, %v2174_v19 }
 0xaf0   : > { %311 = vst.msk [vmem:[#allocation2 + $0x70] sm:$0xff] %vm296_vm0, %v4269_v8  ;;  %312 = vst.msk [vmem:[#allocation2 + $0x78] sm:$0xff] %vm296_vm0, %v4269_v8 }
 0xaf1   : > { %v1597_v23 = vpop.permute.xlu0 %1596 }
 0xaf2   : > { %1637 = vst.msk [vmem:[#allocation3 + $0x20] sm:$0xf] %vm1628_vm4, %v1597_v23  ;;  %v1599_v62 = vpop.permute.xlu1 %1598 }
 0xaf3   : > { %1638 = vst.msk [vmem:[#allocation3 + $0x24] sm:$0xf] %vm1628_vm4, %v1599_v62 }
 0xaf5   : > { %v1601_v36 = vpop.permute.xlu0 %1600 }
 0xaf6   : > { %1639 = vst.msk [vmem:[#allocation3 + $0x28] sm:$0xf] %vm1628_vm4, %v1601_v36  ;;  %v1603_v52 = vpop.permute.xlu1 %1602 }
 0xaf7   : > { %1640 = vst.msk [vmem:[#allocation3 + $0x2c] sm:$0xf] %vm1628_vm4, %v1603_v52 }
 0xaf9   : > { %v2176_v13 = vpop.permute.xlu0 %2175 }
 0xafa   : > { %2216 = vst.msk [vmem:[#allocation3 + $0x20] sm:$0xf] %vm2207_vm5, %v2176_v13  ;;  %v2178_v5 = vpop.permute.xlu1 %2177 }
 0xafb   : > { %2217 = vst.msk [vmem:[#allocation3 + $0x24] sm:$0xf] %vm2207_vm5, %v2178_v5 }
 0xafd   : > { %v2180_v53 = vpop.permute.xlu0 %2179 }
 0xafe   : > { %2218 = vst.msk [vmem:[#allocation3 + $0x28] sm:$0xf] %vm2207_vm5, %v2180_v53  ;;  %v2182_v43 = vpop.permute.xlu1 %2181 }
 0xaff   : > { %2219 = vst.msk [vmem:[#allocation3 + $0x2c] sm:$0xf] %vm2207_vm5, %v2182_v43 }
 0xb01   : > { %v1605_v22 = vpop.permute.xlu0 %1604 }
 0xb02   : > { %1641 = vst.msk [vmem:[#allocation3 + $0x30] sm:$0xf] %vm1628_vm4, %v1605_v22  ;;  %v1607_v2 = vpop.permute.xlu1 %1606 }
 0xb03   : > { %1642 = vst.msk [vmem:[#allocation3 + $0x34] sm:$0xf] %vm1628_vm4, %v1607_v2 }
 0xb05   : > { %v1609_v45 = vpop.permute.xlu0 %1608 }
 0xb06   : > { %1643 = vst.msk [vmem:[#allocation3 + $0x38] sm:$0xf] %vm1628_vm4, %v1609_v45  ;;  %v1611_v41 = vpop.permute.xlu1 %1610 }
 0xb07   : > { %1644 = vst.msk [vmem:[#allocation3 + $0x3c] sm:$0xf] %vm1628_vm4, %v1611_v41 }
 0xb09   : > { %v2184_v44 = vpop.permute.xlu0 %2183 }
 0xb0a   : > { %2220 = vst.msk [vmem:[#allocation3 + $0x30] sm:$0xf] %vm2207_vm5, %v2184_v44  ;;  %v2186_v63 = vpop.permute.xlu1 %2185 }
 0xb0b   : > { %2221 = vst.msk [vmem:[#allocation3 + $0x34] sm:$0xf] %vm2207_vm5, %v2186_v63 }
 0xb96   : > { %v3832_v46 = vpop.f32.mrf.mxu0 }
 0xb97   : > { %v3408_v7 = vpack.c.bf16 %v3832_v46, %v3832_v46  ;;  %v3836_v12 = vpop.f32.mrf.mxu1 }
 0xb98   : > { %v2627_v38 = vpop.f32.mrf.mxu0  ;;  %v3412_v6 = vpack.c.bf16 %v3836_v12, %v3836_v12 }
 0xb99   : > { %v2643_v42 = vpop.f32.mrf.mxu1  ;;  %2742 = vrot.lane.b32.xlu0 %v3408_v7, %s4268_s28  ;;  %v3406_v15 = vpack.c.bf16 %v2627_v38, %v2627_v38  ;;  %v2803_v7 = vld [vmem:[#allocation2] sm:$0xff] }
 0xb9a   : > { %v3833_v51 = vpop.f32.mrf.mxu0  ;;  %v3410_v24 = vpack.c.bf16 %v2643_v42, %v2643_v42  ;;  %v2806_v42 = vld [vmem:[#allocation2 + $0x18] sm:$0xff] }
 0xb9b   : > { %v3409_v14 = vpack.c.bf16 %v3833_v51, %v3833_v51  ;;  %v3837_v16 = vpop.f32.mrf.mxu1 }
 0xb9c   : > { %v2630_v49 = vpop.f32.mrf.mxu0  ;;  %v3413_v48 = vpack.c.bf16 %v3837_v16, %v3837_v16 }
 0xb9d   : > { %v2646_v10 = vpop.f32.mrf.mxu1  ;;  %2738 = vrot.lane.b32.xlu0 %v3406_v15, %s4268_s28  ;;  %2744 = vrot.lane.b32.xlu1 %v3409_v14, %s4268_s28  ;;  %v3407_v29 = vpack.c.bf16 %v2630_v49, %v2630_v49  ;;  %v2804_v14 = vld [vmem:[#allocation2 + $0x8] sm:$0xff] }
 0xb9e   : > { %v3411_v30 = vpack.c.bf16 %v2646_v10, %v2646_v10  ;;  %v2809_v10 = vld [vmem:[#allocation2 + $0x30] sm:$0xff] }
 0xb9f   : > { %v3840_v11 = vpop.f32.mrf.mxu1 }
 0xba0   : > { %v3416_v40 = vpack.c.bf16 %v3840_v11, %v3840_v11 }
 0xba1   : > { %v2659_v9 = vpop.f32.mrf.mxu1  ;;  %2750 = vrot.lane.b32.xlu0 %v3412_v6, %s4268_s28  ;;  %2740 = vrot.lane.b32.xlu1 %v3407_v29, %s4268_s28  ;;  %v5368_v29 = vld [vmem:[%s5449_s4] ss:$0 sm:$0xff] }
 0xba2   : > { %v3414_v27 = vpack.c.bf16 %v2659_v9, %v2659_v9  ;;  %v2807_v9 = vld [vmem:[#allocation2 + $0x20] sm:$0xff] }
 0xba3   : > { %v3841_v31 = vpop.f32.mrf.mxu1 }
 0xba4   : > { %v3417_v25 = vpack.c.bf16 %v3841_v31, %v3841_v31 }
 0xba5   : > { %v2662_v26 = vpop.f32.mrf.mxu1  ;;  %2746 = vrot.lane.b32.xlu0 %v3410_v24, %s4268_s28  ;;  %2752 = vrot.lane.b32.xlu1 %v3413_v48, %s4268_s28 }
 0xba6   : > { %v3415_v4 = vpack.c.bf16 %v2662_v26, %v2662_v26  ;;  %v2810_v26 = vld [vmem:[#allocation2 + $0x38] sm:$0xff] }
 0xba7   : > { %v3844_v56 = vpop.f32.mrf.mxu1 }
 0xba8   : > { %v3420_v20 = vpack.c.bf16 %v3844_v56, %v3844_v56 }
 0xba9   : > { %2758 = vrot.lane.b32.xlu0 %v3416_v40, %s4268_s28  ;;  %2748 = vrot.lane.b32.xlu1 %v3411_v30, %s4268_s28  ;;  %v2675_v35 = vpop.f32.mrf.mxu1 }
 0xbaa   : > { %v3418_v32 = vpack.c.bf16 %v2675_v35, %v2675_v35 }
 0xbab   : > { %v3845_v55 = vpop.f32.mrf.mxu1 }
 0xbac   : > { %v3421_v50 = vpack.c.bf16 %v3845_v55, %v3845_v55  ;;  %v2813_v55 = vld [vmem:[#allocation2 + $0x50] sm:$0xff] }
 0xbad   : > { %2754 = vrot.lane.b32.xlu0 %v3414_v27, %s4268_s28  ;;  %2760 = vrot.lane.b32.xlu1 %v3417_v25, %s4268_s28  ;;  %v2678_v37 = vpop.f32.mrf.mxu1  ;;  %v2808_v25 = vld [vmem:[#allocation2 + $0x28] sm:$0xff] }
 0xbae   : > { %v3419_v54 = vpack.c.bf16 %v2678_v37, %v2678_v37 }
 0xbb1   : > { %2187 = vrot.lane.b32.xlu0 %v3404_v33, %s4267_s23  ;;  %2756 = vrot.lane.b32.xlu1 %v3415_v4, %s4268_s28 }
 0xbb5   : > { %2762 = vrot.lane.b32.xlu0 %v3418_v32, %s4268_s28  ;;  %2189 = vrot.lane.b32.xlu1 %v3405_v47, %s4267_s23 }
 0xbb9   : > { %2766 = vrot.lane.b32.xlu0 %v3420_v20, %s4268_s28  ;;  %2764 = vrot.lane.b32.xlu1 %v3419_v54, %s4268_s28  ;;  %v2811_v20 = vld [vmem:[#allocation2 + $0x40] sm:$0xff] }
 0xbbd   : > { %2768 = vrot.lane.b32.xlu1 %v3421_v50, %s4268_s28 }
 0xc0b   : > { %v2743_v1 = vpop.permute.xlu0 %2742 }
 0xc0c   : > { %2789 = vst.msk [vmem:[#allocation3 + $0x8] sm:$0xf] %vm2786_vm6, %v2743_v1 }
 0xc0f   : > { %v2745_v60 = vpop.permute.xlu1 %2744  ;;  %v2739_v34 = vpop.permute.xlu0 %2738 }
 0xc10   : > { %2790 = vst.msk [vmem:[#allocation3 + $0xc] sm:$0xf] %vm2786_vm6, %v2745_v60  ;;  %2787 = vst.msk [vmem:[#allocation3] sm:$0xf] %vm2786_vm6, %v2739_v34  ;;  %v2814_v60 = vld [vmem:[#allocation2 + $0x58] sm:$0xff] }
 0xc13   : > { %v2741_v59 = vpop.permute.xlu1 %2740  ;;  %v2751_v18 = vpop.permute.xlu0 %2750 }
 0xc14   : > { %2788 = vst.msk [vmem:[#allocation3 + $0x4] sm:$0xf] %vm2786_vm6, %v2741_v59  ;;  %2793 = vst.msk [vmem:[#allocation3 + $0x18] sm:$0xf] %vm2786_vm6, %v2751_v18 }
 0xc17   : > { %v2753_v39 = vpop.permute.xlu1 %2752  ;;  %v2747_v57 = vpop.permute.xlu0 %2746  ;;  %v3967_v19 = vld [vmem:[#allocation3 + $0x8] sm:$0xff]  }
 0xc18   : > { %2794 = vst.msk [vmem:[#allocation3 + $0x1c] sm:$0xf] %vm2786_vm6, %v2753_v39  ;;  %2791 = vst.msk [vmem:[#allocation3 + $0x10] sm:$0xf] %vm2786_vm6, %v2747_v57  ;;  %v2812_v57 = vld [vmem:[#allocation2 + $0x48] sm:$0xff] }
 0xc1b   : > { %v2749_v58 = vpop.permute.xlu1 %2748  ;;  %v2759_v3 = vpop.permute.xlu0 %2758  ;;  %v3966_v61 = vld [vmem:[#allocation3] sm:$0xff]  }
 0xc1c   : > { %2792 = vst.msk [vmem:[#allocation3 + $0x14] sm:$0xf] %vm2786_vm6, %v2749_v58  ;;  %2797 = vst.msk [vmem:[#allocation3 + $0x28] sm:$0xf] %vm2786_vm6, %v2759_v3  ;;  %3850 = vmatprep.mubr.msk.bf16.mxu1 %vm296_vm0, %v3966_v61 }
 0xc1d   : > { %3851 = vmatmul.mubr.msk.bf16.vlgmr.msra.gmra.mxu1 %vm296_vm0, %v3967_v19 }
 0xc1f   : > { %v2761_v23 = vpop.permute.xlu1 %2760  ;;  %v2755_v62 = vpop.permute.xlu0 %2754  ;;  %v3969_v5 = vld [vmem:[#allocation3 + $0x18] sm:$0xff]  }
 0xc20   : > { %2798 = vst.msk [vmem:[#allocation3 + $0x2c] sm:$0xf] %vm2786_vm6, %v2761_v23  ;;  %2795 = vst.msk [vmem:[#allocation3 + $0x20] sm:$0xf] %vm2786_vm6, %v2755_v62 }
 0xc23   : > { %v2757_v36 = vpop.permute.xlu1 %2756  ;;  %v2188_v52 = vpop.permute.xlu0 %2187  ;;  %v3968_v13 = vld [vmem:[#allocation3 + $0x10] sm:$0xff]  }
 0xc24   : > { %2796 = vst.msk [vmem:[#allocation3 + $0x24] sm:$0xf] %vm2786_vm6, %v2757_v36  ;;  %3854 = vmatprep.mubr.msk.bf16.mxu1 %vm296_vm0, %v3968_v13  ;;  %v2817_v13 = vld [vmem:[#allocation2 + $0x70] sm:$0xff] }
 0xc25   : > { %2222 = vst.msk [vmem:[#allocation3 + $0x38] sm:$0xf] %vm2207_vm5, %v2188_v52  ;;  %3855 = vmatmul.mubr.msk.bf16.gmra.mxu1 %vm296_vm0, %v3969_v5 }
 0xc27   : > { %v2190_v53 = vpop.permute.xlu1 %2189  ;;  %v2763_v43 = vpop.permute.xlu0 %2762  ;;  %v3971_v41 = vld [vmem:[#allocation3 + $0x28] sm:$0xff]  }
 0xc28   : > { %2223 = vst.msk [vmem:[#allocation3 + $0x3c] sm:$0xf] %vm2207_vm5, %v2190_v53 }
 0xc29   : > { %2799 = vst.msk [vmem:[#allocation3 + $0x30] sm:$0xf] %vm2786_vm6, %v2763_v43 }
 0xc2b   : > { %v2765_v22 = vpop.permute.xlu1 %2764  ;;  %v2767_v2 = vpop.permute.xlu0 %2766  ;;  %v3970_v45 = vld [vmem:[#allocation3 + $0x20] sm:$0xff]  }
 0xc2c   : > { %2800 = vst.msk [vmem:[#allocation3 + $0x34] sm:$0xf] %vm2786_vm6, %v2765_v22  ;;  %2801 = vst.msk [vmem:[#allocation3 + $0x38] sm:$0xf] %vm2786_vm6, %v2767_v2  ;;  %3858 = vmatprep.mubr.msk.bf16.mxu1 %vm296_vm0, %v3970_v45  ;;  %v2815_v22 = vld [vmem:[#allocation2 + $0x60] sm:$0xff] }
 0xc2d   : > { %3859 = vmatmul.mubr.msk.bf16.gmra.mxu1 %vm296_vm0, %v3971_v41 }
 0xc2f   : > { %v2769_v44 = vpop.permute.xlu1 %2768 }
 0xc30   : > { %2802 = vst.msk [vmem:[#allocation3 + $0x3c] sm:$0xf] %vm2786_vm6, %v2769_v44 }
 0xc33   : > { %v3972_v63 = vld [vmem:[#allocation3 + $0x30] sm:$0xff]  }
 0xc34   : > { %3862 = vmatprep.mubr.msk.bf16.mxu1 %vm296_vm0, %v3972_v63  ;;  %v2818_v63 = vld [vmem:[#allocation2 + $0x78] sm:$0xff] }
 0xc37   : > { %v3973_v0 = vld [vmem:[#allocation3 + $0x38] sm:$0xff]  }
 0xc38   : > { %3863 = vmatmul.mubr.msk.bf16.gmra.mxu1 %vm296_vm0, %v3973_v0 }
 0xcdd   : > { %v3852_v46 = vpop.f32.mrf.mxu1 }
 0xcde   : > { %v3014_v12 = vadd.f32 %v3852_v46, %v2805_v21 }
 0xcdf   : > { %v2949_v38 = vpop.f32.mrf.mxu1 }
 0xce0   : > { %3030 = vst.msk [vmem:[#allocation2 + $0x10] sm:$0xff] %vm296_vm0, %v3014_v12  ;;  %v3012_v51 = vadd.f32 %v2949_v38, %v2803_v7  ;;  %v2816_v12 = vld [vmem:[#allocation2 + $0x68] sm:$0xff] }
 0xce1   : > { %v3853_v15 = vpop.f32.mrf.mxu1 }
 0xce2   : > { %3028 = vst.msk [vmem:[#allocation2] sm:$0xff] %vm296_vm0, %v3012_v51  ;;  %v3015_v16 = vadd.f32 %v3853_v15, %v2806_v42 }
 0xce3   : > { %v2952_v49 = vpop.f32.mrf.mxu1 }
 0xce4   : > { %3031 = vst.msk [vmem:[#allocation2 + $0x18] sm:$0xff] %vm296_vm0, %v3015_v16  ;;  %v3013_v6 = vadd.f32 %v2952_v49, %v2804_v14 }
 0xce5   : > { %v3856_v11 = vpop.f32.mrf.mxu1 }
 0xce6   : > { %3029 = vst.msk [vmem:[#allocation2 + $0x8] sm:$0xff] %vm296_vm0, %v3013_v6  ;;  %v3018_v24 = vadd.f32 %v3856_v11, %v2809_v10 }
 0xce7   : > { %v3049_v48 = vld [vmem:[#allocation2 + $0x10] sm:$0xff]  ;;  %v2965_v31 = vpop.f32.mrf.mxu1 }
 0xce8   : > { %v3072_v30 = vadd.f32 %v5368_v29, %v3049_v48  ;;  %3034 = vst.msk [vmem:[#allocation2 + $0x30] sm:$0xff] %vm296_vm0, %v3018_v24  ;;  %v3016_v40 = vadd.f32 %v2965_v31, %v2807_v9 }
 0xce9   : > { %v3047_v56 = vld [vmem:[#allocation2] sm:$0xff]  ;;  %v3857_v27 = vpop.f32.mrf.mxu1 }
 0xcea   : > { %3088 = vst.msk [vmem:[%s5374_s9 + $0x10] sm:$0xff] %vm296_vm0, %v3072_v30  ;;  %v3070_v35 = vadd.f32 %v5368_v29, %v3047_v56  ;;  %3032 = vst.msk [vmem:[#allocation2 + $0x20] sm:$0xff] %vm296_vm0, %v3016_v40  ;;  %v3019_v28 = vadd.f32 %v3857_v27, %v2810_v26 }
 0xceb   : > { %v3050_v33 = vld [vmem:[#allocation2 + $0x18] sm:$0xff]  ;;  %v2968_v4 = vpop.f32.mrf.mxu1 }
 0xcec   : > { %3086 = vst.msk [vmem:[%s5374_s9] sm:$0xff] %vm296_vm0, %v3070_v35  ;;  %v3073_v17 = vadd.f32 %v5368_v29, %v3050_v33  ;;  %3035 = vst.msk [vmem:[#allocation2 + $0x38] sm:$0xff] %vm296_vm0, %v3019_v28  ;;  %v3017_v47 = vadd.f32 %v2968_v4, %v2808_v25 }
 0xced   : > { %v3048_v32 = vld [vmem:[#allocation2 + $0x8] sm:$0xff]  ;;  %v3860_v37 = vpop.f32.mrf.mxu1 }
 0xcee   : > { %3089 = vst.msk [vmem:[%s5374_s9 + $0x18] sm:$0xff] %vm296_vm0, %v3073_v17  ;;  %v3071_v54 = vadd.f32 %v5368_v29, %v3048_v32  ;;  %3033 = vst.msk [vmem:[#allocation2 + $0x28] sm:$0xff] %vm296_vm0, %v3017_v47  ;;  %v3022_v8 = vadd.f32 %v3860_v37, %v2813_v55 }
 0xcef   : > { %v3053_v50 = vld [vmem:[#allocation2 + $0x30] sm:$0xff]  ;;  %v2981_v1 = vpop.f32.mrf.mxu1 }
 0xcf0   : > { %3087 = vst.msk [vmem:[%s5374_s9 + $0x8] sm:$0xff] %vm296_vm0, %v3071_v54  ;;  %v3076_v34 = vadd.f32 %v5368_v29, %v3053_v50  ;;  %3038 = vst.msk [vmem:[#allocation2 + $0x50] sm:$0xff] %vm296_vm0, %v3022_v8  ;;  %v3020_v59 = vadd.f32 %v2981_v1, %v2811_v20 }
 0xcf1   : > { %v3051_v18 = vld [vmem:[#allocation2 + $0x20] sm:$0xff]  ;;  %v3861_v39 = vpop.f32.mrf.mxu1 }
 0xcf2   : > { %3092 = vst.msk [vmem:[%s5374_s9 + $0x30] sm:$0xff] %vm296_vm0, %v3076_v34  ;;  %v3074_v58 = vadd.f32 %v5368_v29, %v3051_v18  ;;  %3036 = vst.msk [vmem:[#allocation2 + $0x40] sm:$0xff] %vm296_vm0, %v3020_v59  ;;  %v3023_v3 = vadd.f32 %v3861_v39, %v2814_v60 }
 0xcf3   : > { %v3054_v61 = vld [vmem:[#allocation2 + $0x38] sm:$0xff]  ;;  %v2984_v19 = vpop.f32.mrf.mxu1 }
 0xcf4   : > { %3090 = vst.msk [vmem:[%s5374_s9 + $0x20] sm:$0xff] %vm296_vm0, %v3074_v58  ;;  %v3077_v23 = vadd.f32 %v5368_v29, %v3054_v61  ;;  %3039 = vst.msk [vmem:[#allocation2 + $0x58] sm:$0xff] %vm296_vm0, %v3023_v3  ;;  %v3021_v62 = vadd.f32 %v2984_v19, %v2812_v57 }
 0xcf5   : > { %v3052_v36 = vld [vmem:[#allocation2 + $0x28] sm:$0xff] }
 0xcf6   : > { %3093 = vst.msk [vmem:[%s5374_s9 + $0x38] sm:$0xff] %vm296_vm0, %v3077_v23  ;;  %v3075_v52 = vadd.f32 %v5368_v29, %v3052_v36  ;;  %3037 = vst.msk [vmem:[#allocation2 + $0x48] sm:$0xff] %vm296_vm0, %v3021_v62 }
 0xcf7   : > { %v3057_v5 = vld [vmem:[#allocation2 + $0x50] sm:$0xff] }
 0xcf8   : > { %3091 = vst.msk [vmem:[%s5374_s9 + $0x28] sm:$0xff] %vm296_vm0, %v3075_v52  ;;  %v3080_v53 = vadd.f32 %v5368_v29, %v3057_v5  ;;  %v3864_v43 = vpop.f32.mrf.mxu1 }
 0xcf9   : > { %v3055_v2 = vld [vmem:[#allocation2 + $0x40] sm:$0xff]  ;;  %v3026_v45 = vadd.f32 %v3864_v43, %v2817_v13 }
 0xcfa   : > { %3096 = vst.msk [vmem:[%s5374_s9 + $0x50] sm:$0xff] %vm296_vm0, %v3080_v53  ;;  %v3078_v41 = vadd.f32 %v5368_v29, %v3055_v2  ;;  %v2997_v44 = vpop.f32.mrf.mxu1 }
 0xcfb   : > { %v3058_v0 = vld [vmem:[#allocation2 + $0x58] sm:$0xff]  ;;  %3042 = vst.msk [vmem:[#allocation2 + $0x70] sm:$0xff] %vm296_vm0, %v3026_v45  ;;  %v3024_v21 = vadd.f32 %v2997_v44, %v2815_v22 }
 0xcfc   : > { %3094 = vst.msk [vmem:[%s5374_s9 + $0x40] sm:$0xff] %vm296_vm0, %v3078_v41  ;;  %v3081_v46 = vadd.f32 %v5368_v29, %v3058_v0  ;;  %v3865_v7 = vpop.f32.mrf.mxu1 }
 0xcfd   : > { %v3056_v38 = vld [vmem:[#allocation2 + $0x48] sm:$0xff]  ;;  %3040 = vst.msk [vmem:[#allocation2 + $0x60] sm:$0xff] %vm296_vm0, %v3024_v21  ;;  %v3027_v42 = vadd.f32 %v3865_v7, %v2818_v63 }
 0xcfe   : > { %3097 = vst.msk [vmem:[%s5374_s9 + $0x58] sm:$0xff] %vm296_vm0, %v3081_v46  ;;  %v3079_v51 = vadd.f32 %v5368_v29, %v3056_v38  ;;  %v3000_v15 = vpop.f32.mrf.mxu1 }
 0xcff   : > { %3043 = vst.msk [vmem:[#allocation2 + $0x78] sm:$0xff] %vm296_vm0, %v3027_v42  ;;  %v3025_v14 = vadd.f32 %v3000_v15, %v2816_v12 }
 0xd00   : > { %3095 = vst.msk [vmem:[%s5374_s9 + $0x48] sm:$0xff] %vm296_vm0, %v3079_v51 }
 0xd01   : > { %3041 = vst.msk [vmem:[#allocation2 + $0x68] sm:$0xff] %vm296_vm0, %v3025_v14 }
 0xd02   : > { %v3061_v16 = vld [vmem:[#allocation2 + $0x70] sm:$0xff] }
 0xd03   : > { %v3084_v49 = vadd.f32 %v5368_v29, %v3061_v16 }
 0xd04   : > { %v3059_v10 = vld [vmem:[#allocation2 + $0x60] sm:$0xff] }
 0xd05   : > { %3100 = vst.msk [vmem:[%s5374_s9 + $0x70] sm:$0xff] %vm296_vm0, %v3084_v49  ;;  %v3082_v6 = vadd.f32 %v5368_v29, %v3059_v10 }
 0xd06   : > { %v3062_v11 = vld [vmem:[#allocation2 + $0x78] sm:$0xff] }
 0xd07   : > { %3098 = vst.msk [vmem:[%s5374_s9 + $0x60] sm:$0xff] %vm296_vm0, %v3082_v6  ;;  %v3085_v9 = vadd.f32 %v5368_v29, %v3062_v11 }
 0xd08   : > { %v3060_v24 = vld [vmem:[#allocation2 + $0x68] sm:$0xff] }
 0xd09   : > { %3101 = vst.msk [vmem:[%s5374_s9 + $0x78] sm:$0xff] %vm296_vm0, %v3085_v9  ;;  %v3083_v48 = vadd.f32 %v5368_v29, %v3060_v24 }
 0xd0b   : > { %3099 = vst.msk [vmem:[%s5374_s9 + $0x68] sm:$0xff] %vm296_vm0, %v3083_v48 }
 0xd0c PF: > { %s15_s20 = sadd.s32 1, %s4252_s20   ;;  %s5459_s18 = smov %s4248_s19 }
 0xd0d   : > { %p12_p5 = scmp.ge.s32.totalorder %s15_s20, 4   ;;  %s5460_s19 = smov %s5462_s21 }
 0xd0f   :  { %14 = sbr.rel (!%p12_p5) target bundleno = 2 (0x2), region = 87 }

</bundles_post_ra>
